<compile_context>
chip_gen: v7x
topology: tpu7x:2x2x1
jax: 0.10.0
libtpu: 0.0.40
codegen_flags: <defaults>
</compile_context>

<pallas_src>
import functools

import jax
import jax.numpy as jnp
from jax import lax
from jax.experimental import pallas as pl
from jax.experimental.pallas import tpu as pltpu


# ----------------------------------------------------------------------------
# helpers
# ----------------------------------------------------------------------------
def _round_up(x, m):
    return (x + m - 1) // m * m


def _pad_axis(x, axis, new_size):
    pad = new_size - x.shape[axis]
    if pad == 0:
        return x
    widths = [(0, 0)] * x.ndim
    widths[axis] = (0, pad)
    return jnp.pad(x, widths)


def _pick_chunk(t, max_chunk=128):
    """Largest divisor of t that is <= max_chunk (chunked time loop)."""
    if t <= max_chunk:
        return t
    best = 1
    for c in range(1, max_chunk + 1):
        if t % c == 0:
            best = c
    return best


# ----------------------------------------------------------------------------
# Pallas kernel: one GRU direction, time loop inside the kernel.
# grid = (num_chunks,) "arbitrary"; hidden state carried in VMEM scratch.
# Inputs:
#   gi_ref : (CHUNK, Bp, 3*Hp)  precomputed input gates (+ folded biases)
#   whh_ref: (Hp, 3*Hp)         W_hh pre-transposed (resident)
#   bhn_ref: (Bp, Hp)           b_hn pre-broadcast (resident)
#   h0_ref : (Bp, Hp)           initial hidden (resident)
# Outputs:
#   [out_ref (CHUNK, Bp, Hp)]   per-step hidden (omitted if write_out=False)
#   hT_ref  (Bp, Hp)            final hidden
# ----------------------------------------------------------------------------
def _gru_seq_kernel(gi_ref, whh_ref, bhn_ref, h0_ref, *refs,
                    chunk, reverse, write_out):
    if write_out:
        out_ref, hT_ref, h_scratch = refs
    else:
        hT_ref, h_scratch = refs
        out_ref = None

    c = pl.program_id(0)

    @pl.when(c == 0)
    def _():
        h_scratch[...] = h0_ref[...]

    Bp, Hp = h_scratch.shape
    whh = whh_ref[...]          # (Hp, 3Hp) — stays in VMEM, hoisted from loop
    bhn = bhn_ref[...]          # (Bp, Hp)  — pre-broadcast, no per-step bcast

    def step(i, h):
        # reversed direction processes the chunk back-to-front
        t = (chunk - 1 - i) if reverse else i
        g = gi_ref[t]                                         # (Bp, 3Hp)
        gh = jnp.dot(h, whh, preferred_element_type=jnp.float32)
        r = jax.nn.sigmoid(g[:, :Hp] + gh[:, :Hp])
        z = jax.nn.sigmoid(g[:, Hp:2 * Hp] + gh[:, Hp:2 * Hp])
        n = jnp.tanh(g[:, 2 * Hp:] + r * (gh[:, 2 * Hp:] + bhn))
        h_new = (1.0 - z) * n + z * h
        if write_out:
            out_ref[t] = h_new
        return h_new

    h_final = lax.fori_loop(0, chunk, step, h_scratch[...],
                            unroll=(chunk <= 16))
    h_scratch[...] = h_final

    @pl.when(c == pl.num_programs(0) - 1)
    def _():
        hT_ref[...] = h_final


def gru_direction(gi, w_hh_t, b_hn, h0, *, reverse, write_out=True):
    """Run one GRU direction over the padded, precomputed input-gate slab."""
    T, Bp, G = gi.shape
    Hp = G // 3
    chunk = _pick_chunk(T)
    nc = T // chunk

    if reverse:
        seq_map = lambda c: (nc - 1 - c, 0, 0)     # stream chunks back-to-front
    else:
        seq_map = lambda c: (c, 0, 0)
    const2 = lambda c: (0, 0)                      # invariant operands

    in_specs = [
        pl.BlockSpec((chunk, Bp, 3 * Hp), seq_map),   # gi chunk (streamed)
        pl.BlockSpec((Hp, 3 * Hp), const2),           # W_hh^T (fetched once)
        pl.BlockSpec((Bp, Hp), const2),               # b_hn
        pl.BlockSpec((Bp, Hp), const2),               # h0
    ]
    if write_out:
        out_shape = (jax.ShapeDtypeStruct((T, Bp, Hp), jnp.float32),
                     jax.ShapeDtypeStruct((Bp, Hp), jnp.float32))
        out_specs = (pl.BlockSpec((chunk, Bp, Hp), seq_map),
                     pl.BlockSpec((Bp, Hp), const2))
    else:
        out_shape = jax.ShapeDtypeStruct((Bp, Hp), jnp.float32)
        out_specs = pl.BlockSpec((Bp, Hp), const2)

    kernel = functools.partial(_gru_seq_kernel, chunk=chunk,
                               reverse=reverse, write_out=write_out)

    res = pl.pallas_call(
        kernel,
        out_shape=out_shape,
        grid_spec=pltpu.PrefetchScalarGridSpec(
            num_scalar_prefetch=0,
            grid=(nc,),
            in_specs=in_specs,
            out_specs=out_specs,
            scratch_shapes=[pltpu.VMEM((Bp, Hp), jnp.float32)],
        ),
        compiler_params=pltpu.CompilerParams(
            dimension_semantics=("arbitrary",),
            vmem_limit_bytes=64 * 1024 * 1024),
    )(gi, w_hh_t, b_hn, h0)

    if write_out:
        return res[0], res[1]
    return None, res


# ----------------------------------------------------------------------------
# Per-direction parameter preparation (pad + transpose + bias folding).
# PyTorch GRU:
#   r = sig(W_ir x + b_ir + W_hr h + b_hr)
#   z = sig(W_iz x + b_iz + W_hz h + b_hz)
#   n = tanh(W_in x + b_in + r * (W_hn h + b_hn))
# b_ih and the r/z parts of b_hh are folded into the precomputed gi slab;
# only b_hn must remain inside the r*(...) term.
# ----------------------------------------------------------------------------
def _prepare_direction(p, H, Hp, Bp, in_is_hidden):
    w_ih, w_hh = p["w_ih"], p["w_hh"]
    b_ih, b_hh = p["b_ih"], p["b_hh"]

    b_fold = b_ih + jnp.concatenate([b_hh[:2 * H],
                                     jnp.zeros((H,), b_hh.dtype)])
    b_fold = _pad_axis(b_fold.reshape(3, H), 1, Hp).reshape(1, 1, 3 * Hp)

    # W_ih: pad gate rows; pad input columns per [fwd|bwd] half if the input
    # is the (already padded) hidden of the previous layer. Pre-transpose.
    w = _pad_axis(w_ih.reshape(3, H, -1), 1, Hp).reshape(3 * Hp, -1)
    if in_is_hidden:
        w = _pad_axis(w.reshape(3 * Hp, 2, H), 2, Hp).reshape(3 * Hp, 2 * Hp)
    w_ih_t = w.T                                           # (In_p, 3Hp)

    # W_hh: pre-transpose to (H, 3H), pad both dims -> (Hp, 3Hp), lane-dense.
    w_hh_t = _pad_axis(_pad_axis(w_hh.T.reshape(H, 3, H), 2, Hp),
                       0, Hp).reshape(Hp, 3 * Hp)

    # b_hn pre-broadcast so the kernel never re-broadcasts per timestep.
    b_hn = jnp.broadcast_to(_pad_axis(b_hh[2 * H:], 0, Hp)[None, :], (Bp, Hp))

    return w_ih_t, b_fold, w_hh_t, b_hn


# ----------------------------------------------------------------------------
# Encoder forward (embedding + bidirectional multi-layer GRU)
# ----------------------------------------------------------------------------
def encoder_forward(params, src, hidden=None):
    """src: (T, B) int32.  Returns (outputs (T,B,H), hidden (2L,B,H))."""
    T, B = src.shape
    layers = params["layers"]
    L = len(layers)
    H = layers[0]["fwd"]["w_hh"].shape[-1]
    Hp = _round_up(H, 128)
    Bp = _round_up(B, 8)

    embedded = jnp.take(params["embedding"], src, axis=0)      # (T, B, E) glue
    x = _pad_axis(embedded, 1, Bp)                             # (T, Bp, E)

    if hidden is None:
        hidden = jnp.zeros((2 * L, B, H), jnp.float32)
    h0_p = _pad_axis(_pad_axis(hidden.astype(jnp.float32), 2, Hp), 1, Bp)

    h_finals = []
    out_f_last = None
    for li, layer in enumerate(layers):
        last = (li == L - 1)
        outs = []
        for di, dname in enumerate(("fwd", "bwd")):
            p = layer[dname]
            w_ih_t, b_fold, w_hh_t, b_hn = _prepare_direction(
                p, H, Hp, Bp, in_is_hidden=(li > 0))
            # Batched input projection over the whole sequence (one big matmul)
            gi = jnp.einsum("tbi,ig->tbg", x, w_ih_t,
                            preferred_element_type=jnp.float32) + b_fold
            reverse = (dname == "bwd")
            # Last layer's backward output sequence is never consumed.
            want_out = not (last and reverse)
            out_d, h_d = gru_direction(gi, w_hh_t, b_hn, h0_p[2 * li + di],
                                       reverse=reverse, write_out=want_out)
            outs.append(out_d)
            h_finals.append(h_d[:B, :H])
        if last:
            out_f_last = outs[0]
        else:
            # keep padded layout between layers (no unpad/repad round trips)
            x = jnp.concatenate(outs, axis=-1)                 # (T, Bp, 2Hp)
        # TODO(synk): nn.GRU inter-layer dropout omitted (inference semantics).

    # Module: outputs[:, :, :H] + outputs[:, :, :H]  == 2 * forward half.
    outputs = 2.0 * out_f_last[:, :B, :H]
    hidden_out = jnp.stack(h_finals, axis=0)                   # (2L, B, H)
    return outputs, hidden_out


# ----------------------------------------------------------------------------
# Deterministic parameter init (shapes from nn.Embedding / nn.GRU)
# ----------------------------------------------------------------------------
def init_params(key, input_size, embed_size, hidden_size, num_layers):
    keys = jax.random.split(key, 1 + num_layers * 2 * 4)
    ki = iter(keys)
    bound = 1.0 / jnp.sqrt(hidden_size)

    params = {"embedding": jax.random.normal(next(ki),
                                             (input_size, embed_size),
                                             jnp.float32)}
    layers = []
    for li in range(num_layers):
        in_dim = embed_size if li == 0 else 2 * hidden_size
        layer = {}
        for d in ("fwd", "bwd"):
            layer[d] = {
                "w_ih": jax.random.uniform(next(ki), (3 * hidden_size, in_dim),
                                           jnp.float32, -bound, bound),
                "w_hh": jax.random.uniform(next(ki),
                                           (3 * hidden_size, hidden_size),
                                           jnp.float32, -bound, bound),
                "b_ih": jax.random.uniform(next(ki), (3 * hidden_size,),
                                           jnp.float32, -bound, bound),
                "b_hh": jax.random.uniform(next(ki), (3 * hidden_size,),
                                           jnp.float32, -bound, bound),
            }
        layers.append(layer)
    params["layers"] = layers
    return params


# ----------------------------------------------------------------------------
# Pure-JAX reference (sanity check)
# ----------------------------------------------------------------------------
def _encoder_ref(params, src, hidden=None):
    emb = jnp.take(params["embedding"], src, axis=0)
    L = len(params["layers"])
    H = params["layers"][0]["fwd"]["w_hh"].shape[-1]
    T, B = src.shape
    if hidden is None:
        hidden = jnp.zeros((2 * L, B, H), jnp.float32)

    def gru_dir_ref(x_seq, p, h0):
        def step(h, x):
            gi = x @ p["w_ih"].T + p["b_ih"]
            gh = h @ p["w_hh"].T + p["b_hh"]
            r = jax.nn.sigmoid(gi[:, :H] + gh[:, :H])
            z = jax.nn.sigmoid(gi[:, H:2 * H] + gh[:, H:2 * H])
            n = jnp.tanh(gi[:, 2 * H:] + r * gh[:, 2 * H:])
            h_new = (1.0 - z) * n + z * h
            return h_new, h_new
        h_last, outs = lax.scan(step, h0, x_seq)
        return outs, h_last

    x = emb
    hs = []
    for li, layer in enumerate(params["layers"]):
        of, hf = gru_dir_ref(x, layer["fwd"], hidden[2 * li])
        ob_r, hb = gru_dir_ref(x[::-1], layer["bwd"], hidden[2 * li + 1])
        ob = ob_r[::-1]
        x = jnp.concatenate([of, ob], axis=-1)
        hs += [hf, hb]
    outputs = x[:, :, :H] + x[:, :, :H]
    return outputs, jnp.stack(hs, 0)


if __name__ == "__main__":
    VOCAB, EMBED, HIDDEN, LAYERS = 32, 16, 16, 2
    T, B = 8, 2

    key = jax.random.PRNGKey(0)
    k_param, k_src = jax.random.split(key)
    params = init_params(k_param, VOCAB, EMBED, HIDDEN, LAYERS)
    src = jax.random.randint(k_src, (T, B), 0, VOCAB, dtype=jnp.int32)

    fwd = jax.jit(functools.partial(encoder_forward, params))
    outputs, hidden = fwd(src)
    outputs = jax.block_until_ready(outputs)
    hidden = jax.block_until_ready(hidden)

    assert outputs.shape == (T, B, HIDDEN)
    assert hidden.shape == (2 * LAYERS, B, HIDDEN)

    out_ref, hid_ref = _encoder_ref(params, src)
    assert jnp.allclose(outputs, out_ref, atol=2e-2, rtol=2e-2)
    assert jnp.allclose(hidden, hid_ref, atol=2e-2, rtol=2e-2)

    print("KERNEL_OK")
</pallas_src>

<mosaic_0001>
module attributes {stable_mosaic.version = 11 : i64} {
  func.func @_gru_seq_kernel(%arg0: i32, %arg1: memref<8x8x384xf32, #tpu.memory_space<vmem>>, %arg2: memref<128x384xf32, #tpu.memory_space<vmem>>, %arg3: memref<8x128xf32, #tpu.memory_space<vmem>>, %arg4: memref<8x128xf32, #tpu.memory_space<vmem>>, %arg5: memref<8x8x128xf32, #tpu.memory_space<vmem>>, %arg6: memref<8x128xf32, #tpu.memory_space<vmem>>, %arg7: memref<8x128xf32, #tpu.memory_space<vmem>>) attributes {dimension_semantics = [#tpu.dimension_semantics<arbitrary>], iteration_bounds = array<i64: 1>, scalar_prefetch = 0 : i64, scratch_operands = 1 : i64, tpu.core_type = #tpu.core_type<tc>, window_params = [{transform_indices = @transform_0, window_bounds = array<i64: 8, 8, 384>}, {pipeline_mode = #tpu.pipeline_mode<synchronous>, transform_indices = @transform_1, window_bounds = array<i64: 128, 384>}, {pipeline_mode = #tpu.pipeline_mode<synchronous>, transform_indices = @transform_2, window_bounds = array<i64: 8, 128>}, {pipeline_mode = #tpu.pipeline_mode<synchronous>, transform_indices = @transform_3, window_bounds = array<i64: 8, 128>}, {transform_indices = @transform_4, window_bounds = array<i64: 8, 8, 128>}, {pipeline_mode = #tpu.pipeline_mode<synchronous>, transform_indices = @transform_5, window_bounds = array<i64: 8, 128>}]} {
    %c0_i32 = arith.constant 0 : i32
    %0 = arith.cmpi eq, %arg0, %c0_i32 : i32
    %1 = arith.extui %0 : i1 to i32
    %c0_i32_0 = arith.constant 0 : i32
    %2 = arith.cmpi ne, %1, %c0_i32_0 : i32
    scf.if %2 {
      %c0_74 = arith.constant 0 : index
      %c0_75 = arith.constant 0 : index
      %290 = vector.load %arg4[%c0_74, %c0_75] : memref<8x128xf32, #tpu.memory_space<vmem>>, vector<8x128xf32>
      %c0_76 = arith.constant 0 : index
      %c0_77 = arith.constant 0 : index
      %291 = vector.load %arg7[%c0_76, %c0_77] : memref<8x128xf32, #tpu.memory_space<vmem>>, vector<8x128xf32>
      tpu.vector_store %arg7[%c0_76, %c0_77], %290 {strides = array<i32>} : memref<8x128xf32, #tpu.memory_space<vmem>>, vector<8x128xf32>,
    } else {
    }
    %c0 = arith.constant 0 : index
    %c0_1 = arith.constant 0 : index
    %3 = vector.load %arg2[%c0, %c0_1] : memref<128x384xf32, #tpu.memory_space<vmem>>, vector<128x384xf32>
    %c0_2 = arith.constant 0 : index
    %c0_3 = arith.constant 0 : index
    %4 = vector.load %arg3[%c0_2, %c0_3] : memref<8x128xf32, #tpu.memory_space<vmem>>, vector<8x128xf32>
    %c0_4 = arith.constant 0 : index
    %c0_5 = arith.constant 0 : index
    %5 = vector.load %arg7[%c0_4, %c0_5] : memref<8x128xf32, #tpu.memory_space<vmem>>, vector<8x128xf32>
    %c0_i32_6 = arith.constant 0 : i32
    %6 = arith.index_cast %c0_i32_6 : i32 to index
    %c0_7 = arith.constant 0 : index
    %c0_8 = arith.constant 0 : index
    %7 = vector.load %arg1[%6, %c0_7, %c0_8] : memref<8x8x384xf32, #tpu.memory_space<vmem>>, vector<1x8x384xf32>
    %8 = vector.shape_cast %7 : vector<1x8x384xf32> to vector<8x384xf32>
    %cst = arith.constant dense<0.000000e+00> : vector<8x384xf32>
    %9 = tpu.matmul %5, %3, %cst {dimension_numbers = #tpu.dot_dimension_numbers<[1], [0], [0], [1], [0, 0, 1, 1], [], []>} : vector<8x128xf32>, vector<128x384xf32>, vector<8x384xf32> -> vector<8x384xf32>
    %10 = vector.extract_strided_slice %8 {offsets = [0, 0], sizes = [8, 128], strides = [1, 1]} : vector<8x384xf32> to vector<8x128xf32>
    %11 = vector.extract_strided_slice %9 {offsets = [0, 0], sizes = [8, 128], strides = [1, 1]} : vector<8x384xf32> to vector<8x128xf32>
    %12 = arith.addf %10, %11 : vector<8x128xf32>
    %13 = arith.negf %12 : vector<8x128xf32>
    %14 = math.exp %13 : vector<8x128xf32>
    %cst_9 = arith.constant 1.000000e+00 : f32
    %15 = vector.broadcast %cst_9 : f32 to vector<8x128xf32>
    %16 = arith.addf %15, %14 : vector<8x128xf32>
    %17 = arith.divf %15, %16 : vector<8x128xf32>
    %18 = vector.extract_strided_slice %8 {offsets = [0, 128], sizes = [8, 128], strides = [1, 1]} : vector<8x384xf32> to vector<8x128xf32>
    %19 = vector.extract_strided_slice %9 {offsets = [0, 128], sizes = [8, 128], strides = [1, 1]} : vector<8x384xf32> to vector<8x128xf32>
    %20 = arith.addf %18, %19 : vector<8x128xf32>
    %21 = arith.negf %20 : vector<8x128xf32>
    %22 = math.exp %21 : vector<8x128xf32>
    %cst_10 = arith.constant 1.000000e+00 : f32
    %23 = vector.broadcast %cst_10 : f32 to vector<8x128xf32>
    %24 = arith.addf %23, %22 : vector<8x128xf32>
    %25 = arith.divf %23, %24 : vector<8x128xf32>
    %26 = vector.extract_strided_slice %8 {offsets = [0, 256], sizes = [8, 128], strides = [1, 1]} : vector<8x384xf32> to vector<8x128xf32>
    %27 = vector.extract_strided_slice %9 {offsets = [0, 256], sizes = [8, 128], strides = [1, 1]} : vector<8x384xf32> to vector<8x128xf32>
    %28 = arith.addf %27, %4 : vector<8x128xf32>
    %29 = arith.mulf %17, %28 : vector<8x128xf32>
    %30 = arith.addf %26, %29 : vector<8x128xf32>
    %31 = math.tanh %30 : vector<8x128xf32>
    %cst_11 = arith.constant 1.000000e+00 : f32
    %32 = vector.broadcast %cst_11 : f32 to vector<8x128xf32>
    %33 = arith.subf %32, %25 : vector<8x128xf32>
    %34 = arith.mulf %33, %31 : vector<8x128xf32>
    %35 = arith.mulf %25, %5 : vector<8x128xf32>
    %36 = arith.addf %34, %35 : vector<8x128xf32>
    %37 = arith.index_cast %c0_i32_6 : i32 to index
    %c0_12 = arith.constant 0 : index
    %c0_13 = arith.constant 0 : index
    %38 = vector.load %arg5[%37, %c0_12, %c0_13] : memref<8x8x128xf32, #tpu.memory_space<vmem>>, vector<1x8x128xf32>
    %39 = vector.shape_cast %38 : vector<1x8x128xf32> to vector<8x128xf32>
    %40 = vector.shape_cast %36 : vector<8x128xf32> to vector<1x8x128xf32>
    tpu.vector_store %arg5[%37, %c0_12, %c0_13], %40 {strides = array<i32>} : memref<8x8x128xf32, #tpu.memory_space<vmem>>, vector<1x8x128xf32>,
    %c1_i32 = arith.constant 1 : i32
    %41 = arith.index_cast %c1_i32 : i32 to index
    %c0_14 = arith.constant 0 : index
    %c0_15 = arith.constant 0 : index
    %42 = vector.load %arg1[%41, %c0_14, %c0_15] : memref<8x8x384xf32, #tpu.memory_space<vmem>>, vector<1x8x384xf32>
    %43 = vector.shape_cast %42 : vector<1x8x384xf32> to vector<8x384xf32>
    %cst_16 = arith.constant dense<0.000000e+00> : vector<8x384xf32>
    %44 = tpu.matmul %36, %3, %cst_16 {dimension_numbers = #tpu.dot_dimension_numbers<[1], [0], [0], [1], [0, 0, 1, 1], [], []>} : vector<8x128xf32>, vector<128x384xf32>, vector<8x384xf32> -> vector<8x384xf32>
    %45 = vector.extract_strided_slice %43 {offsets = [0, 0], sizes = [8, 128], strides = [1, 1]} : vector<8x384xf32> to vector<8x128xf32>
    %46 = vector.extract_strided_slice %44 {offsets = [0, 0], sizes = [8, 128], strides = [1, 1]} : vector<8x384xf32> to vector<8x128xf32>
    %47 = arith.addf %45, %46 : vector<8x128xf32>
    %48 = arith.negf %47 : vector<8x128xf32>
    %49 = math.exp %48 : vector<8x128xf32>
    %cst_17 = arith.constant 1.000000e+00 : f32
    %50 = vector.broadcast %cst_17 : f32 to vector<8x128xf32>
    %51 = arith.addf %50, %49 : vector<8x128xf32>
    %52 = arith.divf %50, %51 : vector<8x128xf32>
    %53 = vector.extract_strided_slice %43 {offsets = [0, 128], sizes = [8, 128], strides = [1, 1]} : vector<8x384xf32> to vector<8x128xf32>
    %54 = vector.extract_strided_slice %44 {offsets = [0, 128], sizes = [8, 128], strides = [1, 1]} : vector<8x384xf32> to vector<8x128xf32>
    %55 = arith.addf %53, %54 : vector<8x128xf32>
    %56 = arith.negf %55 : vector<8x128xf32>
    %57 = math.exp %56 : vector<8x128xf32>
    %cst_18 = arith.constant 1.000000e+00 : f32
    %58 = vector.broadcast %cst_18 : f32 to vector<8x128xf32>
    %59 = arith.addf %58, %57 : vector<8x128xf32>
    %60 = arith.divf %58, %59 : vector<8x128xf32>
    %61 = vector.extract_strided_slice %43 {offsets = [0, 256], sizes = [8, 128], strides = [1, 1]} : vector<8x384xf32> to vector<8x128xf32>
    %62 = vector.extract_strided_slice %44 {offsets = [0, 256], sizes = [8, 128], strides = [1, 1]} : vector<8x384xf32> to vector<8x128xf32>
    %63 = arith.addf %62, %4 : vector<8x128xf32>
    %64 = arith.mulf %52, %63 : vector<8x128xf32>
    %65 = arith.addf %61, %64 : vector<8x128xf32>
    %66 = math.tanh %65 : vector<8x128xf32>
    %cst_19 = arith.constant 1.000000e+00 : f32
    %67 = vector.broadcast %cst_19 : f32 to vector<8x128xf32>
    %68 = arith.subf %67, %60 : vector<8x128xf32>
    %69 = arith.mulf %68, %66 : vector<8x128xf32>
    %70 = arith.mulf %60, %36 : vector<8x128xf32>
    %71 = arith.addf %69, %70 : vector<8x128xf32>
    %72 = arith.index_cast %c1_i32 : i32 to index
    %c0_20 = arith.constant 0 : index
    %c0_21 = arith.constant 0 : index
    %73 = vector.load %arg5[%72, %c0_20, %c0_21] : memref<8x8x128xf32, #tpu.memory_space<vmem>>, vector<1x8x128xf32>
    %74 = vector.shape_cast %73 : vector<1x8x128xf32> to vector<8x128xf32>
    %75 = vector.shape_cast %71 : vector<8x128xf32> to vector<1x8x128xf32>
    tpu.vector_store %arg5[%72, %c0_20, %c0_21], %75 {strides = array<i32>} : memref<8x8x128xf32, #tpu.memory_space<vmem>>, vector<1x8x128xf32>,
    %c2_i32 = arith.constant 2 : i32
    %76 = arith.index_cast %c2_i32 : i32 to index
    %c0_22 = arith.constant 0 : index
    %c0_23 = arith.constant 0 : index
    %77 = vector.load %arg1[%76, %c0_22, %c0_23] : memref<8x8x384xf32, #tpu.memory_space<vmem>>, vector<1x8x384xf32>
    %78 = vector.shape_cast %77 : vector<1x8x384xf32> to vector<8x384xf32>
    %cst_24 = arith.constant dense<0.000000e+00> : vector<8x384xf32>
    %79 = tpu.matmul %71, %3, %cst_24 {dimension_numbers = #tpu.dot_dimension_numbers<[1], [0], [0], [1], [0, 0, 1, 1], [], []>} : vector<8x128xf32>, vector<128x384xf32>, vector<8x384xf32> -> vector<8x384xf32>
    %80 = vector.extract_strided_slice %78 {offsets = [0, 0], sizes = [8, 128], strides = [1, 1]} : vector<8x384xf32> to vector<8x128xf32>
    %81 = vector.extract_strided_slice %79 {offsets = [0, 0], sizes = [8, 128], strides = [1, 1]} : vector<8x384xf32> to vector<8x128xf32>
    %82 = arith.addf %80, %81 : vector<8x128xf32>
    %83 = arith.negf %82 : vector<8x128xf32>
    %84 = math.exp %83 : vector<8x128xf32>
    %cst_25 = arith.constant 1.000000e+00 : f32
    %85 = vector.broadcast %cst_25 : f32 to vector<8x128xf32>
    %86 = arith.addf %85, %84 : vector<8x128xf32>
    %87 = arith.divf %85, %86 : vector<8x128xf32>
    %88 = vector.extract_strided_slice %78 {offsets = [0, 128], sizes = [8, 128], strides = [1, 1]} : vector<8x384xf32> to vector<8x128xf32>
    %89 = vector.extract_strided_slice %79 {offsets = [0, 128], sizes = [8, 128], strides = [1, 1]} : vector<8x384xf32> to vector<8x128xf32>
    %90 = arith.addf %88, %89 : vector<8x128xf32>
    %91 = arith.negf %90 : vector<8x128xf32>
    %92 = math.exp %91 : vector<8x128xf32>
    %cst_26 = arith.constant 1.000000e+00 : f32
    %93 = vector.broadcast %cst_26 : f32 to vector<8x128xf32>
    %94 = arith.addf %93, %92 : vector<8x128xf32>
    %95 = arith.divf %93, %94 : vector<8x128xf32>
    %96 = vector.extract_strided_slice %78 {offsets = [0, 256], sizes = [8, 128], strides = [1, 1]} : vector<8x384xf32> to vector<8x128xf32>
    %97 = vector.extract_strided_slice %79 {offsets = [0, 256], sizes = [8, 128], strides = [1, 1]} : vector<8x384xf32> to vector<8x128xf32>
    %98 = arith.addf %97, %4 : vector<8x128xf32>
    %99 = arith.mulf %87, %98 : vector<8x128xf32>
    %100 = arith.addf %96, %99 : vector<8x128xf32>
    %101 = math.tanh %100 : vector<8x128xf32>
    %cst_27 = arith.constant 1.000000e+00 : f32
    %102 = vector.broadcast %cst_27 : f32 to vector<8x128xf32>
    %103 = arith.subf %102, %95 : vector<8x128xf32>
    %104 = arith.mulf %103, %101 : vector<8x128xf32>
    %105 = arith.mulf %95, %71 : vector<8x128xf32>
    %106 = arith.addf %104, %105 : vector<8x128xf32>
    %107 = arith.index_cast %c2_i32 : i32 to index
    %c0_28 = arith.constant 0 : index
    %c0_29 = arith.constant 0 : index
    %108 = vector.load %arg5[%107, %c0_28, %c0_29] : memref<8x8x128xf32, #tpu.memory_space<vmem>>, vector<1x8x128xf32>
    %109 = vector.shape_cast %108 : vector<1x8x128xf32> to vector<8x128xf32>
    %110 = vector.shape_cast %106 : vector<8x128xf32> to vector<1x8x128xf32>
    tpu.vector_store %arg5[%107, %c0_28, %c0_29], %110 {strides = array<i32>} : memref<8x8x128xf32, #tpu.memory_space<vmem>>, vector<1x8x128xf32>,
    %c3_i32 = arith.constant 3 : i32
    %111 = arith.index_cast %c3_i32 : i32 to index
    %c0_30 = arith.constant 0 : index
    %c0_31 = arith.constant 0 : index
    %112 = vector.load %arg1[%111, %c0_30, %c0_31] : memref<8x8x384xf32, #tpu.memory_space<vmem>>, vector<1x8x384xf32>
    %113 = vector.shape_cast %112 : vector<1x8x384xf32> to vector<8x384xf32>
    %cst_32 = arith.constant dense<0.000000e+00> : vector<8x384xf32>
    %114 = tpu.matmul %106, %3, %cst_32 {dimension_numbers = #tpu.dot_dimension_numbers<[1], [0], [0], [1], [0, 0, 1, 1], [], []>} : vector<8x128xf32>, vector<128x384xf32>, vector<8x384xf32> -> vector<8x384xf32>
    %115 = vector.extract_strided_slice %113 {offsets = [0, 0], sizes = [8, 128], strides = [1, 1]} : vector<8x384xf32> to vector<8x128xf32>
    %116 = vector.extract_strided_slice %114 {offsets = [0, 0], sizes = [8, 128], strides = [1, 1]} : vector<8x384xf32> to vector<8x128xf32>
    %117 = arith.addf %115, %116 : vector<8x128xf32>
    %118 = arith.negf %117 : vector<8x128xf32>
    %119 = math.exp %118 : vector<8x128xf32>
    %cst_33 = arith.constant 1.000000e+00 : f32
    %120 = vector.broadcast %cst_33 : f32 to vector<8x128xf32>
    %121 = arith.addf %120, %119 : vector<8x128xf32>
    %122 = arith.divf %120, %121 : vector<8x128xf32>
    %123 = vector.extract_strided_slice %113 {offsets = [0, 128], sizes = [8, 128], strides = [1, 1]} : vector<8x384xf32> to vector<8x128xf32>
    %124 = vector.extract_strided_slice %114 {offsets = [0, 128], sizes = [8, 128], strides = [1, 1]} : vector<8x384xf32> to vector<8x128xf32>
    %125 = arith.addf %123, %124 : vector<8x128xf32>
    %126 = arith.negf %125 : vector<8x128xf32>
    %127 = math.exp %126 : vector<8x128xf32>
    %cst_34 = arith.constant 1.000000e+00 : f32
    %128 = vector.broadcast %cst_34 : f32 to vector<8x128xf32>
    %129 = arith.addf %128, %127 : vector<8x128xf32>
    %130 = arith.divf %128, %129 : vector<8x128xf32>
    %131 = vector.extract_strided_slice %113 {offsets = [0, 256], sizes = [8, 128], strides = [1, 1]} : vector<8x384xf32> to vector<8x128xf32>
    %132 = vector.extract_strided_slice %114 {offsets = [0, 256], sizes = [8, 128], strides = [1, 1]} : vector<8x384xf32> to vector<8x128xf32>
    %133 = arith.addf %132, %4 : vector<8x128xf32>
    %134 = arith.mulf %122, %133 : vector<8x128xf32>
    %135 = arith.addf %131, %134 : vector<8x128xf32>
    %136 = math.tanh %135 : vector<8x128xf32>
    %cst_35 = arith.constant 1.000000e+00 : f32
    %137 = vector.broadcast %cst_35 : f32 to vector<8x128xf32>
    %138 = arith.subf %137, %130 : vector<8x128xf32>
    %139 = arith.mulf %138, %136 : vector<8x128xf32>
    %140 = arith.mulf %130, %106 : vector<8x128xf32>
    %141 = arith.addf %139, %140 : vector<8x128xf32>
    %142 = arith.index_cast %c3_i32 : i32 to index
    %c0_36 = arith.constant 0 : index
    %c0_37 = arith.constant 0 : index
    %143 = vector.load %arg5[%142, %c0_36, %c0_37] : memref<8x8x128xf32, #tpu.memory_space<vmem>>, vector<1x8x128xf32>
    %144 = vector.shape_cast %143 : vector<1x8x128xf32> to vector<8x128xf32>
    %145 = vector.shape_cast %141 : vector<8x128xf32> to vector<1x8x128xf32>
    tpu.vector_store %arg5[%142, %c0_36, %c0_37], %145 {strides = array<i32>} : memref<8x8x128xf32, #tpu.memory_space<vmem>>, vector<1x8x128xf32>,
    %c4_i32 = arith.constant 4 : i32
    %146 = arith.index_cast %c4_i32 : i32 to index
    %c0_38 = arith.constant 0 : index
    %c0_39 = arith.constant 0 : index
    %147 = vector.load %arg1[%146, %c0_38, %c0_39] : memref<8x8x384xf32, #tpu.memory_space<vmem>>, vector<1x8x384xf32>
    %148 = vector.shape_cast %147 : vector<1x8x384xf32> to vector<8x384xf32>
    %cst_40 = arith.constant dense<0.000000e+00> : vector<8x384xf32>
    %149 = tpu.matmul %141, %3, %cst_40 {dimension_numbers = #tpu.dot_dimension_numbers<[1], [0], [0], [1], [0, 0, 1, 1], [], []>} : vector<8x128xf32>, vector<128x384xf32>, vector<8x384xf32> -> vector<8x384xf32>
    %150 = vector.extract_strided_slice %148 {offsets = [0, 0], sizes = [8, 128], strides = [1, 1]} : vector<8x384xf32> to vector<8x128xf32>
    %151 = vector.extract_strided_slice %149 {offsets = [0, 0], sizes = [8, 128], strides = [1, 1]} : vector<8x384xf32> to vector<8x128xf32>
    %152 = arith.addf %150, %151 : vector<8x128xf32>
    %153 = arith.negf %152 : vector<8x128xf32>
    %154 = math.exp %153 : vector<8x128xf32>
    %cst_41 = arith.constant 1.000000e+00 : f32
    %155 = vector.broadcast %cst_41 : f32 to vector<8x128xf32>
    %156 = arith.addf %155, %154 : vector<8x128xf32>
    %157 = arith.divf %155, %156 : vector<8x128xf32>
    %158 = vector.extract_strided_slice %148 {offsets = [0, 128], sizes = [8, 128], strides = [1, 1]} : vector<8x384xf32> to vector<8x128xf32>
    %159 = vector.extract_strided_slice %149 {offsets = [0, 128], sizes = [8, 128], strides = [1, 1]} : vector<8x384xf32> to vector<8x128xf32>
    %160 = arith.addf %158, %159 : vector<8x128xf32>
    %161 = arith.negf %160 : vector<8x128xf32>
    %162 = math.exp %161 : vector<8x128xf32>
    %cst_42 = arith.constant 1.000000e+00 : f32
    %163 = vector.broadcast %cst_42 : f32 to vector<8x128xf32>
    %164 = arith.addf %163, %162 : vector<8x128xf32>
    %165 = arith.divf %163, %164 : vector<8x128xf32>
    %166 = vector.extract_strided_slice %148 {offsets = [0, 256], sizes = [8, 128], strides = [1, 1]} : vector<8x384xf32> to vector<8x128xf32>
    %167 = vector.extract_strided_slice %149 {offsets = [0, 256], sizes = [8, 128], strides = [1, 1]} : vector<8x384xf32> to vector<8x128xf32>
    %168 = arith.addf %167, %4 : vector<8x128xf32>
    %169 = arith.mulf %157, %168 : vector<8x128xf32>
    %170 = arith.addf %166, %169 : vector<8x128xf32>
    %171 = math.tanh %170 : vector<8x128xf32>
    %cst_43 = arith.constant 1.000000e+00 : f32
    %172 = vector.broadcast %cst_43 : f32 to vector<8x128xf32>
    %173 = arith.subf %172, %165 : vector<8x128xf32>
    %174 = arith.mulf %173, %171 : vector<8x128xf32>
    %175 = arith.mulf %165, %141 : vector<8x128xf32>
    %176 = arith.addf %174, %175 : vector<8x128xf32>
    %177 = arith.index_cast %c4_i32 : i32 to index
    %c0_44 = arith.constant 0 : index
    %c0_45 = arith.constant 0 : index
    %178 = vector.load %arg5[%177, %c0_44, %c0_45] : memref<8x8x128xf32, #tpu.memory_space<vmem>>, vector<1x8x128xf32>
    %179 = vector.shape_cast %178 : vector<1x8x128xf32> to vector<8x128xf32>
    %180 = vector.shape_cast %176 : vector<8x128xf32> to vector<1x8x128xf32>
    tpu.vector_store %arg5[%177, %c0_44, %c0_45], %180 {strides = array<i32>} : memref<8x8x128xf32, #tpu.memory_space<vmem>>, vector<1x8x128xf32>,
    %c5_i32 = arith.constant 5 : i32
    %181 = arith.index_cast %c5_i32 : i32 to index
    %c0_46 = arith.constant 0 : index
    %c0_47 = arith.constant 0 : index
    %182 = vector.load %arg1[%181, %c0_46, %c0_47] : memref<8x8x384xf32, #tpu.memory_space<vmem>>, vector<1x8x384xf32>
    %183 = vector.shape_cast %182 : vector<1x8x384xf32> to vector<8x384xf32>
    %cst_48 = arith.constant dense<0.000000e+00> : vector<8x384xf32>
    %184 = tpu.matmul %176, %3, %cst_48 {dimension_numbers = #tpu.dot_dimension_numbers<[1], [0], [0], [1], [0, 0, 1, 1], [], []>} : vector<8x128xf32>, vector<128x384xf32>, vector<8x384xf32> -> vector<8x384xf32>
    %185 = vector.extract_strided_slice %183 {offsets = [0, 0], sizes = [8, 128], strides = [1, 1]} : vector<8x384xf32> to vector<8x128xf32>
    %186 = vector.extract_strided_slice %184 {offsets = [0, 0], sizes = [8, 128], strides = [1, 1]} : vector<8x384xf32> to vector<8x128xf32>
    %187 = arith.addf %185, %186 : vector<8x128xf32>
    %188 = arith.negf %187 : vector<8x128xf32>
    %189 = math.exp %188 : vector<8x128xf32>
    %cst_49 = arith.constant 1.000000e+00 : f32
    %190 = vector.broadcast %cst_49 : f32 to vector<8x128xf32>
    %191 = arith.addf %190, %189 : vector<8x128xf32>
    %192 = arith.divf %190, %191 : vector<8x128xf32>
    %193 = vector.extract_strided_slice %183 {offsets = [0, 128], sizes = [8, 128], strides = [1, 1]} : vector<8x384xf32> to vector<8x128xf32>
    %194 = vector.extract_strided_slice %184 {offsets = [0, 128], sizes = [8, 128], strides = [1, 1]} : vector<8x384xf32> to vector<8x128xf32>
    %195 = arith.addf %193, %194 : vector<8x128xf32>
    %196 = arith.negf %195 : vector<8x128xf32>
    %197 = math.exp %196 : vector<8x128xf32>
    %cst_50 = arith.constant 1.000000e+00 : f32
    %198 = vector.broadcast %cst_50 : f32 to vector<8x128xf32>
    %199 = arith.addf %198, %197 : vector<8x128xf32>
    %200 = arith.divf %198, %199 : vector<8x128xf32>
    %201 = vector.extract_strided_slice %183 {offsets = [0, 256], sizes = [8, 128], strides = [1, 1]} : vector<8x384xf32> to vector<8x128xf32>
    %202 = vector.extract_strided_slice %184 {offsets = [0, 256], sizes = [8, 128], strides = [1, 1]} : vector<8x384xf32> to vector<8x128xf32>
    %203 = arith.addf %202, %4 : vector<8x128xf32>
    %204 = arith.mulf %192, %203 : vector<8x128xf32>
    %205 = arith.addf %201, %204 : vector<8x128xf32>
    %206 = math.tanh %205 : vector<8x128xf32>
    %cst_51 = arith.constant 1.000000e+00 : f32
    %207 = vector.broadcast %cst_51 : f32 to vector<8x128xf32>
    %208 = arith.subf %207, %200 : vector<8x128xf32>
    %209 = arith.mulf %208, %206 : vector<8x128xf32>
    %210 = arith.mulf %200, %176 : vector<8x128xf32>
    %211 = arith.addf %209, %210 : vector<8x128xf32>
    %212 = arith.index_cast %c5_i32 : i32 to index
    %c0_52 = arith.constant 0 : index
    %c0_53 = arith.constant 0 : index
    %213 = vector.load %arg5[%212, %c0_52, %c0_53] : memref<8x8x128xf32, #tpu.memory_space<vmem>>, vector<1x8x128xf32>
    %214 = vector.shape_cast %213 : vector<1x8x128xf32> to vector<8x128xf32>
    %215 = vector.shape_cast %211 : vector<8x128xf32> to vector<1x8x128xf32>
    tpu.vector_store %arg5[%212, %c0_52, %c0_53], %215 {strides = array<i32>} : memref<8x8x128xf32, #tpu.memory_space<vmem>>, vector<1x8x128xf32>,
    %c6_i32 = arith.constant 6 : i32
    %216 = arith.index_cast %c6_i32 : i32 to index
    %c0_54 = arith.constant 0 : index
    %c0_55 = arith.constant 0 : index
    %217 = vector.load %arg1[%216, %c0_54, %c0_55] : memref<8x8x384xf32, #tpu.memory_space<vmem>>, vector<1x8x384xf32>
    %218 = vector.shape_cast %217 : vector<1x8x384xf32> to vector<8x384xf32>
    %cst_56 = arith.constant dense<0.000000e+00> : vector<8x384xf32>
    %219 = tpu.matmul %211, %3, %cst_56 {dimension_numbers = #tpu.dot_dimension_numbers<[1], [0], [0], [1], [0, 0, 1, 1], [], []>} : vector<8x128xf32>, vector<128x384xf32>, vector<8x384xf32> -> vector<8x384xf32>
    %220 = vector.extract_strided_slice %218 {offsets = [0, 0], sizes = [8, 128], strides = [1, 1]} : vector<8x384xf32> to vector<8x128xf32>
    %221 = vector.extract_strided_slice %219 {offsets = [0, 0], sizes = [8, 128], strides = [1, 1]} : vector<8x384xf32> to vector<8x128xf32>
    %222 = arith.addf %220, %221 : vector<8x128xf32>
    %223 = arith.negf %222 : vector<8x128xf32>
    %224 = math.exp %223 : vector<8x128xf32>
    %cst_57 = arith.constant 1.000000e+00 : f32
    %225 = vector.broadcast %cst_57 : f32 to vector<8x128xf32>
    %226 = arith.addf %225, %224 : vector<8x128xf32>
    %227 = arith.divf %225, %226 : vector<8x128xf32>
    %228 = vector.extract_strided_slice %218 {offsets = [0, 128], sizes = [8, 128], strides = [1, 1]} : vector<8x384xf32> to vector<8x128xf32>
    %229 = vector.extract_strided_slice %219 {offsets = [0, 128], sizes = [8, 128], strides = [1, 1]} : vector<8x384xf32> to vector<8x128xf32>
    %230 = arith.addf %228, %229 : vector<8x128xf32>
    %231 = arith.negf %230 : vector<8x128xf32>
    %232 = math.exp %231 : vector<8x128xf32>
    %cst_58 = arith.constant 1.000000e+00 : f32
    %233 = vector.broadcast %cst_58 : f32 to vector<8x128xf32>
    %234 = arith.addf %233, %232 : vector<8x128xf32>
    %235 = arith.divf %233, %234 : vector<8x128xf32>
    %236 = vector.extract_strided_slice %218 {offsets = [0, 256], sizes = [8, 128], strides = [1, 1]} : vector<8x384xf32> to vector<8x128xf32>
    %237 = vector.extract_strided_slice %219 {offsets = [0, 256], sizes = [8, 128], strides = [1, 1]} : vector<8x384xf32> to vector<8x128xf32>
    %238 = arith.addf %237, %4 : vector<8x128xf32>
    %239 = arith.mulf %227, %238 : vector<8x128xf32>
    %240 = arith.addf %236, %239 : vector<8x128xf32>
    %241 = math.tanh %240 : vector<8x128xf32>
    %cst_59 = arith.constant 1.000000e+00 : f32
    %242 = vector.broadcast %cst_59 : f32 to vector<8x128xf32>
    %243 = arith.subf %242, %235 : vector<8x128xf32>
    %244 = arith.mulf %243, %241 : vector<8x128xf32>
    %245 = arith.mulf %235, %211 : vector<8x128xf32>
    %246 = arith.addf %244, %245 : vector<8x128xf32>
    %247 = arith.index_cast %c6_i32 : i32 to index
    %c0_60 = arith.constant 0 : index
    %c0_61 = arith.constant 0 : index
    %248 = vector.load %arg5[%247, %c0_60, %c0_61] : memref<8x8x128xf32, #tpu.memory_space<vmem>>, vector<1x8x128xf32>
    %249 = vector.shape_cast %248 : vector<1x8x128xf32> to vector<8x128xf32>
    %250 = vector.shape_cast %246 : vector<8x128xf32> to vector<1x8x128xf32>
    tpu.vector_store %arg5[%247, %c0_60, %c0_61], %250 {strides = array<i32>} : memref<8x8x128xf32, #tpu.memory_space<vmem>>, vector<1x8x128xf32>,
    %c7_i32 = arith.constant 7 : i32
    %251 = arith.index_cast %c7_i32 : i32 to index
    %c0_62 = arith.constant 0 : index
    %c0_63 = arith.constant 0 : index
    %252 = vector.load %arg1[%251, %c0_62, %c0_63] : memref<8x8x384xf32, #tpu.memory_space<vmem>>, vector<1x8x384xf32>
    %253 = vector.shape_cast %252 : vector<1x8x384xf32> to vector<8x384xf32>
    %cst_64 = arith.constant dense<0.000000e+00> : vector<8x384xf32>
    %254 = tpu.matmul %246, %3, %cst_64 {dimension_numbers = #tpu.dot_dimension_numbers<[1], [0], [0], [1], [0, 0, 1, 1], [], []>} : vector<8x128xf32>, vector<128x384xf32>, vector<8x384xf32> -> vector<8x384xf32>
    %255 = vector.extract_strided_slice %253 {offsets = [0, 0], sizes = [8, 128], strides = [1, 1]} : vector<8x384xf32> to vector<8x128xf32>
    %256 = vector.extract_strided_slice %254 {offsets = [0, 0], sizes = [8, 128], strides = [1, 1]} : vector<8x384xf32> to vector<8x128xf32>
    %257 = arith.addf %255, %256 : vector<8x128xf32>
    %258 = arith.negf %257 : vector<8x128xf32>
    %259 = math.exp %258 : vector<8x128xf32>
    %cst_65 = arith.constant 1.000000e+00 : f32
    %260 = vector.broadcast %cst_65 : f32 to vector<8x128xf32>
    %261 = arith.addf %260, %259 : vector<8x128xf32>
    %262 = arith.divf %260, %261 : vector<8x128xf32>
    %263 = vector.extract_strided_slice %253 {offsets = [0, 128], sizes = [8, 128], strides = [1, 1]} : vector<8x384xf32> to vector<8x128xf32>
    %264 = vector.extract_strided_slice %254 {offsets = [0, 128], sizes = [8, 128], strides = [1, 1]} : vector<8x384xf32> to vector<8x128xf32>
    %265 = arith.addf %263, %264 : vector<8x128xf32>
    %266 = arith.negf %265 : vector<8x128xf32>
    %267 = math.exp %266 : vector<8x128xf32>
    %cst_66 = arith.constant 1.000000e+00 : f32
    %268 = vector.broadcast %cst_66 : f32 to vector<8x128xf32>
    %269 = arith.addf %268, %267 : vector<8x128xf32>
    %270 = arith.divf %268, %269 : vector<8x128xf32>
    %271 = vector.extract_strided_slice %253 {offsets = [0, 256], sizes = [8, 128], strides = [1, 1]} : vector<8x384xf32> to vector<8x128xf32>
    %272 = vector.extract_strided_slice %254 {offsets = [0, 256], sizes = [8, 128], strides = [1, 1]} : vector<8x384xf32> to vector<8x128xf32>
    %273 = arith.addf %272, %4 : vector<8x128xf32>
    %274 = arith.mulf %262, %273 : vector<8x128xf32>
    %275 = arith.addf %271, %274 : vector<8x128xf32>
    %276 = math.tanh %275 : vector<8x128xf32>
    %cst_67 = arith.constant 1.000000e+00 : f32
    %277 = vector.broadcast %cst_67 : f32 to vector<8x128xf32>
    %278 = arith.subf %277, %270 : vector<8x128xf32>
    %279 = arith.mulf %278, %276 : vector<8x128xf32>
    %280 = arith.mulf %270, %246 : vector<8x128xf32>
    %281 = arith.addf %279, %280 : vector<8x128xf32>
    %282 = arith.index_cast %c7_i32 : i32 to index
    %c0_68 = arith.constant 0 : index
    %c0_69 = arith.constant 0 : index
    %283 = vector.load %arg5[%282, %c0_68, %c0_69] : memref<8x8x128xf32, #tpu.memory_space<vmem>>, vector<1x8x128xf32>
    %284 = vector.shape_cast %283 : vector<1x8x128xf32> to vector<8x128xf32>
    %285 = vector.shape_cast %281 : vector<8x128xf32> to vector<1x8x128xf32>
    tpu.vector_store %arg5[%282, %c0_68, %c0_69], %285 {strides = array<i32>} : memref<8x8x128xf32, #tpu.memory_space<vmem>>, vector<1x8x128xf32>,
    %c8_i32 = arith.constant 8 : i32
    %c0_70 = arith.constant 0 : index
    %c0_71 = arith.constant 0 : index
    %286 = vector.load %arg7[%c0_70, %c0_71] : memref<8x128xf32, #tpu.memory_space<vmem>>, vector<8x128xf32>
    tpu.vector_store %arg7[%c0_70, %c0_71], %281 {strides = array<i32>} : memref<8x128xf32, #tpu.memory_space<vmem>>, vector<8x128xf32>,
    %c0_i32_72 = arith.constant 0 : i32
    %287 = arith.cmpi eq, %arg0, %c0_i32_72 : i32
    %288 = arith.extui %287 : i1 to i32
    %c0_i32_73 = arith.constant 0 : i32
    %289 = arith.cmpi ne, %288, %c0_i32_73 : i32
    scf.if %289 {
      %c0_74 = arith.constant 0 : index
      %c0_75 = arith.constant 0 : index
      %290 = vector.load %arg6[%c0_74, %c0_75] : memref<8x128xf32, #tpu.memory_space<vmem>>, vector<8x128xf32>
      tpu.vector_store %arg6[%c0_74, %c0_75], %281 {strides = array<i32>} : memref<8x128xf32, #tpu.memory_space<vmem>>, vector<8x128xf32>,
    } else {
    }
    return
  }
  func.func @transform_0(%arg0: i32) -> (i32, i32, i32) {
    %c0_i32 = arith.constant 0 : i32
    %c0_i32_0 = arith.constant 0 : i32
    %c0_i32_1 = arith.constant 0 : i32
    return %arg0, %c0_i32, %c0_i32_0 : i32, i32, i32
  }
  func.func @transform_1(%arg0: i32) -> (i32, i32) {
    %c0_i32 = arith.constant 0 : i32
    %c0_i32_0 = arith.constant 0 : i32
    %c0_i32_1 = arith.constant 0 : i32
    return %c0_i32, %c0_i32_0 : i32, i32
  }
  func.func @transform_2(%arg0: i32) -> (i32, i32) {
    %c0_i32 = arith.constant 0 : i32
    %c0_i32_0 = arith.constant 0 : i32
    %c0_i32_1 = arith.constant 0 : i32
    return %c0_i32, %c0_i32_0 : i32, i32
  }
  func.func @transform_3(%arg0: i32) -> (i32, i32) {
    %c0_i32 = arith.constant 0 : i32
    %c0_i32_0 = arith.constant 0 : i32
    %c0_i32_1 = arith.constant 0 : i32
    return %c0_i32, %c0_i32_0 : i32, i32
  }
  func.func @transform_4(%arg0: i32) -> (i32, i32, i32) {
    %c0_i32 = arith.constant 0 : i32
    %c0_i32_0 = arith.constant 0 : i32
    %c0_i32_1 = arith.constant 0 : i32
    return %arg0, %c0_i32, %c0_i32_0 : i32, i32, i32
  }
  func.func @transform_5(%arg0: i32) -> (i32, i32) {
    %c0_i32 = arith.constant 0 : i32
    %c0_i32_0 = arith.constant 0 : i32
    %c0_i32_1 = arith.constant 0 : i32
    return %c0_i32, %c0_i32_0 : i32, i32
  }
}

module attributes {stable_mosaic.version = 11 : i64} {
  func.func @_gru_seq_kernel(%arg0: i32, %arg1: memref<8x8x384xf32, #tpu.memory_space<vmem>>, %arg2: memref<128x384xf32, #tpu.memory_space<vmem>>, %arg3: memref<8x128xf32, #tpu.memory_space<vmem>>, %arg4: memref<8x128xf32, #tpu.memory_space<vmem>>, %arg5: memref<8x8x128xf32, #tpu.memory_space<vmem>>, %arg6: memref<8x128xf32, #tpu.memory_space<vmem>>, %arg7: memref<8x128xf32, #tpu.memory_space<vmem>>) attributes {dimension_semantics = [#tpu.dimension_semantics<arbitrary>], iteration_bounds = array<i64: 1>, scalar_prefetch = 0 : i64, scratch_operands = 1 : i64, tpu.core_type = #tpu.core_type<tc>, window_params = [{transform_indices = @transform_0, window_bounds = array<i64: 8, 8, 384>}, {pipeline_mode = #tpu.pipeline_mode<synchronous>, transform_indices = @transform_1, window_bounds = array<i64: 128, 384>}, {pipeline_mode = #tpu.pipeline_mode<synchronous>, transform_indices = @transform_2, window_bounds = array<i64: 8, 128>}, {pipeline_mode = #tpu.pipeline_mode<synchronous>, transform_indices = @transform_3, window_bounds = array<i64: 8, 128>}, {transform_indices = @transform_4, window_bounds = array<i64: 8, 8, 128>}, {pipeline_mode = #tpu.pipeline_mode<synchronous>, transform_indices = @transform_5, window_bounds = array<i64: 8, 128>}]} {
    %c0_i32 = arith.constant 0 : i32
    %0 = arith.cmpi eq, %arg0, %c0_i32 : i32
    %1 = arith.extui %0 : i1 to i32
    %c0_i32_0 = arith.constant 0 : i32
    %2 = arith.cmpi ne, %1, %c0_i32_0 : i32
    scf.if %2 {
      %c0_82 = arith.constant 0 : index
      %c0_83 = arith.constant 0 : index
      %298 = vector.load %arg4[%c0_82, %c0_83] : memref<8x128xf32, #tpu.memory_space<vmem>>, vector<8x128xf32>
      %c0_84 = arith.constant 0 : index
      %c0_85 = arith.constant 0 : index
      %299 = vector.load %arg7[%c0_84, %c0_85] : memref<8x128xf32, #tpu.memory_space<vmem>>, vector<8x128xf32>
      tpu.vector_store %arg7[%c0_84, %c0_85], %298 {strides = array<i32>} : memref<8x128xf32, #tpu.memory_space<vmem>>, vector<8x128xf32>,
    } else {
    }
    %c0 = arith.constant 0 : index
    %c0_1 = arith.constant 0 : index
    %3 = vector.load %arg2[%c0, %c0_1] : memref<128x384xf32, #tpu.memory_space<vmem>>, vector<128x384xf32>
    %c0_2 = arith.constant 0 : index
    %c0_3 = arith.constant 0 : index
    %4 = vector.load %arg3[%c0_2, %c0_3] : memref<8x128xf32, #tpu.memory_space<vmem>>, vector<8x128xf32>
    %c0_4 = arith.constant 0 : index
    %c0_5 = arith.constant 0 : index
    %5 = vector.load %arg7[%c0_4, %c0_5] : memref<8x128xf32, #tpu.memory_space<vmem>>, vector<8x128xf32>
    %c0_i32_6 = arith.constant 0 : i32
    %c7_i32 = arith.constant 7 : i32
    %6 = arith.subi %c7_i32, %c0_i32_6 : i32
    %7 = arith.index_cast %6 : i32 to index
    %c0_7 = arith.constant 0 : index
    %c0_8 = arith.constant 0 : index
    %8 = vector.load %arg1[%7, %c0_7, %c0_8] : memref<8x8x384xf32, #tpu.memory_space<vmem>>, vector<1x8x384xf32>
    %9 = vector.shape_cast %8 : vector<1x8x384xf32> to vector<8x384xf32>
    %cst = arith.constant dense<0.000000e+00> : vector<8x384xf32>
    %10 = tpu.matmul %5, %3, %cst {dimension_numbers = #tpu.dot_dimension_numbers<[1], [0], [0], [1], [0, 0, 1, 1], [], []>} : vector<8x128xf32>, vector<128x384xf32>, vector<8x384xf32> -> vector<8x384xf32>
    %11 = vector.extract_strided_slice %9 {offsets = [0, 0], sizes = [8, 128], strides = [1, 1]} : vector<8x384xf32> to vector<8x128xf32>
    %12 = vector.extract_strided_slice %10 {offsets = [0, 0], sizes = [8, 128], strides = [1, 1]} : vector<8x384xf32> to vector<8x128xf32>
    %13 = arith.addf %11, %12 : vector<8x128xf32>
    %14 = arith.negf %13 : vector<8x128xf32>
    %15 = math.exp %14 : vector<8x128xf32>
    %cst_9 = arith.constant 1.000000e+00 : f32
    %16 = vector.broadcast %cst_9 : f32 to vector<8x128xf32>
    %17 = arith.addf %16, %15 : vector<8x128xf32>
    %18 = arith.divf %16, %17 : vector<8x128xf32>
    %19 = vector.extract_strided_slice %9 {offsets = [0, 128], sizes = [8, 128], strides = [1, 1]} : vector<8x384xf32> to vector<8x128xf32>
    %20 = vector.extract_strided_slice %10 {offsets = [0, 128], sizes = [8, 128], strides = [1, 1]} : vector<8x384xf32> to vector<8x128xf32>
    %21 = arith.addf %19, %20 : vector<8x128xf32>
    %22 = arith.negf %21 : vector<8x128xf32>
    %23 = math.exp %22 : vector<8x128xf32>
    %cst_10 = arith.constant 1.000000e+00 : f32
    %24 = vector.broadcast %cst_10 : f32 to vector<8x128xf32>
    %25 = arith.addf %24, %23 : vector<8x128xf32>
    %26 = arith.divf %24, %25 : vector<8x128xf32>
    %27 = vector.extract_strided_slice %9 {offsets = [0, 256], sizes = [8, 128], strides = [1, 1]} : vector<8x384xf32> to vector<8x128xf32>
    %28 = vector.extract_strided_slice %10 {offsets = [0, 256], sizes = [8, 128], strides = [1, 1]} : vector<8x384xf32> to vector<8x128xf32>
    %29 = arith.addf %28, %4 : vector<8x128xf32>
    %30 = arith.mulf %18, %29 : vector<8x128xf32>
    %31 = arith.addf %27, %30 : vector<8x128xf32>
    %32 = math.tanh %31 : vector<8x128xf32>
    %cst_11 = arith.constant 1.000000e+00 : f32
    %33 = vector.broadcast %cst_11 : f32 to vector<8x128xf32>
    %34 = arith.subf %33, %26 : vector<8x128xf32>
    %35 = arith.mulf %34, %32 : vector<8x128xf32>
    %36 = arith.mulf %26, %5 : vector<8x128xf32>
    %37 = arith.addf %35, %36 : vector<8x128xf32>
    %38 = arith.index_cast %6 : i32 to index
    %c0_12 = arith.constant 0 : index
    %c0_13 = arith.constant 0 : index
    %39 = vector.load %arg5[%38, %c0_12, %c0_13] : memref<8x8x128xf32, #tpu.memory_space<vmem>>, vector<1x8x128xf32>
    %40 = vector.shape_cast %39 : vector<1x8x128xf32> to vector<8x128xf32>
    %41 = vector.shape_cast %37 : vector<8x128xf32> to vector<1x8x128xf32>
    tpu.vector_store %arg5[%38, %c0_12, %c0_13], %41 {strides = array<i32>} : memref<8x8x128xf32, #tpu.memory_space<vmem>>, vector<1x8x128xf32>,
    %c1_i32 = arith.constant 1 : i32
    %c7_i32_14 = arith.constant 7 : i32
    %42 = arith.subi %c7_i32_14, %c1_i32 : i32
    %43 = arith.index_cast %42 : i32 to index
    %c0_15 = arith.constant 0 : index
    %c0_16 = arith.constant 0 : index
    %44 = vector.load %arg1[%43, %c0_15, %c0_16] : memref<8x8x384xf32, #tpu.memory_space<vmem>>, vector<1x8x384xf32>
    %45 = vector.shape_cast %44 : vector<1x8x384xf32> to vector<8x384xf32>
    %cst_17 = arith.constant dense<0.000000e+00> : vector<8x384xf32>
    %46 = tpu.matmul %37, %3, %cst_17 {dimension_numbers = #tpu.dot_dimension_numbers<[1], [0], [0], [1], [0, 0, 1, 1], [], []>} : vector<8x128xf32>, vector<128x384xf32>, vector<8x384xf32> -> vector<8x384xf32>
    %47 = vector.extract_strided_slice %45 {offsets = [0, 0], sizes = [8, 128], strides = [1, 1]} : vector<8x384xf32> to vector<8x128xf32>
    %48 = vector.extract_strided_slice %46 {offsets = [0, 0], sizes = [8, 128], strides = [1, 1]} : vector<8x384xf32> to vector<8x128xf32>
    %49 = arith.addf %47, %48 : vector<8x128xf32>
    %50 = arith.negf %49 : vector<8x128xf32>
    %51 = math.exp %50 : vector<8x128xf32>
    %cst_18 = arith.constant 1.000000e+00 : f32
    %52 = vector.broadcast %cst_18 : f32 to vector<8x128xf32>
    %53 = arith.addf %52, %51 : vector<8x128xf32>
    %54 = arith.divf %52, %53 : vector<8x128xf32>
    %55 = vector.extract_strided_slice %45 {offsets = [0, 128], sizes = [8, 128], strides = [1, 1]} : vector<8x384xf32> to vector<8x128xf32>
    %56 = vector.extract_strided_slice %46 {offsets = [0, 128], sizes = [8, 128], strides = [1, 1]} : vector<8x384xf32> to vector<8x128xf32>
    %57 = arith.addf %55, %56 : vector<8x128xf32>
    %58 = arith.negf %57 : vector<8x128xf32>
    %59 = math.exp %58 : vector<8x128xf32>
    %cst_19 = arith.constant 1.000000e+00 : f32
    %60 = vector.broadcast %cst_19 : f32 to vector<8x128xf32>
    %61 = arith.addf %60, %59 : vector<8x128xf32>
    %62 = arith.divf %60, %61 : vector<8x128xf32>
    %63 = vector.extract_strided_slice %45 {offsets = [0, 256], sizes = [8, 128], strides = [1, 1]} : vector<8x384xf32> to vector<8x128xf32>
    %64 = vector.extract_strided_slice %46 {offsets = [0, 256], sizes = [8, 128], strides = [1, 1]} : vector<8x384xf32> to vector<8x128xf32>
    %65 = arith.addf %64, %4 : vector<8x128xf32>
    %66 = arith.mulf %54, %65 : vector<8x128xf32>
    %67 = arith.addf %63, %66 : vector<8x128xf32>
    %68 = math.tanh %67 : vector<8x128xf32>
    %cst_20 = arith.constant 1.000000e+00 : f32
    %69 = vector.broadcast %cst_20 : f32 to vector<8x128xf32>
    %70 = arith.subf %69, %62 : vector<8x128xf32>
    %71 = arith.mulf %70, %68 : vector<8x128xf32>
    %72 = arith.mulf %62, %37 : vector<8x128xf32>
    %73 = arith.addf %71, %72 : vector<8x128xf32>
    %74 = arith.index_cast %42 : i32 to index
    %c0_21 = arith.constant 0 : index
    %c0_22 = arith.constant 0 : index
    %75 = vector.load %arg5[%74, %c0_21, %c0_22] : memref<8x8x128xf32, #tpu.memory_space<vmem>>, vector<1x8x128xf32>
    %76 = vector.shape_cast %75 : vector<1x8x128xf32> to vector<8x128xf32>
    %77 = vector.shape_cast %73 : vector<8x128xf32> to vector<1x8x128xf32>
    tpu.vector_store %arg5[%74, %c0_21, %c0_22], %77 {strides = array<i32>} : memref<8x8x128xf32, #tpu.memory_space<vmem>>, vector<1x8x128xf32>,
    %c2_i32 = arith.constant 2 : i32
    %c7_i32_23 = arith.constant 7 : i32
    %78 = arith.subi %c7_i32_23, %c2_i32 : i32
    %79 = arith.index_cast %78 : i32 to index
    %c0_24 = arith.constant 0 : index
    %c0_25 = arith.constant 0 : index
    %80 = vector.load %arg1[%79, %c0_24, %c0_25] : memref<8x8x384xf32, #tpu.memory_space<vmem>>, vector<1x8x384xf32>
    %81 = vector.shape_cast %80 : vector<1x8x384xf32> to vector<8x384xf32>
    %cst_26 = arith.constant dense<0.000000e+00> : vector<8x384xf32>
    %82 = tpu.matmul %73, %3, %cst_26 {dimension_numbers = #tpu.dot_dimension_numbers<[1], [0], [0], [1], [0, 0, 1, 1], [], []>} : vector<8x128xf32>, vector<128x384xf32>, vector<8x384xf32> -> vector<8x384xf32>
    %83 = vector.extract_strided_slice %81 {offsets = [0, 0], sizes = [8, 128], strides = [1, 1]} : vector<8x384xf32> to vector<8x128xf32>
    %84 = vector.extract_strided_slice %82 {offsets = [0, 0], sizes = [8, 128], strides = [1, 1]} : vector<8x384xf32> to vector<8x128xf32>
    %85 = arith.addf %83, %84 : vector<8x128xf32>
    %86 = arith.negf %85 : vector<8x128xf32>
    %87 = math.exp %86 : vector<8x128xf32>
    %cst_27 = arith.constant 1.000000e+00 : f32
    %88 = vector.broadcast %cst_27 : f32 to vector<8x128xf32>
    %89 = arith.addf %88, %87 : vector<8x128xf32>
    %90 = arith.divf %88, %89 : vector<8x128xf32>
    %91 = vector.extract_strided_slice %81 {offsets = [0, 128], sizes = [8, 128], strides = [1, 1]} : vector<8x384xf32> to vector<8x128xf32>
    %92 = vector.extract_strided_slice %82 {offsets = [0, 128], sizes = [8, 128], strides = [1, 1]} : vector<8x384xf32> to vector<8x128xf32>
    %93 = arith.addf %91, %92 : vector<8x128xf32>
    %94 = arith.negf %93 : vector<8x128xf32>
    %95 = math.exp %94 : vector<8x128xf32>
    %cst_28 = arith.constant 1.000000e+00 : f32
    %96 = vector.broadcast %cst_28 : f32 to vector<8x128xf32>
    %97 = arith.addf %96, %95 : vector<8x128xf32>
    %98 = arith.divf %96, %97 : vector<8x128xf32>
    %99 = vector.extract_strided_slice %81 {offsets = [0, 256], sizes = [8, 128], strides = [1, 1]} : vector<8x384xf32> to vector<8x128xf32>
    %100 = vector.extract_strided_slice %82 {offsets = [0, 256], sizes = [8, 128], strides = [1, 1]} : vector<8x384xf32> to vector<8x128xf32>
    %101 = arith.addf %100, %4 : vector<8x128xf32>
    %102 = arith.mulf %90, %101 : vector<8x128xf32>
    %103 = arith.addf %99, %102 : vector<8x128xf32>
    %104 = math.tanh %103 : vector<8x128xf32>
    %cst_29 = arith.constant 1.000000e+00 : f32
    %105 = vector.broadcast %cst_29 : f32 to vector<8x128xf32>
    %106 = arith.subf %105, %98 : vector<8x128xf32>
    %107 = arith.mulf %106, %104 : vector<8x128xf32>
    %108 = arith.mulf %98, %73 : vector<8x128xf32>
    %109 = arith.addf %107, %108 : vector<8x128xf32>
    %110 = arith.index_cast %78 : i32 to index
    %c0_30 = arith.constant 0 : index
    %c0_31 = arith.constant 0 : index
    %111 = vector.load %arg5[%110, %c0_30, %c0_31] : memref<8x8x128xf32, #tpu.memory_space<vmem>>, vector<1x8x128xf32>
    %112 = vector.shape_cast %111 : vector<1x8x128xf32> to vector<8x128xf32>
    %113 = vector.shape_cast %109 : vector<8x128xf32> to vector<1x8x128xf32>
    tpu.vector_store %arg5[%110, %c0_30, %c0_31], %113 {strides = array<i32>} : memref<8x8x128xf32, #tpu.memory_space<vmem>>, vector<1x8x128xf32>,
    %c3_i32 = arith.constant 3 : i32
    %c7_i32_32 = arith.constant 7 : i32
    %114 = arith.subi %c7_i32_32, %c3_i32 : i32
    %115 = arith.index_cast %114 : i32 to index
    %c0_33 = arith.constant 0 : index
    %c0_34 = arith.constant 0 : index
    %116 = vector.load %arg1[%115, %c0_33, %c0_34] : memref<8x8x384xf32, #tpu.memory_space<vmem>>, vector<1x8x384xf32>
    %117 = vector.shape_cast %116 : vector<1x8x384xf32> to vector<8x384xf32>
    %cst_35 = arith.constant dense<0.000000e+00> : vector<8x384xf32>
    %118 = tpu.matmul %109, %3, %cst_35 {dimension_numbers = #tpu.dot_dimension_numbers<[1], [0], [0], [1], [0, 0, 1, 1], [], []>} : vector<8x128xf32>, vector<128x384xf32>, vector<8x384xf32> -> vector<8x384xf32>
    %119 = vector.extract_strided_slice %117 {offsets = [0, 0], sizes = [8, 128], strides = [1, 1]} : vector<8x384xf32> to vector<8x128xf32>
    %120 = vector.extract_strided_slice %118 {offsets = [0, 0], sizes = [8, 128], strides = [1, 1]} : vector<8x384xf32> to vector<8x128xf32>
    %121 = arith.addf %119, %120 : vector<8x128xf32>
    %122 = arith.negf %121 : vector<8x128xf32>
    %123 = math.exp %122 : vector<8x128xf32>
    %cst_36 = arith.constant 1.000000e+00 : f32
    %124 = vector.broadcast %cst_36 : f32 to vector<8x128xf32>
    %125 = arith.addf %124, %123 : vector<8x128xf32>
    %126 = arith.divf %124, %125 : vector<8x128xf32>
    %127 = vector.extract_strided_slice %117 {offsets = [0, 128], sizes = [8, 128], strides = [1, 1]} : vector<8x384xf32> to vector<8x128xf32>
    %128 = vector.extract_strided_slice %118 {offsets = [0, 128], sizes = [8, 128], strides = [1, 1]} : vector<8x384xf32> to vector<8x128xf32>
    %129 = arith.addf %127, %128 : vector<8x128xf32>
    %130 = arith.negf %129 : vector<8x128xf32>
    %131 = math.exp %130 : vector<8x128xf32>
    %cst_37 = arith.constant 1.000000e+00 : f32
    %132 = vector.broadcast %cst_37 : f32 to vector<8x128xf32>
    %133 = arith.addf %132, %131 : vector<8x128xf32>
    %134 = arith.divf %132, %133 : vector<8x128xf32>
    %135 = vector.extract_strided_slice %117 {offsets = [0, 256], sizes = [8, 128], strides = [1, 1]} : vector<8x384xf32> to vector<8x128xf32>
    %136 = vector.extract_strided_slice %118 {offsets = [0, 256], sizes = [8, 128], strides = [1, 1]} : vector<8x384xf32> to vector<8x128xf32>
    %137 = arith.addf %136, %4 : vector<8x128xf32>
    %138 = arith.mulf %126, %137 : vector<8x128xf32>
    %139 = arith.addf %135, %138 : vector<8x128xf32>
    %140 = math.tanh %139 : vector<8x128xf32>
    %cst_38 = arith.constant 1.000000e+00 : f32
    %141 = vector.broadcast %cst_38 : f32 to vector<8x128xf32>
    %142 = arith.subf %141, %134 : vector<8x128xf32>
    %143 = arith.mulf %142, %140 : vector<8x128xf32>
    %144 = arith.mulf %134, %109 : vector<8x128xf32>
    %145 = arith.addf %143, %144 : vector<8x128xf32>
    %146 = arith.index_cast %114 : i32 to index
    %c0_39 = arith.constant 0 : index
    %c0_40 = arith.constant 0 : index
    %147 = vector.load %arg5[%146, %c0_39, %c0_40] : memref<8x8x128xf32, #tpu.memory_space<vmem>>, vector<1x8x128xf32>
    %148 = vector.shape_cast %147 : vector<1x8x128xf32> to vector<8x128xf32>
    %149 = vector.shape_cast %145 : vector<8x128xf32> to vector<1x8x128xf32>
    tpu.vector_store %arg5[%146, %c0_39, %c0_40], %149 {strides = array<i32>} : memref<8x8x128xf32, #tpu.memory_space<vmem>>, vector<1x8x128xf32>,
    %c4_i32 = arith.constant 4 : i32
    %c7_i32_41 = arith.constant 7 : i32
    %150 = arith.subi %c7_i32_41, %c4_i32 : i32
    %151 = arith.index_cast %150 : i32 to index
    %c0_42 = arith.constant 0 : index
    %c0_43 = arith.constant 0 : index
    %152 = vector.load %arg1[%151, %c0_42, %c0_43] : memref<8x8x384xf32, #tpu.memory_space<vmem>>, vector<1x8x384xf32>
    %153 = vector.shape_cast %152 : vector<1x8x384xf32> to vector<8x384xf32>
    %cst_44 = arith.constant dense<0.000000e+00> : vector<8x384xf32>
    %154 = tpu.matmul %145, %3, %cst_44 {dimension_numbers = #tpu.dot_dimension_numbers<[1], [0], [0], [1], [0, 0, 1, 1], [], []>} : vector<8x128xf32>, vector<128x384xf32>, vector<8x384xf32> -> vector<8x384xf32>
    %155 = vector.extract_strided_slice %153 {offsets = [0, 0], sizes = [8, 128], strides = [1, 1]} : vector<8x384xf32> to vector<8x128xf32>
    %156 = vector.extract_strided_slice %154 {offsets = [0, 0], sizes = [8, 128], strides = [1, 1]} : vector<8x384xf32> to vector<8x128xf32>
    %157 = arith.addf %155, %156 : vector<8x128xf32>
    %158 = arith.negf %157 : vector<8x128xf32>
    %159 = math.exp %158 : vector<8x128xf32>
    %cst_45 = arith.constant 1.000000e+00 : f32
    %160 = vector.broadcast %cst_45 : f32 to vector<8x128xf32>
    %161 = arith.addf %160, %159 : vector<8x128xf32>
    %162 = arith.divf %160, %161 : vector<8x128xf32>
    %163 = vector.extract_strided_slice %153 {offsets = [0, 128], sizes = [8, 128], strides = [1, 1]} : vector<8x384xf32> to vector<8x128xf32>
    %164 = vector.extract_strided_slice %154 {offsets = [0, 128], sizes = [8, 128], strides = [1, 1]} : vector<8x384xf32> to vector<8x128xf32>
    %165 = arith.addf %163, %164 : vector<8x128xf32>
    %166 = arith.negf %165 : vector<8x128xf32>
    %167 = math.exp %166 : vector<8x128xf32>
    %cst_46 = arith.constant 1.000000e+00 : f32
    %168 = vector.broadcast %cst_46 : f32 to vector<8x128xf32>
    %169 = arith.addf %168, %167 : vector<8x128xf32>
    %170 = arith.divf %168, %169 : vector<8x128xf32>
    %171 = vector.extract_strided_slice %153 {offsets = [0, 256], sizes = [8, 128], strides = [1, 1]} : vector<8x384xf32> to vector<8x128xf32>
    %172 = vector.extract_strided_slice %154 {offsets = [0, 256], sizes = [8, 128], strides = [1, 1]} : vector<8x384xf32> to vector<8x128xf32>
    %173 = arith.addf %172, %4 : vector<8x128xf32>
    %174 = arith.mulf %162, %173 : vector<8x128xf32>
    %175 = arith.addf %171, %174 : vector<8x128xf32>
    %176 = math.tanh %175 : vector<8x128xf32>
    %cst_47 = arith.constant 1.000000e+00 : f32
    %177 = vector.broadcast %cst_47 : f32 to vector<8x128xf32>
    %178 = arith.subf %177, %170 : vector<8x128xf32>
    %179 = arith.mulf %178, %176 : vector<8x128xf32>
    %180 = arith.mulf %170, %145 : vector<8x128xf32>
    %181 = arith.addf %179, %180 : vector<8x128xf32>
    %182 = arith.index_cast %150 : i32 to index
    %c0_48 = arith.constant 0 : index
    %c0_49 = arith.constant 0 : index
    %183 = vector.load %arg5[%182, %c0_48, %c0_49] : memref<8x8x128xf32, #tpu.memory_space<vmem>>, vector<1x8x128xf32>
    %184 = vector.shape_cast %183 : vector<1x8x128xf32> to vector<8x128xf32>
    %185 = vector.shape_cast %181 : vector<8x128xf32> to vector<1x8x128xf32>
    tpu.vector_store %arg5[%182, %c0_48, %c0_49], %185 {strides = array<i32>} : memref<8x8x128xf32, #tpu.memory_space<vmem>>, vector<1x8x128xf32>,
    %c5_i32 = arith.constant 5 : i32
    %c7_i32_50 = arith.constant 7 : i32
    %186 = arith.subi %c7_i32_50, %c5_i32 : i32
    %187 = arith.index_cast %186 : i32 to index
    %c0_51 = arith.constant 0 : index
    %c0_52 = arith.constant 0 : index
    %188 = vector.load %arg1[%187, %c0_51, %c0_52] : memref<8x8x384xf32, #tpu.memory_space<vmem>>, vector<1x8x384xf32>
    %189 = vector.shape_cast %188 : vector<1x8x384xf32> to vector<8x384xf32>
    %cst_53 = arith.constant dense<0.000000e+00> : vector<8x384xf32>
    %190 = tpu.matmul %181, %3, %cst_53 {dimension_numbers = #tpu.dot_dimension_numbers<[1], [0], [0], [1], [0, 0, 1, 1], [], []>} : vector<8x128xf32>, vector<128x384xf32>, vector<8x384xf32> -> vector<8x384xf32>
    %191 = vector.extract_strided_slice %189 {offsets = [0, 0], sizes = [8, 128], strides = [1, 1]} : vector<8x384xf32> to vector<8x128xf32>
    %192 = vector.extract_strided_slice %190 {offsets = [0, 0], sizes = [8, 128], strides = [1, 1]} : vector<8x384xf32> to vector<8x128xf32>
    %193 = arith.addf %191, %192 : vector<8x128xf32>
    %194 = arith.negf %193 : vector<8x128xf32>
    %195 = math.exp %194 : vector<8x128xf32>
    %cst_54 = arith.constant 1.000000e+00 : f32
    %196 = vector.broadcast %cst_54 : f32 to vector<8x128xf32>
    %197 = arith.addf %196, %195 : vector<8x128xf32>
    %198 = arith.divf %196, %197 : vector<8x128xf32>
    %199 = vector.extract_strided_slice %189 {offsets = [0, 128], sizes = [8, 128], strides = [1, 1]} : vector<8x384xf32> to vector<8x128xf32>
    %200 = vector.extract_strided_slice %190 {offsets = [0, 128], sizes = [8, 128], strides = [1, 1]} : vector<8x384xf32> to vector<8x128xf32>
    %201 = arith.addf %199, %200 : vector<8x128xf32>
    %202 = arith.negf %201 : vector<8x128xf32>
    %203 = math.exp %202 : vector<8x128xf32>
    %cst_55 = arith.constant 1.000000e+00 : f32
    %204 = vector.broadcast %cst_55 : f32 to vector<8x128xf32>
    %205 = arith.addf %204, %203 : vector<8x128xf32>
    %206 = arith.divf %204, %205 : vector<8x128xf32>
    %207 = vector.extract_strided_slice %189 {offsets = [0, 256], sizes = [8, 128], strides = [1, 1]} : vector<8x384xf32> to vector<8x128xf32>
    %208 = vector.extract_strided_slice %190 {offsets = [0, 256], sizes = [8, 128], strides = [1, 1]} : vector<8x384xf32> to vector<8x128xf32>
    %209 = arith.addf %208, %4 : vector<8x128xf32>
    %210 = arith.mulf %198, %209 : vector<8x128xf32>
    %211 = arith.addf %207, %210 : vector<8x128xf32>
    %212 = math.tanh %211 : vector<8x128xf32>
    %cst_56 = arith.constant 1.000000e+00 : f32
    %213 = vector.broadcast %cst_56 : f32 to vector<8x128xf32>
    %214 = arith.subf %213, %206 : vector<8x128xf32>
    %215 = arith.mulf %214, %212 : vector<8x128xf32>
    %216 = arith.mulf %206, %181 : vector<8x128xf32>
    %217 = arith.addf %215, %216 : vector<8x128xf32>
    %218 = arith.index_cast %186 : i32 to index
    %c0_57 = arith.constant 0 : index
    %c0_58 = arith.constant 0 : index
    %219 = vector.load %arg5[%218, %c0_57, %c0_58] : memref<8x8x128xf32, #tpu.memory_space<vmem>>, vector<1x8x128xf32>
    %220 = vector.shape_cast %219 : vector<1x8x128xf32> to vector<8x128xf32>
    %221 = vector.shape_cast %217 : vector<8x128xf32> to vector<1x8x128xf32>
    tpu.vector_store %arg5[%218, %c0_57, %c0_58], %221 {strides = array<i32>} : memref<8x8x128xf32, #tpu.memory_space<vmem>>, vector<1x8x128xf32>,
    %c6_i32 = arith.constant 6 : i32
    %c7_i32_59 = arith.constant 7 : i32
    %222 = arith.subi %c7_i32_59, %c6_i32 : i32
    %223 = arith.index_cast %222 : i32 to index
    %c0_60 = arith.constant 0 : index
    %c0_61 = arith.constant 0 : index
    %224 = vector.load %arg1[%223, %c0_60, %c0_61] : memref<8x8x384xf32, #tpu.memory_space<vmem>>, vector<1x8x384xf32>
    %225 = vector.shape_cast %224 : vector<1x8x384xf32> to vector<8x384xf32>
    %cst_62 = arith.constant dense<0.000000e+00> : vector<8x384xf32>
    %226 = tpu.matmul %217, %3, %cst_62 {dimension_numbers = #tpu.dot_dimension_numbers<[1], [0], [0], [1], [0, 0, 1, 1], [], []>} : vector<8x128xf32>, vector<128x384xf32>, vector<8x384xf32> -> vector<8x384xf32>
    %227 = vector.extract_strided_slice %225 {offsets = [0, 0], sizes = [8, 128], strides = [1, 1]} : vector<8x384xf32> to vector<8x128xf32>
    %228 = vector.extract_strided_slice %226 {offsets = [0, 0], sizes = [8, 128], strides = [1, 1]} : vector<8x384xf32> to vector<8x128xf32>
    %229 = arith.addf %227, %228 : vector<8x128xf32>
    %230 = arith.negf %229 : vector<8x128xf32>
    %231 = math.exp %230 : vector<8x128xf32>
    %cst_63 = arith.constant 1.000000e+00 : f32
    %232 = vector.broadcast %cst_63 : f32 to vector<8x128xf32>
    %233 = arith.addf %232, %231 : vector<8x128xf32>
    %234 = arith.divf %232, %233 : vector<8x128xf32>
    %235 = vector.extract_strided_slice %225 {offsets = [0, 128], sizes = [8, 128], strides = [1, 1]} : vector<8x384xf32> to vector<8x128xf32>
    %236 = vector.extract_strided_slice %226 {offsets = [0, 128], sizes = [8, 128], strides = [1, 1]} : vector<8x384xf32> to vector<8x128xf32>
    %237 = arith.addf %235, %236 : vector<8x128xf32>
    %238 = arith.negf %237 : vector<8x128xf32>
    %239 = math.exp %238 : vector<8x128xf32>
    %cst_64 = arith.constant 1.000000e+00 : f32
    %240 = vector.broadcast %cst_64 : f32 to vector<8x128xf32>
    %241 = arith.addf %240, %239 : vector<8x128xf32>
    %242 = arith.divf %240, %241 : vector<8x128xf32>
    %243 = vector.extract_strided_slice %225 {offsets = [0, 256], sizes = [8, 128], strides = [1, 1]} : vector<8x384xf32> to vector<8x128xf32>
    %244 = vector.extract_strided_slice %226 {offsets = [0, 256], sizes = [8, 128], strides = [1, 1]} : vector<8x384xf32> to vector<8x128xf32>
    %245 = arith.addf %244, %4 : vector<8x128xf32>
    %246 = arith.mulf %234, %245 : vector<8x128xf32>
    %247 = arith.addf %243, %246 : vector<8x128xf32>
    %248 = math.tanh %247 : vector<8x128xf32>
    %cst_65 = arith.constant 1.000000e+00 : f32
    %249 = vector.broadcast %cst_65 : f32 to vector<8x128xf32>
    %250 = arith.subf %249, %242 : vector<8x128xf32>
    %251 = arith.mulf %250, %248 : vector<8x128xf32>
    %252 = arith.mulf %242, %217 : vector<8x128xf32>
    %253 = arith.addf %251, %252 : vector<8x128xf32>
    %254 = arith.index_cast %222 : i32 to index
    %c0_66 = arith.constant 0 : index
    %c0_67 = arith.constant 0 : index
    %255 = vector.load %arg5[%254, %c0_66, %c0_67] : memref<8x8x128xf32, #tpu.memory_space<vmem>>, vector<1x8x128xf32>
    %256 = vector.shape_cast %255 : vector<1x8x128xf32> to vector<8x128xf32>
    %257 = vector.shape_cast %253 : vector<8x128xf32> to vector<1x8x128xf32>
    tpu.vector_store %arg5[%254, %c0_66, %c0_67], %257 {strides = array<i32>} : memref<8x8x128xf32, #tpu.memory_space<vmem>>, vector<1x8x128xf32>,
    %c7_i32_68 = arith.constant 7 : i32
    %c7_i32_69 = arith.constant 7 : i32
    %258 = arith.subi %c7_i32_69, %c7_i32_68 : i32
    %259 = arith.index_cast %258 : i32 to index
    %c0_70 = arith.constant 0 : index
    %c0_71 = arith.constant 0 : index
    %260 = vector.load %arg1[%259, %c0_70, %c0_71] : memref<8x8x384xf32, #tpu.memory_space<vmem>>, vector<1x8x384xf32>
    %261 = vector.shape_cast %260 : vector<1x8x384xf32> to vector<8x384xf32>
    %cst_72 = arith.constant dense<0.000000e+00> : vector<8x384xf32>
    %262 = tpu.matmul %253, %3, %cst_72 {dimension_numbers = #tpu.dot_dimension_numbers<[1], [0], [0], [1], [0, 0, 1, 1], [], []>} : vector<8x128xf32>, vector<128x384xf32>, vector<8x384xf32> -> vector<8x384xf32>
    %263 = vector.extract_strided_slice %261 {offsets = [0, 0], sizes = [8, 128], strides = [1, 1]} : vector<8x384xf32> to vector<8x128xf32>
    %264 = vector.extract_strided_slice %262 {offsets = [0, 0], sizes = [8, 128], strides = [1, 1]} : vector<8x384xf32> to vector<8x128xf32>
    %265 = arith.addf %263, %264 : vector<8x128xf32>
    %266 = arith.negf %265 : vector<8x128xf32>
    %267 = math.exp %266 : vector<8x128xf32>
    %cst_73 = arith.constant 1.000000e+00 : f32
    %268 = vector.broadcast %cst_73 : f32 to vector<8x128xf32>
    %269 = arith.addf %268, %267 : vector<8x128xf32>
    %270 = arith.divf %268, %269 : vector<8x128xf32>
    %271 = vector.extract_strided_slice %261 {offsets = [0, 128], sizes = [8, 128], strides = [1, 1]} : vector<8x384xf32> to vector<8x128xf32>
    %272 = vector.extract_strided_slice %262 {offsets = [0, 128], sizes = [8, 128], strides = [1, 1]} : vector<8x384xf32> to vector<8x128xf32>
    %273 = arith.addf %271, %272 : vector<8x128xf32>
    %274 = arith.negf %273 : vector<8x128xf32>
    %275 = math.exp %274 : vector<8x128xf32>
    %cst_74 = arith.constant 1.000000e+00 : f32
    %276 = vector.broadcast %cst_74 : f32 to vector<8x128xf32>
    %277 = arith.addf %276, %275 : vector<8x128xf32>
    %278 = arith.divf %276, %277 : vector<8x128xf32>
    %279 = vector.extract_strided_slice %261 {offsets = [0, 256], sizes = [8, 128], strides = [1, 1]} : vector<8x384xf32> to vector<8x128xf32>
    %280 = vector.extract_strided_slice %262 {offsets = [0, 256], sizes = [8, 128], strides = [1, 1]} : vector<8x384xf32> to vector<8x128xf32>
    %281 = arith.addf %280, %4 : vector<8x128xf32>
    %282 = arith.mulf %270, %281 : vector<8x128xf32>
    %283 = arith.addf %279, %282 : vector<8x128xf32>
    %284 = math.tanh %283 : vector<8x128xf32>
    %cst_75 = arith.constant 1.000000e+00 : f32
    %285 = vector.broadcast %cst_75 : f32 to vector<8x128xf32>
    %286 = arith.subf %285, %278 : vector<8x128xf32>
    %287 = arith.mulf %286, %284 : vector<8x128xf32>
    %288 = arith.mulf %278, %253 : vector<8x128xf32>
    %289 = arith.addf %287, %288 : vector<8x128xf32>
    %290 = arith.index_cast %258 : i32 to index
    %c0_76 = arith.constant 0 : index
    %c0_77 = arith.constant 0 : index
    %291 = vector.load %arg5[%290, %c0_76, %c0_77] : memref<8x8x128xf32, #tpu.memory_space<vmem>>, vector<1x8x128xf32>
    %292 = vector.shape_cast %291 : vector<1x8x128xf32> to vector<8x128xf32>
    %293 = vector.shape_cast %289 : vector<8x128xf32> to vector<1x8x128xf32>
    tpu.vector_store %arg5[%290, %c0_76, %c0_77], %293 {strides = array<i32>} : memref<8x8x128xf32, #tpu.memory_space<vmem>>, vector<1x8x128xf32>,
    %c8_i32 = arith.constant 8 : i32
    %c0_78 = arith.constant 0 : index
    %c0_79 = arith.constant 0 : index
    %294 = vector.load %arg7[%c0_78, %c0_79] : memref<8x128xf32, #tpu.memory_space<vmem>>, vector<8x128xf32>
    tpu.vector_store %arg7[%c0_78, %c0_79], %289 {strides = array<i32>} : memref<8x128xf32, #tpu.memory_space<vmem>>, vector<8x128xf32>,
    %c0_i32_80 = arith.constant 0 : i32
    %295 = arith.cmpi eq, %arg0, %c0_i32_80 : i32
    %296 = arith.extui %295 : i1 to i32
    %c0_i32_81 = arith.constant 0 : i32
    %297 = arith.cmpi ne, %296, %c0_i32_81 : i32
    scf.if %297 {
      %c0_82 = arith.constant 0 : index
      %c0_83 = arith.constant 0 : index
      %298 = vector.load %arg6[%c0_82, %c0_83] : memref<8x128xf32, #tpu.memory_space<vmem>>, vector<8x128xf32>
      tpu.vector_store %arg6[%c0_82, %c0_83], %289 {strides = array<i32>} : memref<8x128xf32, #tpu.memory_space<vmem>>, vector<8x128xf32>,
    } else {
    }
    return
  }
  func.func @transform_0(%arg0: i32) -> (i32, i32, i32) {
    %c0_i32 = arith.constant 0 : i32
    %0 = arith.subi %c0_i32, %arg0 : i32
    %c0_i32_0 = arith.constant 0 : i32
    %c0_i32_1 = arith.constant 0 : i32
    %c0_i32_2 = arith.constant 0 : i32
    return %0, %c0_i32_0, %c0_i32_1 : i32, i32, i32
  }
  func.func @transform_1(%arg0: i32) -> (i32, i32) {
    %c0_i32 = arith.constant 0 : i32
    %c0_i32_0 = arith.constant 0 : i32
    %c0_i32_1 = arith.constant 0 : i32
    return %c0_i32, %c0_i32_0 : i32, i32
  }
  func.func @transform_2(%arg0: i32) -> (i32, i32) {
    %c0_i32 = arith.constant 0 : i32
    %c0_i32_0 = arith.constant 0 : i32
    %c0_i32_1 = arith.constant 0 : i32
    return %c0_i32, %c0_i32_0 : i32, i32
  }
  func.func @transform_3(%arg0: i32) -> (i32, i32) {
    %c0_i32 = arith.constant 0 : i32
    %c0_i32_0 = arith.constant 0 : i32
    %c0_i32_1 = arith.constant 0 : i32
    return %c0_i32, %c0_i32_0 : i32, i32
  }
  func.func @transform_4(%arg0: i32) -> (i32, i32, i32) {
    %c0_i32 = arith.constant 0 : i32
    %0 = arith.subi %c0_i32, %arg0 : i32
    %c0_i32_0 = arith.constant 0 : i32
    %c0_i32_1 = arith.constant 0 : i32
    %c0_i32_2 = arith.constant 0 : i32
    return %0, %c0_i32_0, %c0_i32_1 : i32, i32, i32
  }
  func.func @transform_5(%arg0: i32) -> (i32, i32) {
    %c0_i32 = arith.constant 0 : i32
    %c0_i32_0 = arith.constant 0 : i32
    %c0_i32_1 = arith.constant 0 : i32
    return %c0_i32, %c0_i32_0 : i32, i32
  }
}

module attributes {stable_mosaic.version = 11 : i64} {
  func.func @_gru_seq_kernel(%arg0: i32, %arg1: memref<8x8x384xf32, #tpu.memory_space<vmem>>, %arg2: memref<128x384xf32, #tpu.memory_space<vmem>>, %arg3: memref<8x128xf32, #tpu.memory_space<vmem>>, %arg4: memref<8x128xf32, #tpu.memory_space<vmem>>, %arg5: memref<8x128xf32, #tpu.memory_space<vmem>>, %arg6: memref<8x128xf32, #tpu.memory_space<vmem>>) attributes {dimension_semantics = [#tpu.dimension_semantics<arbitrary>], iteration_bounds = array<i64: 1>, scalar_prefetch = 0 : i64, scratch_operands = 1 : i64, tpu.core_type = #tpu.core_type<tc>, window_params = [{transform_indices = @transform_0, window_bounds = array<i64: 8, 8, 384>}, {pipeline_mode = #tpu.pipeline_mode<synchronous>, transform_indices = @transform_1, window_bounds = array<i64: 128, 384>}, {pipeline_mode = #tpu.pipeline_mode<synchronous>, transform_indices = @transform_2, window_bounds = array<i64: 8, 128>}, {pipeline_mode = #tpu.pipeline_mode<synchronous>, transform_indices = @transform_3, window_bounds = array<i64: 8, 128>}, {pipeline_mode = #tpu.pipeline_mode<synchronous>, transform_indices = @transform_4, window_bounds = array<i64: 8, 128>}]} {
    %c0_i32 = arith.constant 0 : i32
    %0 = arith.cmpi eq, %arg0, %c0_i32 : i32
    %1 = arith.extui %0 : i1 to i32
    %c0_i32_0 = arith.constant 0 : i32
    %2 = arith.cmpi ne, %1, %c0_i32_0 : i32
    scf.if %2 {
      %c0_66 = arith.constant 0 : index
      %c0_67 = arith.constant 0 : index
      %266 = vector.load %arg4[%c0_66, %c0_67] : memref<8x128xf32, #tpu.memory_space<vmem>>, vector<8x128xf32>
      %c0_68 = arith.constant 0 : index
      %c0_69 = arith.constant 0 : index
      %267 = vector.load %arg6[%c0_68, %c0_69] : memref<8x128xf32, #tpu.memory_space<vmem>>, vector<8x128xf32>
      tpu.vector_store %arg6[%c0_68, %c0_69], %266 {strides = array<i32>} : memref<8x128xf32, #tpu.memory_space<vmem>>, vector<8x128xf32>,
    } else {
    }
    %c0 = arith.constant 0 : index
    %c0_1 = arith.constant 0 : index
    %3 = vector.load %arg2[%c0, %c0_1] : memref<128x384xf32, #tpu.memory_space<vmem>>, vector<128x384xf32>
    %c0_2 = arith.constant 0 : index
    %c0_3 = arith.constant 0 : index
    %4 = vector.load %arg3[%c0_2, %c0_3] : memref<8x128xf32, #tpu.memory_space<vmem>>, vector<8x128xf32>
    %c0_4 = arith.constant 0 : index
    %c0_5 = arith.constant 0 : index
    %5 = vector.load %arg6[%c0_4, %c0_5] : memref<8x128xf32, #tpu.memory_space<vmem>>, vector<8x128xf32>
    %c0_i32_6 = arith.constant 0 : i32
    %c7_i32 = arith.constant 7 : i32
    %6 = arith.subi %c7_i32, %c0_i32_6 : i32
    %7 = arith.index_cast %6 : i32 to index
    %c0_7 = arith.constant 0 : index
    %c0_8 = arith.constant 0 : index
    %8 = vector.load %arg1[%7, %c0_7, %c0_8] : memref<8x8x384xf32, #tpu.memory_space<vmem>>, vector<1x8x384xf32>
    %9 = vector.shape_cast %8 : vector<1x8x384xf32> to vector<8x384xf32>
    %cst = arith.constant dense<0.000000e+00> : vector<8x384xf32>
    %10 = tpu.matmul %5, %3, %cst {dimension_numbers = #tpu.dot_dimension_numbers<[1], [0], [0], [1], [0, 0, 1, 1], [], []>} : vector<8x128xf32>, vector<128x384xf32>, vector<8x384xf32> -> vector<8x384xf32>
    %11 = vector.extract_strided_slice %9 {offsets = [0, 0], sizes = [8, 128], strides = [1, 1]} : vector<8x384xf32> to vector<8x128xf32>
    %12 = vector.extract_strided_slice %10 {offsets = [0, 0], sizes = [8, 128], strides = [1, 1]} : vector<8x384xf32> to vector<8x128xf32>
    %13 = arith.addf %11, %12 : vector<8x128xf32>
    %14 = arith.negf %13 : vector<8x128xf32>
    %15 = math.exp %14 : vector<8x128xf32>
    %cst_9 = arith.constant 1.000000e+00 : f32
    %16 = vector.broadcast %cst_9 : f32 to vector<8x128xf32>
    %17 = arith.addf %16, %15 : vector<8x128xf32>
    %18 = arith.divf %16, %17 : vector<8x128xf32>
    %19 = vector.extract_strided_slice %9 {offsets = [0, 128], sizes = [8, 128], strides = [1, 1]} : vector<8x384xf32> to vector<8x128xf32>
    %20 = vector.extract_strided_slice %10 {offsets = [0, 128], sizes = [8, 128], strides = [1, 1]} : vector<8x384xf32> to vector<8x128xf32>
    %21 = arith.addf %19, %20 : vector<8x128xf32>
    %22 = arith.negf %21 : vector<8x128xf32>
    %23 = math.exp %22 : vector<8x128xf32>
    %cst_10 = arith.constant 1.000000e+00 : f32
    %24 = vector.broadcast %cst_10 : f32 to vector<8x128xf32>
    %25 = arith.addf %24, %23 : vector<8x128xf32>
    %26 = arith.divf %24, %25 : vector<8x128xf32>
    %27 = vector.extract_strided_slice %9 {offsets = [0, 256], sizes = [8, 128], strides = [1, 1]} : vector<8x384xf32> to vector<8x128xf32>
    %28 = vector.extract_strided_slice %10 {offsets = [0, 256], sizes = [8, 128], strides = [1, 1]} : vector<8x384xf32> to vector<8x128xf32>
    %29 = arith.addf %28, %4 : vector<8x128xf32>
    %30 = arith.mulf %18, %29 : vector<8x128xf32>
    %31 = arith.addf %27, %30 : vector<8x128xf32>
    %32 = math.tanh %31 : vector<8x128xf32>
    %cst_11 = arith.constant 1.000000e+00 : f32
    %33 = vector.broadcast %cst_11 : f32 to vector<8x128xf32>
    %34 = arith.subf %33, %26 : vector<8x128xf32>
    %35 = arith.mulf %34, %32 : vector<8x128xf32>
    %36 = arith.mulf %26, %5 : vector<8x128xf32>
    %37 = arith.addf %35, %36 : vector<8x128xf32>
    %c1_i32 = arith.constant 1 : i32
    %c7_i32_12 = arith.constant 7 : i32
    %38 = arith.subi %c7_i32_12, %c1_i32 : i32
    %39 = arith.index_cast %38 : i32 to index
    %c0_13 = arith.constant 0 : index
    %c0_14 = arith.constant 0 : index
    %40 = vector.load %arg1[%39, %c0_13, %c0_14] : memref<8x8x384xf32, #tpu.memory_space<vmem>>, vector<1x8x384xf32>
    %41 = vector.shape_cast %40 : vector<1x8x384xf32> to vector<8x384xf32>
    %cst_15 = arith.constant dense<0.000000e+00> : vector<8x384xf32>
    %42 = tpu.matmul %37, %3, %cst_15 {dimension_numbers = #tpu.dot_dimension_numbers<[1], [0], [0], [1], [0, 0, 1, 1], [], []>} : vector<8x128xf32>, vector<128x384xf32>, vector<8x384xf32> -> vector<8x384xf32>
    %43 = vector.extract_strided_slice %41 {offsets = [0, 0], sizes = [8, 128], strides = [1, 1]} : vector<8x384xf32> to vector<8x128xf32>
    %44 = vector.extract_strided_slice %42 {offsets = [0, 0], sizes = [8, 128], strides = [1, 1]} : vector<8x384xf32> to vector<8x128xf32>
    %45 = arith.addf %43, %44 : vector<8x128xf32>
    %46 = arith.negf %45 : vector<8x128xf32>
    %47 = math.exp %46 : vector<8x128xf32>
    %cst_16 = arith.constant 1.000000e+00 : f32
    %48 = vector.broadcast %cst_16 : f32 to vector<8x128xf32>
    %49 = arith.addf %48, %47 : vector<8x128xf32>
    %50 = arith.divf %48, %49 : vector<8x128xf32>
    %51 = vector.extract_strided_slice %41 {offsets = [0, 128], sizes = [8, 128], strides = [1, 1]} : vector<8x384xf32> to vector<8x128xf32>
    %52 = vector.extract_strided_slice %42 {offsets = [0, 128], sizes = [8, 128], strides = [1, 1]} : vector<8x384xf32> to vector<8x128xf32>
    %53 = arith.addf %51, %52 : vector<8x128xf32>
    %54 = arith.negf %53 : vector<8x128xf32>
    %55 = math.exp %54 : vector<8x128xf32>
    %cst_17 = arith.constant 1.000000e+00 : f32
    %56 = vector.broadcast %cst_17 : f32 to vector<8x128xf32>
    %57 = arith.addf %56, %55 : vector<8x128xf32>
    %58 = arith.divf %56, %57 : vector<8x128xf32>
    %59 = vector.extract_strided_slice %41 {offsets = [0, 256], sizes = [8, 128], strides = [1, 1]} : vector<8x384xf32> to vector<8x128xf32>
    %60 = vector.extract_strided_slice %42 {offsets = [0, 256], sizes = [8, 128], strides = [1, 1]} : vector<8x384xf32> to vector<8x128xf32>
    %61 = arith.addf %60, %4 : vector<8x128xf32>
    %62 = arith.mulf %50, %61 : vector<8x128xf32>
    %63 = arith.addf %59, %62 : vector<8x128xf32>
    %64 = math.tanh %63 : vector<8x128xf32>
    %cst_18 = arith.constant 1.000000e+00 : f32
    %65 = vector.broadcast %cst_18 : f32 to vector<8x128xf32>
    %66 = arith.subf %65, %58 : vector<8x128xf32>
    %67 = arith.mulf %66, %64 : vector<8x128xf32>
    %68 = arith.mulf %58, %37 : vector<8x128xf32>
    %69 = arith.addf %67, %68 : vector<8x128xf32>
    %c2_i32 = arith.constant 2 : i32
    %c7_i32_19 = arith.constant 7 : i32
    %70 = arith.subi %c7_i32_19, %c2_i32 : i32
    %71 = arith.index_cast %70 : i32 to index
    %c0_20 = arith.constant 0 : index
    %c0_21 = arith.constant 0 : index
    %72 = vector.load %arg1[%71, %c0_20, %c0_21] : memref<8x8x384xf32, #tpu.memory_space<vmem>>, vector<1x8x384xf32>
    %73 = vector.shape_cast %72 : vector<1x8x384xf32> to vector<8x384xf32>
    %cst_22 = arith.constant dense<0.000000e+00> : vector<8x384xf32>
    %74 = tpu.matmul %69, %3, %cst_22 {dimension_numbers = #tpu.dot_dimension_numbers<[1], [0], [0], [1], [0, 0, 1, 1], [], []>} : vector<8x128xf32>, vector<128x384xf32>, vector<8x384xf32> -> vector<8x384xf32>
    %75 = vector.extract_strided_slice %73 {offsets = [0, 0], sizes = [8, 128], strides = [1, 1]} : vector<8x384xf32> to vector<8x128xf32>
    %76 = vector.extract_strided_slice %74 {offsets = [0, 0], sizes = [8, 128], strides = [1, 1]} : vector<8x384xf32> to vector<8x128xf32>
    %77 = arith.addf %75, %76 : vector<8x128xf32>
    %78 = arith.negf %77 : vector<8x128xf32>
    %79 = math.exp %78 : vector<8x128xf32>
    %cst_23 = arith.constant 1.000000e+00 : f32
    %80 = vector.broadcast %cst_23 : f32 to vector<8x128xf32>
    %81 = arith.addf %80, %79 : vector<8x128xf32>
    %82 = arith.divf %80, %81 : vector<8x128xf32>
    %83 = vector.extract_strided_slice %73 {offsets = [0, 128], sizes = [8, 128], strides = [1, 1]} : vector<8x384xf32> to vector<8x128xf32>
    %84 = vector.extract_strided_slice %74 {offsets = [0, 128], sizes = [8, 128], strides = [1, 1]} : vector<8x384xf32> to vector<8x128xf32>
    %85 = arith.addf %83, %84 : vector<8x128xf32>
    %86 = arith.negf %85 : vector<8x128xf32>
    %87 = math.exp %86 : vector<8x128xf32>
    %cst_24 = arith.constant 1.000000e+00 : f32
    %88 = vector.broadcast %cst_24 : f32 to vector<8x128xf32>
    %89 = arith.addf %88, %87 : vector<8x128xf32>
    %90 = arith.divf %88, %89 : vector<8x128xf32>
    %91 = vector.extract_strided_slice %73 {offsets = [0, 256], sizes = [8, 128], strides = [1, 1]} : vector<8x384xf32> to vector<8x128xf32>
    %92 = vector.extract_strided_slice %74 {offsets = [0, 256], sizes = [8, 128], strides = [1, 1]} : vector<8x384xf32> to vector<8x128xf32>
    %93 = arith.addf %92, %4 : vector<8x128xf32>
    %94 = arith.mulf %82, %93 : vector<8x128xf32>
    %95 = arith.addf %91, %94 : vector<8x128xf32>
    %96 = math.tanh %95 : vector<8x128xf32>
    %cst_25 = arith.constant 1.000000e+00 : f32
    %97 = vector.broadcast %cst_25 : f32 to vector<8x128xf32>
    %98 = arith.subf %97, %90 : vector<8x128xf32>
    %99 = arith.mulf %98, %96 : vector<8x128xf32>
    %100 = arith.mulf %90, %69 : vector<8x128xf32>
    %101 = arith.addf %99, %100 : vector<8x128xf32>
    %c3_i32 = arith.constant 3 : i32
    %c7_i32_26 = arith.constant 7 : i32
    %102 = arith.subi %c7_i32_26, %c3_i32 : i32
    %103 = arith.index_cast %102 : i32 to index
    %c0_27 = arith.constant 0 : index
    %c0_28 = arith.constant 0 : index
    %104 = vector.load %arg1[%103, %c0_27, %c0_28] : memref<8x8x384xf32, #tpu.memory_space<vmem>>, vector<1x8x384xf32>
    %105 = vector.shape_cast %104 : vector<1x8x384xf32> to vector<8x384xf32>
    %cst_29 = arith.constant dense<0.000000e+00> : vector<8x384xf32>
    %106 = tpu.matmul %101, %3, %cst_29 {dimension_numbers = #tpu.dot_dimension_numbers<[1], [0], [0], [1], [0, 0, 1, 1], [], []>} : vector<8x128xf32>, vector<128x384xf32>, vector<8x384xf32> -> vector<8x384xf32>
    %107 = vector.extract_strided_slice %105 {offsets = [0, 0], sizes = [8, 128], strides = [1, 1]} : vector<8x384xf32> to vector<8x128xf32>
    %108 = vector.extract_strided_slice %106 {offsets = [0, 0], sizes = [8, 128], strides = [1, 1]} : vector<8x384xf32> to vector<8x128xf32>
    %109 = arith.addf %107, %108 : vector<8x128xf32>
    %110 = arith.negf %109 : vector<8x128xf32>
    %111 = math.exp %110 : vector<8x128xf32>
    %cst_30 = arith.constant 1.000000e+00 : f32
    %112 = vector.broadcast %cst_30 : f32 to vector<8x128xf32>
    %113 = arith.addf %112, %111 : vector<8x128xf32>
    %114 = arith.divf %112, %113 : vector<8x128xf32>
    %115 = vector.extract_strided_slice %105 {offsets = [0, 128], sizes = [8, 128], strides = [1, 1]} : vector<8x384xf32> to vector<8x128xf32>
    %116 = vector.extract_strided_slice %106 {offsets = [0, 128], sizes = [8, 128], strides = [1, 1]} : vector<8x384xf32> to vector<8x128xf32>
    %117 = arith.addf %115, %116 : vector<8x128xf32>
    %118 = arith.negf %117 : vector<8x128xf32>
    %119 = math.exp %118 : vector<8x128xf32>
    %cst_31 = arith.constant 1.000000e+00 : f32
    %120 = vector.broadcast %cst_31 : f32 to vector<8x128xf32>
    %121 = arith.addf %120, %119 : vector<8x128xf32>
    %122 = arith.divf %120, %121 : vector<8x128xf32>
    %123 = vector.extract_strided_slice %105 {offsets = [0, 256], sizes = [8, 128], strides = [1, 1]} : vector<8x384xf32> to vector<8x128xf32>
    %124 = vector.extract_strided_slice %106 {offsets = [0, 256], sizes = [8, 128], strides = [1, 1]} : vector<8x384xf32> to vector<8x128xf32>
    %125 = arith.addf %124, %4 : vector<8x128xf32>
    %126 = arith.mulf %114, %125 : vector<8x128xf32>
    %127 = arith.addf %123, %126 : vector<8x128xf32>
    %128 = math.tanh %127 : vector<8x128xf32>
    %cst_32 = arith.constant 1.000000e+00 : f32
    %129 = vector.broadcast %cst_32 : f32 to vector<8x128xf32>
    %130 = arith.subf %129, %122 : vector<8x128xf32>
    %131 = arith.mulf %130, %128 : vector<8x128xf32>
    %132 = arith.mulf %122, %101 : vector<8x128xf32>
    %133 = arith.addf %131, %132 : vector<8x128xf32>
    %c4_i32 = arith.constant 4 : i32
    %c7_i32_33 = arith.constant 7 : i32
    %134 = arith.subi %c7_i32_33, %c4_i32 : i32
    %135 = arith.index_cast %134 : i32 to index
    %c0_34 = arith.constant 0 : index
    %c0_35 = arith.constant 0 : index
    %136 = vector.load %arg1[%135, %c0_34, %c0_35] : memref<8x8x384xf32, #tpu.memory_space<vmem>>, vector<1x8x384xf32>
    %137 = vector.shape_cast %136 : vector<1x8x384xf32> to vector<8x384xf32>
    %cst_36 = arith.constant dense<0.000000e+00> : vector<8x384xf32>
    %138 = tpu.matmul %133, %3, %cst_36 {dimension_numbers = #tpu.dot_dimension_numbers<[1], [0], [0], [1], [0, 0, 1, 1], [], []>} : vector<8x128xf32>, vector<128x384xf32>, vector<8x384xf32> -> vector<8x384xf32>
    %139 = vector.extract_strided_slice %137 {offsets = [0, 0], sizes = [8, 128], strides = [1, 1]} : vector<8x384xf32> to vector<8x128xf32>
    %140 = vector.extract_strided_slice %138 {offsets = [0, 0], sizes = [8, 128], strides = [1, 1]} : vector<8x384xf32> to vector<8x128xf32>
    %141 = arith.addf %139, %140 : vector<8x128xf32>
    %142 = arith.negf %141 : vector<8x128xf32>
    %143 = math.exp %142 : vector<8x128xf32>
    %cst_37 = arith.constant 1.000000e+00 : f32
    %144 = vector.broadcast %cst_37 : f32 to vector<8x128xf32>
    %145 = arith.addf %144, %143 : vector<8x128xf32>
    %146 = arith.divf %144, %145 : vector<8x128xf32>
    %147 = vector.extract_strided_slice %137 {offsets = [0, 128], sizes = [8, 128], strides = [1, 1]} : vector<8x384xf32> to vector<8x128xf32>
    %148 = vector.extract_strided_slice %138 {offsets = [0, 128], sizes = [8, 128], strides = [1, 1]} : vector<8x384xf32> to vector<8x128xf32>
    %149 = arith.addf %147, %148 : vector<8x128xf32>
    %150 = arith.negf %149 : vector<8x128xf32>
    %151 = math.exp %150 : vector<8x128xf32>
    %cst_38 = arith.constant 1.000000e+00 : f32
    %152 = vector.broadcast %cst_38 : f32 to vector<8x128xf32>
    %153 = arith.addf %152, %151 : vector<8x128xf32>
    %154 = arith.divf %152, %153 : vector<8x128xf32>
    %155 = vector.extract_strided_slice %137 {offsets = [0, 256], sizes = [8, 128], strides = [1, 1]} : vector<8x384xf32> to vector<8x128xf32>
    %156 = vector.extract_strided_slice %138 {offsets = [0, 256], sizes = [8, 128], strides = [1, 1]} : vector<8x384xf32> to vector<8x128xf32>
    %157 = arith.addf %156, %4 : vector<8x128xf32>
    %158 = arith.mulf %146, %157 : vector<8x128xf32>
    %159 = arith.addf %155, %158 : vector<8x128xf32>
    %160 = math.tanh %159 : vector<8x128xf32>
    %cst_39 = arith.constant 1.000000e+00 : f32
    %161 = vector.broadcast %cst_39 : f32 to vector<8x128xf32>
    %162 = arith.subf %161, %154 : vector<8x128xf32>
    %163 = arith.mulf %162, %160 : vector<8x128xf32>
    %164 = arith.mulf %154, %133 : vector<8x128xf32>
    %165 = arith.addf %163, %164 : vector<8x128xf32>
    %c5_i32 = arith.constant 5 : i32
    %c7_i32_40 = arith.constant 7 : i32
    %166 = arith.subi %c7_i32_40, %c5_i32 : i32
    %167 = arith.index_cast %166 : i32 to index
    %c0_41 = arith.constant 0 : index
    %c0_42 = arith.constant 0 : index
    %168 = vector.load %arg1[%167, %c0_41, %c0_42] : memref<8x8x384xf32, #tpu.memory_space<vmem>>, vector<1x8x384xf32>
    %169 = vector.shape_cast %168 : vector<1x8x384xf32> to vector<8x384xf32>
    %cst_43 = arith.constant dense<0.000000e+00> : vector<8x384xf32>
    %170 = tpu.matmul %165, %3, %cst_43 {dimension_numbers = #tpu.dot_dimension_numbers<[1], [0], [0], [1], [0, 0, 1, 1], [], []>} : vector<8x128xf32>, vector<128x384xf32>, vector<8x384xf32> -> vector<8x384xf32>
    %171 = vector.extract_strided_slice %169 {offsets = [0, 0], sizes = [8, 128], strides = [1, 1]} : vector<8x384xf32> to vector<8x128xf32>
    %172 = vector.extract_strided_slice %170 {offsets = [0, 0], sizes = [8, 128], strides = [1, 1]} : vector<8x384xf32> to vector<8x128xf32>
    %173 = arith.addf %171, %172 : vector<8x128xf32>
    %174 = arith.negf %173 : vector<8x128xf32>
    %175 = math.exp %174 : vector<8x128xf32>
    %cst_44 = arith.constant 1.000000e+00 : f32
    %176 = vector.broadcast %cst_44 : f32 to vector<8x128xf32>
    %177 = arith.addf %176, %175 : vector<8x128xf32>
    %178 = arith.divf %176, %177 : vector<8x128xf32>
    %179 = vector.extract_strided_slice %169 {offsets = [0, 128], sizes = [8, 128], strides = [1, 1]} : vector<8x384xf32> to vector<8x128xf32>
    %180 = vector.extract_strided_slice %170 {offsets = [0, 128], sizes = [8, 128], strides = [1, 1]} : vector<8x384xf32> to vector<8x128xf32>
    %181 = arith.addf %179, %180 : vector<8x128xf32>
    %182 = arith.negf %181 : vector<8x128xf32>
    %183 = math.exp %182 : vector<8x128xf32>
    %cst_45 = arith.constant 1.000000e+00 : f32
    %184 = vector.broadcast %cst_45 : f32 to vector<8x128xf32>
    %185 = arith.addf %184, %183 : vector<8x128xf32>
    %186 = arith.divf %184, %185 : vector<8x128xf32>
    %187 = vector.extract_strided_slice %169 {offsets = [0, 256], sizes = [8, 128], strides = [1, 1]} : vector<8x384xf32> to vector<8x128xf32>
    %188 = vector.extract_strided_slice %170 {offsets = [0, 256], sizes = [8, 128], strides = [1, 1]} : vector<8x384xf32> to vector<8x128xf32>
    %189 = arith.addf %188, %4 : vector<8x128xf32>
    %190 = arith.mulf %178, %189 : vector<8x128xf32>
    %191 = arith.addf %187, %190 : vector<8x128xf32>
    %192 = math.tanh %191 : vector<8x128xf32>
    %cst_46 = arith.constant 1.000000e+00 : f32
    %193 = vector.broadcast %cst_46 : f32 to vector<8x128xf32>
    %194 = arith.subf %193, %186 : vector<8x128xf32>
    %195 = arith.mulf %194, %192 : vector<8x128xf32>
    %196 = arith.mulf %186, %165 : vector<8x128xf32>
    %197 = arith.addf %195, %196 : vector<8x128xf32>
    %c6_i32 = arith.constant 6 : i32
    %c7_i32_47 = arith.constant 7 : i32
    %198 = arith.subi %c7_i32_47, %c6_i32 : i32
    %199 = arith.index_cast %198 : i32 to index
    %c0_48 = arith.constant 0 : index
    %c0_49 = arith.constant 0 : index
    %200 = vector.load %arg1[%199, %c0_48, %c0_49] : memref<8x8x384xf32, #tpu.memory_space<vmem>>, vector<1x8x384xf32>
    %201 = vector.shape_cast %200 : vector<1x8x384xf32> to vector<8x384xf32>
    %cst_50 = arith.constant dense<0.000000e+00> : vector<8x384xf32>
    %202 = tpu.matmul %197, %3, %cst_50 {dimension_numbers = #tpu.dot_dimension_numbers<[1], [0], [0], [1], [0, 0, 1, 1], [], []>} : vector<8x128xf32>, vector<128x384xf32>, vector<8x384xf32> -> vector<8x384xf32>
    %203 = vector.extract_strided_slice %201 {offsets = [0, 0], sizes = [8, 128], strides = [1, 1]} : vector<8x384xf32> to vector<8x128xf32>
    %204 = vector.extract_strided_slice %202 {offsets = [0, 0], sizes = [8, 128], strides = [1, 1]} : vector<8x384xf32> to vector<8x128xf32>
    %205 = arith.addf %203, %204 : vector<8x128xf32>
    %206 = arith.negf %205 : vector<8x128xf32>
    %207 = math.exp %206 : vector<8x128xf32>
    %cst_51 = arith.constant 1.000000e+00 : f32
    %208 = vector.broadcast %cst_51 : f32 to vector<8x128xf32>
    %209 = arith.addf %208, %207 : vector<8x128xf32>
    %210 = arith.divf %208, %209 : vector<8x128xf32>
    %211 = vector.extract_strided_slice %201 {offsets = [0, 128], sizes = [8, 128], strides = [1, 1]} : vector<8x384xf32> to vector<8x128xf32>
    %212 = vector.extract_strided_slice %202 {offsets = [0, 128], sizes = [8, 128], strides = [1, 1]} : vector<8x384xf32> to vector<8x128xf32>
    %213 = arith.addf %211, %212 : vector<8x128xf32>
    %214 = arith.negf %213 : vector<8x128xf32>
    %215 = math.exp %214 : vector<8x128xf32>
    %cst_52 = arith.constant 1.000000e+00 : f32
    %216 = vector.broadcast %cst_52 : f32 to vector<8x128xf32>
    %217 = arith.addf %216, %215 : vector<8x128xf32>
    %218 = arith.divf %216, %217 : vector<8x128xf32>
    %219 = vector.extract_strided_slice %201 {offsets = [0, 256], sizes = [8, 128], strides = [1, 1]} : vector<8x384xf32> to vector<8x128xf32>
    %220 = vector.extract_strided_slice %202 {offsets = [0, 256], sizes = [8, 128], strides = [1, 1]} : vector<8x384xf32> to vector<8x128xf32>
    %221 = arith.addf %220, %4 : vector<8x128xf32>
    %222 = arith.mulf %210, %221 : vector<8x128xf32>
    %223 = arith.addf %219, %222 : vector<8x128xf32>
    %224 = math.tanh %223 : vector<8x128xf32>
    %cst_53 = arith.constant 1.000000e+00 : f32
    %225 = vector.broadcast %cst_53 : f32 to vector<8x128xf32>
    %226 = arith.subf %225, %218 : vector<8x128xf32>
    %227 = arith.mulf %226, %224 : vector<8x128xf32>
    %228 = arith.mulf %218, %197 : vector<8x128xf32>
    %229 = arith.addf %227, %228 : vector<8x128xf32>
    %c7_i32_54 = arith.constant 7 : i32
    %c7_i32_55 = arith.constant 7 : i32
    %230 = arith.subi %c7_i32_55, %c7_i32_54 : i32
    %231 = arith.index_cast %230 : i32 to index
    %c0_56 = arith.constant 0 : index
    %c0_57 = arith.constant 0 : index
    %232 = vector.load %arg1[%231, %c0_56, %c0_57] : memref<8x8x384xf32, #tpu.memory_space<vmem>>, vector<1x8x384xf32>
    %233 = vector.shape_cast %232 : vector<1x8x384xf32> to vector<8x384xf32>
    %cst_58 = arith.constant dense<0.000000e+00> : vector<8x384xf32>
    %234 = tpu.matmul %229, %3, %cst_58 {dimension_numbers = #tpu.dot_dimension_numbers<[1], [0], [0], [1], [0, 0, 1, 1], [], []>} : vector<8x128xf32>, vector<128x384xf32>, vector<8x384xf32> -> vector<8x384xf32>
    %235 = vector.extract_strided_slice %233 {offsets = [0, 0], sizes = [8, 128], strides = [1, 1]} : vector<8x384xf32> to vector<8x128xf32>
    %236 = vector.extract_strided_slice %234 {offsets = [0, 0], sizes = [8, 128], strides = [1, 1]} : vector<8x384xf32> to vector<8x128xf32>
    %237 = arith.addf %235, %236 : vector<8x128xf32>
    %238 = arith.negf %237 : vector<8x128xf32>
    %239 = math.exp %238 : vector<8x128xf32>
    %cst_59 = arith.constant 1.000000e+00 : f32
    %240 = vector.broadcast %cst_59 : f32 to vector<8x128xf32>
    %241 = arith.addf %240, %239 : vector<8x128xf32>
    %242 = arith.divf %240, %241 : vector<8x128xf32>
    %243 = vector.extract_strided_slice %233 {offsets = [0, 128], sizes = [8, 128], strides = [1, 1]} : vector<8x384xf32> to vector<8x128xf32>
    %244 = vector.extract_strided_slice %234 {offsets = [0, 128], sizes = [8, 128], strides = [1, 1]} : vector<8x384xf32> to vector<8x128xf32>
    %245 = arith.addf %243, %244 : vector<8x128xf32>
    %246 = arith.negf %245 : vector<8x128xf32>
    %247 = math.exp %246 : vector<8x128xf32>
    %cst_60 = arith.constant 1.000000e+00 : f32
    %248 = vector.broadcast %cst_60 : f32 to vector<8x128xf32>
    %249 = arith.addf %248, %247 : vector<8x128xf32>
    %250 = arith.divf %248, %249 : vector<8x128xf32>
    %251 = vector.extract_strided_slice %233 {offsets = [0, 256], sizes = [8, 128], strides = [1, 1]} : vector<8x384xf32> to vector<8x128xf32>
    %252 = vector.extract_strided_slice %234 {offsets = [0, 256], sizes = [8, 128], strides = [1, 1]} : vector<8x384xf32> to vector<8x128xf32>
    %253 = arith.addf %252, %4 : vector<8x128xf32>
    %254 = arith.mulf %242, %253 : vector<8x128xf32>
    %255 = arith.addf %251, %254 : vector<8x128xf32>
    %256 = math.tanh %255 : vector<8x128xf32>
    %cst_61 = arith.constant 1.000000e+00 : f32
    %257 = vector.broadcast %cst_61 : f32 to vector<8x128xf32>
    %258 = arith.subf %257, %250 : vector<8x128xf32>
    %259 = arith.mulf %258, %256 : vector<8x128xf32>
    %260 = arith.mulf %250, %229 : vector<8x128xf32>
    %261 = arith.addf %259, %260 : vector<8x128xf32>
    %c8_i32 = arith.constant 8 : i32
    %c0_62 = arith.constant 0 : index
    %c0_63 = arith.constant 0 : index
    %262 = vector.load %arg6[%c0_62, %c0_63] : memref<8x128xf32, #tpu.memory_space<vmem>>, vector<8x128xf32>
    tpu.vector_store %arg6[%c0_62, %c0_63], %261 {strides = array<i32>} : memref<8x128xf32, #tpu.memory_space<vmem>>, vector<8x128xf32>,
    %c0_i32_64 = arith.constant 0 : i32
    %263 = arith.cmpi eq, %arg0, %c0_i32_64 : i32
    %264 = arith.extui %263 : i1 to i32
    %c0_i32_65 = arith.constant 0 : i32
    %265 = arith.cmpi ne, %264, %c0_i32_65 : i32
    scf.if %265 {
      %c0_66 = arith.constant 0 : index
      %c0_67 = arith.constant 0 : index
      %266 = vector.load %arg5[%c0_66, %c0_67] : memref<8x128xf32, #tpu.memory_space<vmem>>, vector<8x128xf32>
      tpu.vector_store %arg5[%c0_66, %c0_67], %261 {strides = array<i32>} : memref<8x128xf32, #tpu.memory_space<vmem>>, vector<8x128xf32>,
    } else {
    }
    return
  }
  func.func @transform_0(%arg0: i32) -> (i32, i32, i32) {
    %c0_i32 = arith.constant 0 : i32
    %0 = arith.subi %c0_i32, %arg0 : i32
    %c0_i32_0 = arith.constant 0 : i32
    %c0_i32_1 = arith.constant 0 : i32
    %c0_i32_2 = arith.constant 0 : i32
    return %0, %c0_i32_0, %c0_i32_1 : i32, i32, i32
  }
  func.func @transform_1(%arg0: i32) -> (i32, i32) {
    %c0_i32 = arith.constant 0 : i32
    %c0_i32_0 = arith.constant 0 : i32
    %c0_i32_1 = arith.constant 0 : i32
    return %c0_i32, %c0_i32_0 : i32, i32
  }
  func.func @transform_2(%arg0: i32) -> (i32, i32) {
    %c0_i32 = arith.constant 0 : i32
    %c0_i32_0 = arith.constant 0 : i32
    %c0_i32_1 = arith.constant 0 : i32
    return %c0_i32, %c0_i32_0 : i32, i32
  }
  func.func @transform_3(%arg0: i32) -> (i32, i32) {
    %c0_i32 = arith.constant 0 : i32
    %c0_i32_0 = arith.constant 0 : i32
    %c0_i32_1 = arith.constant 0 : i32
    return %c0_i32, %c0_i32_0 : i32, i32
  }
  func.func @transform_4(%arg0: i32) -> (i32, i32) {
    %c0_i32 = arith.constant 0 : i32
    %c0_i32_0 = arith.constant 0 : i32
    %c0_i32_1 = arith.constant 0 : i32
    return %c0_i32, %c0_i32_0 : i32, i32
  }
}

</mosaic_0001>

<bundles_post_ra>
// kernel: encoder_forward.4
= control target key start
LH: loop header
LB: loop body
LE: loop exit
PB: predicated region body
PF: predicated region fallthrough
CT: control target
= control target key end

     0   :  { %11 = vsyncpa [#allocation4], 0  ;;  %s3139_s0 = inlined_call_operand.hbm [shape: f32[8,8,384], index: 0, kind: input, shape index: {}]   ;;  %s3140_s1 = inlined_call_operand.hbm [shape: f32[128,384], index: 1, kind: input, shape index: {}]   ;;  %s3141_s2 = inlined_call_operand.hbm [shape: f32[8,128], index: 2, kind: input, shape index: {}]   ;;  %s3142_s3 = inlined_call_operand.hbm [shape: f32[8,128], index: 3, kind: input, shape index: {}]   ;;  %s3143_s4 = inlined_call_operand.hbm [shape: f32[8,8,128], index: 4, kind: output, shape index: {0}]   ;;  %s3144_s5 = inlined_call_operand.hbm [shape: f32[8,128], index: 5, kind: output, shape index: {1}]  }
   0x1   :  { %12 = vsyncpa [#allocation7], 0 }
   0x2   :  { %13 = vsyncpa [#allocation10], 0 }
   0x3   :  { %14 = vsyncpa [#allocation5], 0 }
   0x4   :  { %15 = vsyncpa [#allocation13], 0  ;;  %s2631_s18 = smov [#allocation6]   ;;  %s2632_s20 = smov [#allocation3]  }
   0x5   :  { %s33_s19 = sshll.u32 %s2631_s18, 4  ;;  %s21_s21 = sshll.u32 %s2632_s20, 4  ;;  %s34_s19 = int_to_ptr.vmem [resolvable:$true] %s33_s19  ;;  %s2674_s21 = int_to_ptr.vmem [resolvable:$true] %s21_s21 }
   0x6   :  { %s2489_s24 = scalar_lea.hbm %s3140_s1, 6144 }
   0x7   :  { %p2490_p0 = scmp.ne.s32.totalorder %s3140_s1, %s2489_s24  ;;  %p2493_p1 = scmp.lt.u32.totalorder %s2489_s24, %s3140_s1 }
   0x9   :  { %p2495_p2 = pnand %p2493_p1, %p2490_p0 }
   0xb   :  { %2498 = shalt.err (!%p2495_p2)
}
   0xc   :  { %s2499_s29 = scalar_lea.vmem %s34_s19, 6144  ;;  %p2504_p4 = scmp.lt.s32.totalorder %s34_s19, %s34_s19 }
   0xd   :  { %p2500_p3 = scmp.ne.s32.totalorder %s34_s19, %s2499_s29  ;;  %p2505_p5 = scmp.lt.s32.totalorder %s2499_s29, %s2499_s29 }
   0xf   :  { %p2506_p6 = por %p2505_p5, %p2504_p4 }
  0x11   :  { %p2507_p7 = pnand %p2506_p6, %p2500_p3 }
  0x13   :  { %2510 = shalt.err (!%p2507_p7)
}
  0x14   :  { %s2633_s30 = smov 384   ;;  %s2634_s6 = smov 24  }
  0x15   :  { %39 = dma.hbm_to_vmem [thread:$0]  %s3140_s1, 6144, %s34_s19, [#allocation7], %s2633_s30, %s2633_s30, %s2634_s6  }
  0x16   :  { %s2511_s11 = scalar_lea.hbm %s3139_s0, 3072 }
  0x17   :  { %p2512_p8 = scmp.ne.s32.totalorder %s3139_s0, %s2511_s11  ;;  %p2515_p9 = scmp.lt.u32.totalorder %s2511_s11, %s3139_s0 }
  0x19   :  { %p2517_p10 = pnand %p2515_p9, %p2512_p8 }
  0x1b   :  { %2520 = shalt.err (!%p2517_p10)
}
  0x1c   :  { %s2521_s16 = scalar_lea.vmem %s2674_s21, 3072  ;;  %p2526_p12 = scmp.lt.s32.totalorder %s2674_s21, %s2674_s21 }
  0x1d   :  { %p2522_p11 = scmp.ne.s32.totalorder %s2674_s21, %s2521_s16  ;;  %p2527_p13 = scmp.lt.s32.totalorder %s2521_s16, %s2521_s16 }
  0x1f   :  { %p2528_p0 = por %p2527_p13, %p2526_p12 }
  0x21   :  { %p2529_p1 = pnand %p2528_p0, %p2522_p11 }
  0x23   :  { %2532 = shalt.err (!%p2529_p1)
}
  0x24   :  { %27 = dma.hbm_to_vmem [thread:$0]  %s3139_s0, 3072, %s2674_s21, [#allocation4], %s2633_s30, %s2633_s30, %s2634_s6  }
  0x25   :  { %s2635_s18 = smov [#allocation8]   ;;  %s2636_s20 = smov [#allocation9]  }
  0x26   :  { %s46_s19 = sshll.u32 %s2635_s18, 4  ;;  %s56_s22 = sshll.u32 %s2636_s20, 4  ;;  %s47_s19 = int_to_ptr.vmem [resolvable:$true] %s46_s19  ;;  %s57_s22 = int_to_ptr.vmem [resolvable:$true] %s56_s22 }
  0x27   :  { %s2533_s25 = scalar_lea.hbm %s3141_s2, 128 }
  0x28   :  { %p2534_p2 = scmp.ne.s32.totalorder %s3141_s2, %s2533_s25  ;;  %p2537_p3 = scmp.lt.u32.totalorder %s2533_s25, %s3141_s2 }
  0x2a   :  { %p2539_p4 = pnand %p2537_p3, %p2534_p2 }
  0x2c   :  { %2542 = shalt.err (!%p2539_p4)
}
  0x2d   :  { %s2543_s0 = scalar_lea.vmem %s47_s19, 128  ;;  %p2548_p6 = scmp.lt.s32.totalorder %s47_s19, %s47_s19 }
  0x2e   :  { %p2544_p5 = scmp.ne.s32.totalorder %s47_s19, %s2543_s0  ;;  %p2549_p7 = scmp.lt.s32.totalorder %s2543_s0, %s2543_s0 }
  0x30   :  { %p2550_p8 = por %p2549_p7, %p2548_p6 }
  0x32   :  { %p2551_p9 = pnand %p2550_p8, %p2544_p5 }
  0x34   :  { %2554 = shalt.err (!%p2551_p9)
}
  0x35   :  { %49 = dma.hbm_to_vmem [thread:$0]  %s3141_s2, 128, %s47_s19, [#allocation7]  }
  0x36   :  { %s2555_s8 = scalar_lea.hbm %s3142_s3, 128 }
  0x37   :  { %p2556_p10 = scmp.ne.s32.totalorder %s3142_s3, %s2555_s8  ;;  %p2559_p11 = scmp.lt.u32.totalorder %s2555_s8, %s3142_s3 }
  0x39   :  { %p2561_p12 = pnand %p2559_p11, %p2556_p10 }
  0x3b   :  { %2564 = shalt.err (!%p2561_p12)
}
  0x3c   :  { %s2565_s13 = scalar_lea.vmem %s57_s22, 128  ;;  %p2570_p0 = scmp.lt.s32.totalorder %s57_s22, %s57_s22 }
  0x3d   :  { %p2566_p13 = scmp.ne.s32.totalorder %s57_s22, %s2565_s13  ;;  %p2571_p1 = scmp.lt.s32.totalorder %s2565_s13, %s2565_s13 }
  0x3f   :  { %p2572_p2 = por %p2571_p1, %p2570_p0 }
  0x41   :  { %p2573_p3 = pnand %p2572_p2, %p2566_p13 }
  0x43   :  { %2576 = shalt.err (!%p2573_p3)
}
  0x44   :  { %59 = dma.hbm_to_vmem [thread:$0]  %s3142_s3, 128, %s57_s22, [#allocation10]  }
  0x45   :  { %2621 = dma.done.wait [#allocation4], 3072  }
  0x46   :  { %2622 = vsyncadd [#allocation4], 4294964224 }
  0x47   :  { %2623 = dma.done.wait [#allocation7], 6272  }
  0x48   :  { %2624 = vsyncadd [#allocation7], 4294961024 }
  0x49   :  { %2625 = dma.done.wait [#allocation10], 128  }
  0x4a   :  { %2626 = vsyncadd [#allocation10], 4294967168  ;;  %v2637_v0 = vmov 0.0|0.0   ;;  %v2638_v1 = vmov 0.0   ;;  %vm2639_vm0 = vmmov 0   ;;  %v79_v2 = vld [vmem:[#allocation6 + $0x8] sm:$0xff] }
  0x4b   :  { %1980 = vmatprep.subr.bf16.mxu1 %v2637_v0  ;;  %195 = vmatprep.mubr.f32.mxu0 %v2638_v1  ;;  %v82_v3 = vld [vmem:[#allocation6 + $0x20] sm:$0xff]  ;;  %v81_v6 = vld [vmem:[#allocation6 + $0x18] sm:$0xff]  ;;  %v88_v8 = vld [vmem:[#allocation6 + $0x50] sm:$0xff]  ;;  %s2640_s3 = smov [#allocation11]   ;;  %s2641_s16 = smov [#allocation12]  }
  0x4c   :  { %1700 = vmatprep.mubr.msk.f32.mxu1 %vm2639_vm0, %v2638_v1  ;;  %v78_v4 = vld [vmem:[#allocation6] sm:$0xff]  ;;  %v2733_v5 = vpack.c.bf16 %v82_v3, %v79_v2  ;;  %v85_v7 = vld [vmem:[#allocation6 + $0x38] sm:$0xff]  ;;  %v84_v11 = vld [vmem:[#allocation6 + $0x30] sm:$0xff]  ;;  %s1488_s15 = sshll.u32 %s2640_s3, 4  ;;  %s1501_s1 = sshll.u32 %s2641_s16, 4  ;;  %s1489_s15 = int_to_ptr.vmem [resolvable:$true] %s1488_s15  ;;  %s3108_s1 = int_to_ptr.vmem [resolvable:$true] %s1501_s1 }
  0x4d   :  { %v2735_v9 = vpack.c.bf16 %v81_v6, %v78_v4  ;;  %v2737_v10 = vpack.c.bf16 %v88_v8, %v85_v7  ;;  %v87_v12 = vld [vmem:[#allocation6 + $0x48] sm:$0xff]  ;;  %v94_v14 = vld [vmem:[#allocation6 + $0x80] sm:$0xff]  ;;  %v93_v18 = vld [vmem:[#allocation6 + $0x78] sm:$0xff]  ;;  %s2577_s17 = scalar_lea.vmem %s1489_s15, 1024  ;;  %p2582_p5 = scmp.lt.s32.totalorder %s1489_s15, %s1489_s15 }
  0x4e   :  { %v91_v13 = vld [vmem:[#allocation6 + $0x68] sm:$0xff]  ;;  %1949 = vmatprep.subr.bf16.mxu0 %v2733_v5  ;;  %v2741_v15 = vpack.c.bf16 %v87_v12, %v84_v11  ;;  %v90_v17 = vld [vmem:[#allocation6 + $0x60] sm:$0xff]  ;;  %v97_v19 = vld [vmem:[#allocation6 + $0x98] sm:$0xff]  ;;  %p2578_p4 = scmp.ne.s32.totalorder %s1489_s15, %s2577_s17  ;;  %p2583_p6 = scmp.lt.s32.totalorder %s2577_s17, %s2577_s17 }
  0x4f   :  { %1951 = vmatpush1.bf16.msra.mxu0 %v2735_v9  ;;  %v2744_v16 = vpack.c.bf16 %v94_v14, %v91_v13  ;;  %v100_v20 = vld [vmem:[#allocation6 + $0xb0] sm:$0xff]  ;;  %v2747_v21 = vpack.c.bf16 %v93_v18, %v90_v17  ;;  %v99_v24 = vld [vmem:[#allocation6 + $0xa8] sm:$0xff]  ;;  %v106_v28 = vld [vmem:[#allocation6 + $0xe0] sm:$0xff] }
  0x50   :  { %1953 = vmatprep.subr.bf16.mxu0 %v2737_v10  ;;  %v96_v22 = vld [vmem:[#allocation6 + $0x90] sm:$0xff]  ;;  %v2750_v23 = vpack.c.bf16 %v100_v20, %v97_v19  ;;  %v83_v26 = vld [vmem:[#allocation6 + $0x28] sm:$0xff]  ;;  %v86_v30 = vld [vmem:[#allocation6 + $0x40] sm:$0xff]  ;;  %p2584_p7 = por %p2583_p6, %p2582_p5 }
  0x51   :  { %v80_v25 = vld [vmem:[#allocation6 + $0x10] sm:$0xff]  ;;  %v103_v27 = vld [vmem:[#allocation6 + $0xc8] sm:$0xff]  ;;  %v89_v31 = vld [vmem:[#allocation6 + $0x58] sm:$0xff]  ;;  %v2755_v32 = vpack.c.bf16 %v99_v24, %v96_v22 }
  0x52   :  { %v2752_v29 = vpack.c.bf16 %v83_v26, %v80_v25  ;;  %v102_v33 = vld [vmem:[#allocation6 + $0xc0] sm:$0xff]  ;;  %v2758_v34 = vpack.c.bf16 %v89_v31, %v86_v30  ;;  %v2761_v35 = vpack.c.bf16 %v106_v28, %v103_v27  ;;  %v105_v36 = vld [vmem:[#allocation6 + $0xd8] sm:$0xff]  ;;  %v92_v37 = vld [vmem:[#allocation6 + $0x70] sm:$0xff]  ;;  %p2585_p8 = pnand %p2584_p7, %p2578_p4 }
  0x53   :  { %1955 = vmatpush1.bf16.msra.mxu0 %v2741_v15  ;;  %v95_v38 = vld [vmem:[#allocation6 + $0x88] sm:$0xff]  ;;  %v109_v39 = vld [vmem:[#allocation6 + $0xf8] sm:$0xff]  ;;  %v112_v40 = vld [vmem:[#allocation6 + $0x110] sm:$0xff]  ;;  %v2765_v41 = vpack.c.bf16 %v105_v36, %v102_v33 }
  0x54   :  { %1957 = vmatprep.subr.bf16.mxu0 %v2744_v16  ;;  %1982 = vmatpush3.bf16.msra.mxu1 %v2752_v29  ;;  %v108_v42 = vld [vmem:[#allocation6 + $0xf0] sm:$0xff]  ;;  %v2768_v43 = vpack.c.bf16 %v95_v38, %v92_v37  ;;  %v2771_v44 = vpack.c.bf16 %v112_v40, %v109_v39  ;;  %v111_v45 = vld [vmem:[#allocation6 + $0x108] sm:$0xff]  ;;  %v98_v46 = vld [vmem:[#allocation6 + $0xa0] sm:$0xff] }
  0x55   :  { %1983 = vmatprep.subr.bf16.mxu1 %v2637_v0  ;;  %v101_v47 = vld [vmem:[#allocation6 + $0xb8] sm:$0xff]  ;;  %v115_v48 = vld [vmem:[#allocation6 + $0x128] sm:$0xff]  ;;  %v118_v49 = vld [vmem:[#allocation6 + $0x140] sm:$0xff]  ;;  %v2775_v50 = vpack.c.bf16 %v111_v45, %v108_v42 }
  0x56   :  { %v114_v51 = vld [vmem:[#allocation6 + $0x120] sm:$0xff]  ;;  %v2778_v52 = vpack.c.bf16 %v101_v47, %v98_v46  ;;  %v2781_v53 = vpack.c.bf16 %v118_v49, %v115_v48  ;;  %v117_v54 = vld [vmem:[#allocation6 + $0x138] sm:$0xff]  ;;  %v104_v55 = vld [vmem:[#allocation6 + $0xd0] sm:$0xff] }
  0x57   :  { %1959 = vmatpush1.bf16.msra.mxu0 %v2747_v21  ;;  %v107_v56 = vld [vmem:[#allocation6 + $0xe8] sm:$0xff]  ;;  %v121_v57 = vld [vmem:[#allocation6 + $0x158] sm:$0xff]  ;;  %v124_v58 = vld [vmem:[#allocation6 + $0x170] sm:$0xff]  ;;  %v2785_v59 = vpack.c.bf16 %v117_v54, %v114_v51 }
  0x58   :  { %1961 = vmatprep.subr.bf16.mxu0 %v2750_v23  ;;  %1985 = vmatpush3.bf16.msra.mxu1 %v2758_v34  ;;  %v120_v60 = vld [vmem:[#allocation6 + $0x150] sm:$0xff]  ;;  %v2788_v61 = vpack.c.bf16 %v107_v56, %v104_v55  ;;  %v2791_v62 = vpack.c.bf16 %v124_v58, %v121_v57  ;;  %v123_v63 = vld [vmem:[#allocation6 + $0x168] sm:$0xff]  ;;  %v110_v2 = vld [vmem:[#allocation6 + $0x100] sm:$0xff] }
  0x59   :  { %1986 = vmatprep.subr.bf16.mxu1 %v2637_v0  ;;  %v113_v3 = vld [vmem:[#allocation6 + $0x118] sm:$0xff]  ;;  %v2795_v4 = vpack.c.bf16 %v123_v63, %v120_v60  ;;  %v116_v7 = vld [vmem:[#allocation6 + $0x130] sm:$0xff]  ;;  %v119_v8 = vld [vmem:[#allocation6 + $0x148] sm:$0xff] }
  0x5a   :  { %v2798_v6 = vpack.c.bf16 %v113_v3, %v110_v2  ;;  %v2803_v11 = vld [vmem:[#allocation9] sm:$0xff]  ;;  %v2806_v12 = vpack.c.bf16 %v119_v8, %v116_v7  ;;  %v122_v13 = vld [vmem:[#allocation6 + $0x160] sm:$0xff]  ;;  %v125_v14 = vld [vmem:[#allocation6 + $0x178] sm:$0xff] }
  0x5b   :  { %1963 = vmatpush1.bf16.msra.mxu0 %v2755_v32  ;;  %v2812_v17 = vpack.c.bf16 %v125_v14, %v122_v13  ;;  %v128_v18 = vld [vmem:[#allocation3] sm:$0xff]  ;;  %v129_v22 = vld [vmem:[#allocation3 + $0x8] sm:$0xff]  ;;  %v130_v42 = vld [vmem:[#allocation3 + $0x10] sm:$0xff] }
  0x5c   :  { %1965 = vmatprep.subr.bf16.mxu0 %v2761_v35  ;;  %1988 = vmatpush3.bf16.msra.mxu1 %v2768_v43  ;;  %v2853_v37 = vld [vmem:[#allocation8] sm:$0xff]  ;;  %v296_v56 = vld [vmem:[#allocation3 + $0x18] sm:$0xff] }
  0x5d   :  { %1989 = vmatprep.subr.bf16.mxu1 %v2637_v0  ;;  %v297_v63 = vld [vmem:[#allocation3 + $0x20] sm:$0xff] }
  0x5f   :  { %1967 = vmatpush1.bf16.msra.mxu0 %v2765_v41 }
  0x60   :  { %1969 = vmatprep.subr.bf16.mxu0 %v2771_v44  ;;  %1991 = vmatpush3.bf16.msra.mxu1 %v2778_v52 }
  0x61   :  { %1992 = vmatprep.subr.bf16.mxu1 %v2637_v0 }
  0x63   :  { %1971 = vmatpush1.bf16.msra.mxu0 %v2775_v50 }
  0x64   :  { %1973 = vmatprep.subr.bf16.mxu0 %v2781_v53  ;;  %1994 = vmatpush3.bf16.msra.mxu1 %v2788_v61 }
  0x65   :  { %1995 = vmatprep.subr.bf16.mxu1 %v2637_v0 }
  0x67   :  { %1975 = vmatpush1.bf16.msra.mxu0 %v2785_v59 }
  0x68   :  { %1977 = vmatprep.subr.bf16.mxu0 %v2791_v62  ;;  %1997 = vmatpush3.bf16.msra.mxu1 %v2798_v6 }
  0x69   :  { %1998 = vmatprep.subr.bf16.mxu1 %v2637_v0 }
  0x6b   :  { %1979 = vmatpush1.bf16.msra.mxu0 %v2795_v4 }
  0x6c   :  { %2005 = vmatprep.subr.bf16.mxu0 %v2733_v5  ;;  %2000 = vmatpush3.bf16.msra.mxu1 %v2806_v12 }
  0x6d   :  { %2001 = vmatprep.subr.bf16.mxu1 %v2637_v0 }
  0x6e   :  { %196 = vmatmul.mubr.f32.vlgmr.msra.gmra.mrb[0].mxu0 %v2803_v11 }
  0x6f   :  { %2007 = vmatpush1.bf16.msra.mxu0 %v2735_v9  ;;  %363 = vmatprep.mubr.f32.mxu0 %v2638_v1 }
  0x70   :  { %2009 = vmatprep.subr.bf16.mxu0 %v2737_v10  ;;  %2003 = vmatpush3.bf16.msra.mxu1 %v2812_v17 }
  0x71   :  { %2036 = vmatprep.subr.bf16.mxu1 %v2637_v0 }
  0x73   :  { %2011 = vmatpush1.bf16.msra.mxu0 %v2741_v15  ;;  %1701 = vmatmul.mubr.f32.vlgmr.msra.gmra.mrb[0].mxu1 %v2803_v11 }
  0x74   :  { %2013 = vmatprep.subr.bf16.mxu0 %v2744_v16  ;;  %2038 = vmatpush3.bf16.msra.mxu1 %v2752_v29 }
  0x75   :  { %2039 = vmatprep.subr.bf16.mxu1 %v2637_v0  ;;  %1735 = vmatprep.mubr.msk.f32.mxu1 %vm2639_vm0, %v2638_v1 }
  0x77   :  { %2015 = vmatpush1.bf16.msra.mxu0 %v2747_v21 }
  0x78   :  { %2017 = vmatprep.subr.bf16.mxu0 %v2750_v23  ;;  %2041 = vmatpush3.bf16.msra.mxu1 %v2758_v34 }
  0x79   :  { %2042 = vmatprep.subr.bf16.mxu1 %v2637_v0 }
  0x7b   :  { %2019 = vmatpush1.bf16.msra.mxu0 %v2755_v32 }
  0x7c   :  { %2021 = vmatprep.subr.bf16.mxu0 %v2761_v35  ;;  %2044 = vmatpush3.bf16.msra.mxu1 %v2768_v43 }
  0x7d   :  { %2045 = vmatprep.subr.bf16.mxu1 %v2637_v0 }
  0x7f   :  { %2023 = vmatpush1.bf16.msra.mxu0 %v2765_v41 }
  0x80   :  { %2025 = vmatprep.subr.bf16.mxu0 %v2771_v44  ;;  %2047 = vmatpush3.bf16.msra.mxu1 %v2778_v52 }
  0x81   :  { %2048 = vmatprep.subr.bf16.mxu1 %v2637_v0 }
  0x83   :  { %2027 = vmatpush1.bf16.msra.mxu0 %v2775_v50 }
  0x84   :  { %2029 = vmatprep.subr.bf16.mxu0 %v2781_v53  ;;  %2050 = vmatpush3.bf16.msra.mxu1 %v2788_v61 }
  0x85   :  { %2051 = vmatprep.subr.bf16.mxu1 %v2637_v0 }
  0x87   :  { %2031 = vmatpush1.bf16.msra.mxu0 %v2785_v59 }
  0x88   :  { %2033 = vmatprep.subr.bf16.mxu0 %v2791_v62  ;;  %2053 = vmatpush3.bf16.msra.mxu1 %v2798_v6 }
  0x89   :  { %2054 = vmatprep.subr.bf16.mxu1 %v2637_v0 }
  0x8b   :  { %2035 = vmatpush1.bf16.msra.mxu0 %v2795_v4 }
  0x8c   :  { %2061 = vmatprep.subr.bf16.mxu0 %v2733_v5  ;;  %2056 = vmatpush3.bf16.msra.mxu1 %v2806_v12 }
  0x8d   :  { %2057 = vmatprep.subr.bf16.mxu1 %v2637_v0 }
  0x90   :  { %2059 = vmatpush3.bf16.msra.mxu1 %v2812_v17 }
  0x91   :  { %2092 = vmatprep.subr.bf16.mxu1 %v2637_v0 }
 0x141   :  { %v197_v19 = vpop.f32.mrb[0].mxu0 }
 0x142   :  { %v272_v20 = vadd.f32 %v197_v19, %v128_v18  ;;  %v199_v24 = vpop.f32.mrb[1].mxu0 }
 0x143   :  { %v279_v26 = vadd.f32 %v199_v24, %v129_v22  ;;  %v298_v24 = vld [vmem:[#allocation3 + $0x28] sm:$0xff] }
 0x144   :  { %v1516_v25 = vmul.f32 -1.442695, %v272_v20 }
 0x145   :  { %v1517_v27 = vmul.f32 -1.442695, %v279_v26 }
 0x146   :  { %2409 = vpow2.f32 %v1516_v25  ;;  %v268_v28 = vpop.f32.mrb[0].mxu1 }
 0x147   :  { %v1702_v30 = vpop.f32.mrb[1].mxu1  ;;  %2411 = vpow2.f32 %v1517_v27  ;;  %v286_v39 = vadd.f32 %v268_v28, %v2853_v37 }
 0x150   :  { %v2410_v31 = vpop.eup %2409 }
 0x151   :  { %v276_v33 = vadd.f32 1.0, %v2410_v31  ;;  %v2412_v36 = vpop.eup %2411 }
 0x152   :  { %v283_v38 = vadd.f32 1.0, %v2412_v36 }
 0x153   :  { %2413 = vrcp.f32 %v276_v33 }
 0x154   :  { %2415 = vrcp.f32 %v283_v38  ;;  %v465_v38 = vld [vmem:[#allocation3 + $0x30] sm:$0xff] }
 0x15d   :  { %v2414_v40 = vpop.eup %2413 }
 0x15e   :  { %v287_v45 = vmul.f32 %v2414_v40, %v286_v39  ;;  %v2416_v47 = vpop.eup %2415 }
 0x15f   :  { %v290_v48 = vsub.f32 1.0, %v2416_v47  ;;  %v292_v54 = vmul.f32 %v2416_v47, %v2803_v11 }
 0x160   :  { %v288_v46 = vadd.f32 %v287_v45, %v130_v42  ;;  %v466_v45 = vld [vmem:[#allocation3 + $0x38] sm:$0xff] }
 0x162   :  { %2417 = vtanh.f32 %v288_v46 }
 0x16c   :  { %v2418_v49 = vpop.eup %2417 }
 0x16d   :  { %v291_v51 = vmul.f32 %v2418_v49, %v290_v48 }
 0x16f   :  { %v2857_v55 = vadd.f32 %v292_v54, %v291_v51 }
 0x171   :  { %294 = vst [vmem:[#allocation11] sm:$0xff] %v2857_v55  ;;  %364 = vmatmul.mubr.f32.vlgmr.msra.gmra.mrb[2].mxu0 %v2857_v55  ;;  %1736 = vmatmul.mubr.f32.vlgmr.msra.gmra.mrb[2].mxu1 %v2857_v55 }
 0x172   :  { %2063 = vmatpush1.bf16.msra.mxu0 %v2735_v9  ;;  %2094 = vmatpush3.bf16.msra.mxu1 %v2752_v29 }
 0x173   :  { %2065 = vmatprep.subr.bf16.mxu0 %v2737_v10  ;;  %2095 = vmatprep.subr.bf16.mxu1 %v2637_v0 }
 0x174   :  { %532 = vmatprep.mubr.f32.mxu0 %v2638_v1  ;;  %1770 = vmatprep.mubr.msk.f32.mxu1 %vm2639_vm0, %v2638_v1 }
 0x176   :  { %2067 = vmatpush1.bf16.msra.mxu0 %v2741_v15  ;;  %2097 = vmatpush3.bf16.msra.mxu1 %v2758_v34 }
 0x177   :  { %2069 = vmatprep.subr.bf16.mxu0 %v2744_v16  ;;  %2098 = vmatprep.subr.bf16.mxu1 %v2637_v0 }
 0x17a   :  { %2071 = vmatpush1.bf16.msra.mxu0 %v2747_v21  ;;  %2100 = vmatpush3.bf16.msra.mxu1 %v2768_v43 }
 0x17b   :  { %2073 = vmatprep.subr.bf16.mxu0 %v2750_v23  ;;  %2101 = vmatprep.subr.bf16.mxu1 %v2637_v0 }
 0x17e   :  { %2075 = vmatpush1.bf16.msra.mxu0 %v2755_v32  ;;  %2103 = vmatpush3.bf16.msra.mxu1 %v2778_v52 }
 0x17f   :  { %2077 = vmatprep.subr.bf16.mxu0 %v2761_v35  ;;  %2104 = vmatprep.subr.bf16.mxu1 %v2637_v0 }
 0x182   :  { %2079 = vmatpush1.bf16.msra.mxu0 %v2765_v41  ;;  %2106 = vmatpush3.bf16.msra.mxu1 %v2788_v61 }
 0x183   :  { %2081 = vmatprep.subr.bf16.mxu0 %v2771_v44  ;;  %2107 = vmatprep.subr.bf16.mxu1 %v2637_v0 }
 0x186   :  { %2083 = vmatpush1.bf16.msra.mxu0 %v2775_v50  ;;  %2109 = vmatpush3.bf16.msra.mxu1 %v2798_v6 }
 0x187   :  { %2085 = vmatprep.subr.bf16.mxu0 %v2781_v53  ;;  %2110 = vmatprep.subr.bf16.mxu1 %v2637_v0 }
 0x18a   :  { %2087 = vmatpush1.bf16.msra.mxu0 %v2785_v59  ;;  %2112 = vmatpush3.bf16.msra.mxu1 %v2806_v12 }
 0x18b   :  { %2089 = vmatprep.subr.bf16.mxu0 %v2791_v62  ;;  %2113 = vmatprep.subr.bf16.mxu1 %v2637_v0 }
 0x18e   :  { %2091 = vmatpush1.bf16.msra.mxu0 %v2795_v4  ;;  %2115 = vmatpush3.bf16.msra.mxu1 %v2812_v17 }
 0x18f   :  { %2117 = vmatprep.subr.bf16.mxu0 %v2733_v5  ;;  %2148 = vmatprep.subr.bf16.mxu1 %v2637_v0 }
 0x244   :  { %v365_v57 = vpop.f32.mrb[2].mxu0  ;;  %v436_v58 = vpop.f32.mrb[2].mxu1 }
 0x245   :  { %v440_v60 = vadd.f32 %v365_v57, %v296_v56  ;;  %v367_v2 = vpop.f32.mrb[3].mxu0  ;;  %v1737_v3 = vpop.f32.mrb[3].mxu1  ;;  %v454_v20 = vadd.f32 %v436_v58, %v2853_v37 }
 0x246   :  { %v447_v8 = vadd.f32 %v367_v2, %v297_v63  ;;  %v467_v63 = vld [vmem:[#allocation3 + $0x40] sm:$0xff] }
 0x247   :  { %v1518_v7 = vmul.f32 -1.442695, %v440_v60 }
 0x248   :  { %v1519_v11 = vmul.f32 -1.442695, %v447_v8 }
 0x249   :  { %2419 = vpow2.f32 %v1518_v7 }
 0x24a   :  { %2421 = vpow2.f32 %v1519_v11 }
 0x253   :  { %v2420_v13 = vpop.eup %2419 }
 0x254   :  { %v444_v14 = vadd.f32 1.0, %v2420_v13  ;;  %v2422_v18 = vpop.eup %2421 }
 0x255   :  { %v451_v19 = vadd.f32 1.0, %v2422_v18 }
 0x256   :  { %2423 = vrcp.f32 %v444_v14 }
 0x257   :  { %2425 = vrcp.f32 %v451_v19  ;;  %v634_v19 = vld [vmem:[#allocation3 + $0x48] sm:$0xff] }
 0x260   :  { %v2424_v22 = vpop.eup %2423 }
 0x261   :  { %v455_v25 = vmul.f32 %v2424_v22, %v454_v20  ;;  %v2426_v27 = vpop.eup %2425 }
 0x262   :  { %v458_v28 = vsub.f32 1.0, %v2426_v27  ;;  %v460_v33 = vmul.f32 %v2426_v27, %v2857_v55 }
 0x263   :  { %v456_v26 = vadd.f32 %v455_v25, %v298_v24  ;;  %v635_v25 = vld [vmem:[#allocation3 + $0x50] sm:$0xff] }
 0x265   :  { %2427 = vtanh.f32 %v456_v26 }
 0x26f   :  { %v2428_v30 = vpop.eup %2427 }
 0x270   :  { %v459_v31 = vmul.f32 %v2428_v30, %v458_v28 }
 0x272   :  { %v2899_v36 = vadd.f32 %v460_v33, %v459_v31 }
 0x274   :  { %463 = vst [vmem:[#allocation11 + $0x8] sm:$0xff] %v2899_v36  ;;  %533 = vmatmul.mubr.f32.vlgmr.msra.gmra.mrb[4].mxu0 %v2899_v36  ;;  %1771 = vmatmul.mubr.f32.vlgmr.msra.gmra.mrb[4].mxu1 %v2899_v36 }
 0x275   :  { %2119 = vmatpush1.bf16.msra.mxu0 %v2735_v9  ;;  %2150 = vmatpush3.bf16.msra.mxu1 %v2752_v29 }
 0x276   :  { %2121 = vmatprep.subr.bf16.mxu0 %v2737_v10  ;;  %2151 = vmatprep.subr.bf16.mxu1 %v2637_v0 }
 0x277   :  { %701 = vmatprep.mubr.f32.mxu0 %v2638_v1  ;;  %1805 = vmatprep.mubr.msk.f32.mxu1 %vm2639_vm0, %v2638_v1 }
 0x279   :  { %2123 = vmatpush1.bf16.msra.mxu0 %v2741_v15  ;;  %2153 = vmatpush3.bf16.msra.mxu1 %v2758_v34 }
 0x27a   :  { %2125 = vmatprep.subr.bf16.mxu0 %v2744_v16  ;;  %2154 = vmatprep.subr.bf16.mxu1 %v2637_v0 }
 0x27d   :  { %2127 = vmatpush1.bf16.msra.mxu0 %v2747_v21  ;;  %2156 = vmatpush3.bf16.msra.mxu1 %v2768_v43 }
 0x27e   :  { %2129 = vmatprep.subr.bf16.mxu0 %v2750_v23  ;;  %2157 = vmatprep.subr.bf16.mxu1 %v2637_v0 }
 0x281   :  { %2131 = vmatpush1.bf16.msra.mxu0 %v2755_v32  ;;  %2159 = vmatpush3.bf16.msra.mxu1 %v2778_v52 }
 0x282   :  { %2133 = vmatprep.subr.bf16.mxu0 %v2761_v35  ;;  %2160 = vmatprep.subr.bf16.mxu1 %v2637_v0 }
 0x285   :  { %2135 = vmatpush1.bf16.msra.mxu0 %v2765_v41  ;;  %2162 = vmatpush3.bf16.msra.mxu1 %v2788_v61 }
 0x286   :  { %2137 = vmatprep.subr.bf16.mxu0 %v2771_v44  ;;  %2163 = vmatprep.subr.bf16.mxu1 %v2637_v0 }
 0x289   :  { %2139 = vmatpush1.bf16.msra.mxu0 %v2775_v50  ;;  %2165 = vmatpush3.bf16.msra.mxu1 %v2798_v6 }
 0x28a   :  { %2141 = vmatprep.subr.bf16.mxu0 %v2781_v53  ;;  %2166 = vmatprep.subr.bf16.mxu1 %v2637_v0 }
 0x28d   :  { %2143 = vmatpush1.bf16.msra.mxu0 %v2785_v59  ;;  %2168 = vmatpush3.bf16.msra.mxu1 %v2806_v12 }
 0x28e   :  { %2145 = vmatprep.subr.bf16.mxu0 %v2791_v62  ;;  %2169 = vmatprep.subr.bf16.mxu1 %v2637_v0 }
 0x291   :  { %2147 = vmatpush1.bf16.msra.mxu0 %v2795_v4  ;;  %2171 = vmatpush3.bf16.msra.mxu1 %v2812_v17 }
 0x292   :  { %2173 = vmatprep.subr.bf16.mxu0 %v2733_v5  ;;  %2204 = vmatprep.subr.bf16.mxu1 %v2637_v0 }
 0x347   :  { %v534_v39 = vpop.f32.mrb[4].mxu0  ;;  %v605_v40 = vpop.f32.mrb[4].mxu1 }
 0x348   :  { %v609_v42 = vadd.f32 %v534_v39, %v465_v38  ;;  %v536_v46 = vpop.f32.mrb[5].mxu0  ;;  %v1772_v47 = vpop.f32.mrb[5].mxu1  ;;  %v623_v58 = vadd.f32 %v605_v40, %v2853_v37 }
 0x349   :  { %v616_v49 = vadd.f32 %v536_v46, %v466_v45  ;;  %v636_v45 = vld [vmem:[#allocation3 + $0x58] sm:$0xff] }
 0x34a   :  { %v1520_v48 = vmul.f32 -1.442695, %v609_v42 }
 0x34b   :  { %v1521_v51 = vmul.f32 -1.442695, %v616_v49 }
 0x34c   :  { %2429 = vpow2.f32 %v1520_v48 }
 0x34d   :  { %2431 = vpow2.f32 %v1521_v51 }
 0x356   :  { %v2430_v54 = vpop.eup %2429 }
 0x357   :  { %v613_v55 = vadd.f32 1.0, %v2430_v54  ;;  %v2432_v56 = vpop.eup %2431 }
 0x358   :  { %v620_v57 = vadd.f32 1.0, %v2432_v56 }
 0x359   :  { %2433 = vrcp.f32 %v613_v55 }
 0x35a   :  { %2435 = vrcp.f32 %v620_v57  ;;  %v803_v57 = vld [vmem:[#allocation3 + $0x60] sm:$0xff] }
 0x363   :  { %v2434_v60 = vpop.eup %2433 }
 0x364   :  { %v624_v2 = vmul.f32 %v2434_v60, %v623_v58  ;;  %v2436_v7 = vpop.eup %2435 }
 0x365   :  { %v627_v8 = vsub.f32 1.0, %v2436_v7  ;;  %v629_v14 = vmul.f32 %v2436_v7, %v2899_v36 }
 0x366   :  { %v625_v3 = vadd.f32 %v624_v2, %v467_v63  ;;  %v804_v2 = vld [vmem:[#allocation3 + $0x68] sm:$0xff] }
 0x368   :  { %2437 = vtanh.f32 %v625_v3 }
 0x372   :  { %v2438_v11 = vpop.eup %2437 }
 0x373   :  { %v628_v13 = vmul.f32 %v2438_v11, %v627_v8 }
 0x375   :  { %v2941_v18 = vadd.f32 %v629_v14, %v628_v13 }
 0x377   :  { %632 = vst [vmem:[#allocation11 + $0x10] sm:$0xff] %v2941_v18  ;;  %702 = vmatmul.mubr.f32.vlgmr.msra.gmra.mrb[6].mxu0 %v2941_v18  ;;  %1806 = vmatmul.mubr.f32.vlgmr.msra.gmra.mrb[6].mxu1 %v2941_v18 }
 0x378   :  { %2175 = vmatpush1.bf16.msra.mxu0 %v2735_v9  ;;  %2206 = vmatpush3.bf16.msra.mxu1 %v2752_v29 }
 0x379   :  { %2177 = vmatprep.subr.bf16.mxu0 %v2737_v10  ;;  %2207 = vmatprep.subr.bf16.mxu1 %v2637_v0 }
 0x37a   :  { %870 = vmatprep.mubr.f32.mxu0 %v2638_v1  ;;  %1840 = vmatprep.mubr.msk.f32.mxu1 %vm2639_vm0, %v2638_v1 }
 0x37c   :  { %2179 = vmatpush1.bf16.msra.mxu0 %v2741_v15  ;;  %2209 = vmatpush3.bf16.msra.mxu1 %v2758_v34 }
 0x37d   :  { %2181 = vmatprep.subr.bf16.mxu0 %v2744_v16  ;;  %2210 = vmatprep.subr.bf16.mxu1 %v2637_v0 }
 0x380   :  { %2183 = vmatpush1.bf16.msra.mxu0 %v2747_v21  ;;  %2212 = vmatpush3.bf16.msra.mxu1 %v2768_v43 }
 0x381   :  { %2185 = vmatprep.subr.bf16.mxu0 %v2750_v23  ;;  %2213 = vmatprep.subr.bf16.mxu1 %v2637_v0 }
 0x384   :  { %2187 = vmatpush1.bf16.msra.mxu0 %v2755_v32  ;;  %2215 = vmatpush3.bf16.msra.mxu1 %v2778_v52 }
 0x385   :  { %2189 = vmatprep.subr.bf16.mxu0 %v2761_v35  ;;  %2216 = vmatprep.subr.bf16.mxu1 %v2637_v0 }
 0x388   :  { %2191 = vmatpush1.bf16.msra.mxu0 %v2765_v41  ;;  %2218 = vmatpush3.bf16.msra.mxu1 %v2788_v61 }
 0x389   :  { %2193 = vmatprep.subr.bf16.mxu0 %v2771_v44  ;;  %2219 = vmatprep.subr.bf16.mxu1 %v2637_v0 }
 0x38c   :  { %2195 = vmatpush1.bf16.msra.mxu0 %v2775_v50  ;;  %2221 = vmatpush3.bf16.msra.mxu1 %v2798_v6 }
 0x38d   :  { %2197 = vmatprep.subr.bf16.mxu0 %v2781_v53  ;;  %2222 = vmatprep.subr.bf16.mxu1 %v2637_v0 }
 0x390   :  { %2199 = vmatpush1.bf16.msra.mxu0 %v2785_v59  ;;  %2224 = vmatpush3.bf16.msra.mxu1 %v2806_v12 }
 0x391   :  { %2201 = vmatprep.subr.bf16.mxu0 %v2791_v62  ;;  %2225 = vmatprep.subr.bf16.mxu1 %v2637_v0 }
 0x394   :  { %2203 = vmatpush1.bf16.msra.mxu0 %v2795_v4  ;;  %2227 = vmatpush3.bf16.msra.mxu1 %v2812_v17 }
 0x395   :  { %2229 = vmatprep.subr.bf16.mxu0 %v2733_v5  ;;  %2260 = vmatprep.subr.bf16.mxu1 %v2637_v0 }
 0x44a   :  { %v703_v20 = vpop.f32.mrb[6].mxu0  ;;  %v774_v22 = vpop.f32.mrb[6].mxu1 }
 0x44b   :  { %v778_v24 = vadd.f32 %v703_v20, %v634_v19  ;;  %v705_v26 = vpop.f32.mrb[7].mxu0  ;;  %v1807_v27 = vpop.f32.mrb[7].mxu1  ;;  %v792_v40 = vadd.f32 %v774_v22, %v2853_v37 }
 0x44c   :  { %v785_v30 = vadd.f32 %v705_v26, %v635_v25  ;;  %v805_v25 = vld [vmem:[#allocation3 + $0x70] sm:$0xff] }
 0x44d   :  { %v1522_v28 = vmul.f32 -1.442695, %v778_v24 }
 0x44e   :  { %v1523_v31 = vmul.f32 -1.442695, %v785_v30 }
 0x44f   :  { %2439 = vpow2.f32 %v1522_v28 }
 0x450   :  { %2441 = vpow2.f32 %v1523_v31 }
 0x459   :  { %v2440_v33 = vpop.eup %2439 }
 0x45a   :  { %v782_v36 = vadd.f32 1.0, %v2440_v33  ;;  %v2442_v38 = vpop.eup %2441 }
 0x45b   :  { %v789_v39 = vadd.f32 1.0, %v2442_v38 }
 0x45c   :  { %2443 = vrcp.f32 %v782_v36 }
 0x45d   :  { %2445 = vrcp.f32 %v789_v39  ;;  %v972_v39 = vld [vmem:[#allocation3 + $0x78] sm:$0xff] }
 0x466   :  { %v2444_v42 = vpop.eup %2443 }
 0x467   :  { %v793_v46 = vmul.f32 %v2444_v42, %v792_v40  ;;  %v2446_v48 = vpop.eup %2445 }
 0x468   :  { %v796_v49 = vsub.f32 1.0, %v2446_v48  ;;  %v798_v55 = vmul.f32 %v2446_v48, %v2941_v18 }
 0x469   :  { %v794_v47 = vadd.f32 %v793_v46, %v636_v45  ;;  %v973_v46 = vld [vmem:[#allocation3 + $0x80] sm:$0xff] }
 0x46b   :  { %2447 = vtanh.f32 %v794_v47 }
 0x475   :  { %v2448_v51 = vpop.eup %2447 }
 0x476   :  { %v797_v54 = vmul.f32 %v2448_v51, %v796_v49 }
 0x478   :  { %v2983_v56 = vadd.f32 %v798_v55, %v797_v54 }
 0x47a   :  { %801 = vst [vmem:[#allocation11 + $0x18] sm:$0xff] %v2983_v56  ;;  %871 = vmatmul.mubr.f32.vlgmr.msra.gmra.mrb[8].mxu0 %v2983_v56  ;;  %1841 = vmatmul.mubr.f32.vlgmr.msra.gmra.mrb[8].mxu1 %v2983_v56 }
 0x47b   :  { %2231 = vmatpush1.bf16.msra.mxu0 %v2735_v9  ;;  %2262 = vmatpush3.bf16.msra.mxu1 %v2752_v29 }
 0x47c   :  { %2233 = vmatprep.subr.bf16.mxu0 %v2737_v10  ;;  %2263 = vmatprep.subr.bf16.mxu1 %v2637_v0 }
 0x47d   :  { %1039 = vmatprep.mubr.f32.mxu0 %v2638_v1  ;;  %1875 = vmatprep.mubr.msk.f32.mxu1 %vm2639_vm0, %v2638_v1 }
 0x47f   :  { %2235 = vmatpush1.bf16.msra.mxu0 %v2741_v15  ;;  %2265 = vmatpush3.bf16.msra.mxu1 %v2758_v34 }
 0x480   :  { %2237 = vmatprep.subr.bf16.mxu0 %v2744_v16  ;;  %2266 = vmatprep.subr.bf16.mxu1 %v2637_v0 }
 0x483   :  { %2239 = vmatpush1.bf16.msra.mxu0 %v2747_v21  ;;  %2268 = vmatpush3.bf16.msra.mxu1 %v2768_v43 }
 0x484   :  { %2241 = vmatprep.subr.bf16.mxu0 %v2750_v23  ;;  %2269 = vmatprep.subr.bf16.mxu1 %v2637_v0 }
 0x487   :  { %2243 = vmatpush1.bf16.msra.mxu0 %v2755_v32  ;;  %2271 = vmatpush3.bf16.msra.mxu1 %v2778_v52 }
 0x488   :  { %2245 = vmatprep.subr.bf16.mxu0 %v2761_v35  ;;  %2272 = vmatprep.subr.bf16.mxu1 %v2637_v0 }
 0x48b   :  { %2247 = vmatpush1.bf16.msra.mxu0 %v2765_v41  ;;  %2274 = vmatpush3.bf16.msra.mxu1 %v2788_v61 }
 0x48c   :  { %2249 = vmatprep.subr.bf16.mxu0 %v2771_v44  ;;  %2275 = vmatprep.subr.bf16.mxu1 %v2637_v0 }
 0x48f   :  { %2251 = vmatpush1.bf16.msra.mxu0 %v2775_v50  ;;  %2277 = vmatpush3.bf16.msra.mxu1 %v2798_v6 }
 0x490   :  { %2253 = vmatprep.subr.bf16.mxu0 %v2781_v53  ;;  %2278 = vmatprep.subr.bf16.mxu1 %v2637_v0 }
 0x493   :  { %2255 = vmatpush1.bf16.msra.mxu0 %v2785_v59  ;;  %2280 = vmatpush3.bf16.msra.mxu1 %v2806_v12 }
 0x494   :  { %2257 = vmatprep.subr.bf16.mxu0 %v2791_v62  ;;  %2281 = vmatprep.subr.bf16.mxu1 %v2637_v0 }
 0x497   :  { %2259 = vmatpush1.bf16.msra.mxu0 %v2795_v4  ;;  %2283 = vmatpush3.bf16.msra.mxu1 %v2812_v17 }
 0x498   :  { %2285 = vmatprep.subr.bf16.mxu0 %v2733_v5  ;;  %2316 = vmatprep.subr.bf16.mxu1 %v2637_v0 }
 0x54d   :  { %v872_v58 = vpop.f32.mrb[8].mxu0  ;;  %v943_v60 = vpop.f32.mrb[8].mxu1 }
 0x54e   :  { %v947_v63 = vadd.f32 %v872_v58, %v803_v57  ;;  %v874_v3 = vpop.f32.mrb[9].mxu0  ;;  %v1842_v7 = vpop.f32.mrb[9].mxu1  ;;  %v961_v22 = vadd.f32 %v943_v60, %v2853_v37 }
 0x54f   :  { %v954_v11 = vadd.f32 %v874_v3, %v804_v2 }
 0x550   :  { %v1524_v8 = vmul.f32 -1.442695, %v947_v63  ;;  %v974_v63 = vld [vmem:[#allocation3 + $0x88] sm:$0xff] }
 0x551   :  { %v1525_v13 = vmul.f32 -1.442695, %v954_v11 }
 0x552   :  { %2449 = vpow2.f32 %v1524_v8 }
 0x553   :  { %2451 = vpow2.f32 %v1525_v13 }
 0x55c   :  { %v2450_v14 = vpop.eup %2449 }
 0x55d   :  { %v951_v18 = vadd.f32 1.0, %v2450_v14  ;;  %v2452_v19 = vpop.eup %2451 }
 0x55e   :  { %v958_v20 = vadd.f32 1.0, %v2452_v19  ;;  %v1310_v19 = vld [vmem:[#allocation3 + $0xa8] sm:$0xff] }
 0x55f   :  { %2453 = vrcp.f32 %v951_v18 }
 0x560   :  { %2455 = vrcp.f32 %v958_v20 }
 0x569   :  { %v2454_v24 = vpop.eup %2453 }
 0x56a   :  { %v962_v26 = vmul.f32 %v2454_v24, %v961_v22  ;;  %v2456_v28 = vpop.eup %2455 }
 0x56b   :  { %v965_v30 = vsub.f32 1.0, %v2456_v28  ;;  %v967_v36 = vmul.f32 %v2456_v28, %v2983_v56 }
 0x56c   :  { %v963_v27 = vadd.f32 %v962_v26, %v805_v25  ;;  %v1311_v25 = vld [vmem:[#allocation3 + $0xb0] sm:$0xff] }
 0x56e   :  { %2457 = vtanh.f32 %v963_v27 }
 0x578   :  { %v2458_v31 = vpop.eup %2457 }
 0x579   :  { %v966_v33 = vmul.f32 %v2458_v31, %v965_v30 }
 0x57b   :  { %v3025_v38 = vadd.f32 %v967_v36, %v966_v33 }
 0x57d   :  { %970 = vst [vmem:[#allocation11 + $0x20] sm:$0xff] %v3025_v38  ;;  %1040 = vmatmul.mubr.f32.vlgmr.msra.gmra.mrb[10].mxu0 %v3025_v38  ;;  %1876 = vmatmul.mubr.f32.vlgmr.msra.gmra.mrb[10].mxu1 %v3025_v38 }
 0x57e   :  { %2287 = vmatpush1.bf16.msra.mxu0 %v2735_v9  ;;  %2318 = vmatpush3.bf16.msra.mxu1 %v2752_v29 }
 0x57f   :  { %2289 = vmatprep.subr.bf16.mxu0 %v2737_v10  ;;  %2319 = vmatprep.subr.bf16.mxu1 %v2637_v0 }
 0x580   :  { %1208 = vmatprep.mubr.f32.mxu0 %v2638_v1  ;;  %1910 = vmatprep.mubr.msk.f32.mxu1 %vm2639_vm0, %v2638_v1 }
 0x582   :  { %2291 = vmatpush1.bf16.msra.mxu0 %v2741_v15  ;;  %2321 = vmatpush3.bf16.msra.mxu1 %v2758_v34 }
 0x583   :  { %2293 = vmatprep.subr.bf16.mxu0 %v2744_v16  ;;  %2322 = vmatprep.subr.bf16.mxu1 %v2637_v0 }
 0x586   :  { %2295 = vmatpush1.bf16.msra.mxu0 %v2747_v21  ;;  %2324 = vmatpush3.bf16.msra.mxu1 %v2768_v43 }
 0x587   :  { %2297 = vmatprep.subr.bf16.mxu0 %v2750_v23  ;;  %2325 = vmatprep.subr.bf16.mxu1 %v2637_v0 }
 0x58a   :  { %2299 = vmatpush1.bf16.msra.mxu0 %v2755_v32  ;;  %2327 = vmatpush3.bf16.msra.mxu1 %v2778_v52 }
 0x58b   :  { %2301 = vmatprep.subr.bf16.mxu0 %v2761_v35  ;;  %2328 = vmatprep.subr.bf16.mxu1 %v2637_v0 }
 0x58e   :  { %2303 = vmatpush1.bf16.msra.mxu0 %v2765_v41  ;;  %2330 = vmatpush3.bf16.msra.mxu1 %v2788_v61 }
 0x58f   :  { %2305 = vmatprep.subr.bf16.mxu0 %v2771_v44  ;;  %2331 = vmatprep.subr.bf16.mxu1 %v2637_v0 }
 0x592   :  { %2307 = vmatpush1.bf16.msra.mxu0 %v2775_v50  ;;  %2333 = vmatpush3.bf16.msra.mxu1 %v2798_v6 }
 0x593   :  { %2309 = vmatprep.subr.bf16.mxu0 %v2781_v53  ;;  %2334 = vmatprep.subr.bf16.mxu1 %v2637_v0 }
 0x596   :  { %2311 = vmatpush1.bf16.msra.mxu0 %v2785_v59  ;;  %2336 = vmatpush3.bf16.msra.mxu1 %v2806_v12 }
 0x597   :  { %2313 = vmatprep.subr.bf16.mxu0 %v2791_v62  ;;  %2337 = vmatprep.subr.bf16.mxu1 %v2637_v0 }
 0x59a   :  { %2315 = vmatpush1.bf16.msra.mxu0 %v2795_v4  ;;  %2339 = vmatpush3.bf16.msra.mxu1 %v2812_v17 }
 0x59b   :  { %2341 = vmatprep.subr.bf16.mxu0 %v2733_v5  ;;  %2372 = vmatprep.subr.bf16.mxu1 %v2637_v0 }
 0x650   :  { %v1041_v40 = vpop.f32.mrb[10].mxu0  ;;  %v1112_v42 = vpop.f32.mrb[10].mxu1 }
 0x651   :  { %v1116_v45 = vadd.f32 %v1041_v40, %v972_v39  ;;  %v1043_v47 = vpop.f32.mrb[11].mxu0  ;;  %v1877_v48 = vpop.f32.mrb[11].mxu1  ;;  %v1130_v5 = vadd.f32 %v1112_v42, %v2853_v37 }
 0x652   :  { %v1123_v51 = vadd.f32 %v1043_v47, %v973_v46 }
 0x653   :  { %v1526_v49 = vmul.f32 -1.442695, %v1116_v45  ;;  %v1312_v45 = vld [vmem:[#allocation3 + $0xb8] sm:$0xff] }
 0x654   :  { %v1527_v54 = vmul.f32 -1.442695, %v1123_v51 }
 0x655   :  { %2459 = vpow2.f32 %v1526_v49 }
 0x656   :  { %2461 = vpow2.f32 %v1527_v54 }
 0x65f   :  { %v2460_v55 = vpop.eup %2459 }
 0x660   :  { %v1120_v56 = vadd.f32 1.0, %v2460_v55  ;;  %v2462_v57 = vpop.eup %2461 }
 0x661   :  { %v1127_v58 = vadd.f32 1.0, %v2462_v57 }
 0x662   :  { %2463 = vrcp.f32 %v1120_v56 }
 0x663   :  { %2465 = vrcp.f32 %v1127_v58 }
 0x66c   :  { %v2464_v60 = vpop.eup %2463 }
 0x66d   :  { %v1131_v2 = vmul.f32 %v2464_v60, %v1130_v5  ;;  %v2466_v7 = vpop.eup %2465 }
 0x66e   :  { %v1134_v8 = vsub.f32 1.0, %v2466_v7  ;;  %v1136_v14 = vmul.f32 %v2466_v7, %v3025_v38 }
 0x66f   :  { %v1132_v3 = vadd.f32 %v1131_v2, %v974_v63 }
 0x671   :  { %2467 = vtanh.f32 %v1132_v3 }
 0x67b   :  { %v2468_v11 = vpop.eup %2467 }
 0x67c   :  { %v1135_v13 = vmul.f32 %v2468_v11, %v1134_v8 }
 0x67e   :  { %v3067_v18 = vadd.f32 %v1136_v14, %v1135_v13 }
 0x680   :  { %1139 = vst [vmem:[#allocation11 + $0x28] sm:$0xff] %v3067_v18  ;;  %1209 = vmatmul.mubr.f32.vlgmr.msra.gmra.mrb[12].mxu0 %v3067_v18  ;;  %1911 = vmatmul.mubr.f32.vlgmr.msra.gmra.mrb[12].mxu1 %v3067_v18 }
 0x681   :  { %2343 = vmatpush1.bf16.msra.mxu0 %v2735_v9  ;;  %2374 = vmatpush3.bf16.msra.mxu1 %v2752_v29 }
 0x682   :  { %2345 = vmatprep.subr.bf16.mxu0 %v2737_v10  ;;  %2375 = vmatprep.subr.bf16.mxu1 %v2637_v0 }
 0x683   :  { %1377 = vmatprep.mubr.f32.mxu0 %v2638_v1  ;;  %1945 = vmatprep.mubr.msk.f32.mxu1 %vm2639_vm0, %v2638_v1  ;;  %v1141_v1 = vld [vmem:[#allocation3 + $0x90] sm:$0xff] }
 0x685   :  { %2347 = vmatpush1.bf16.msra.mxu0 %v2741_v15  ;;  %2377 = vmatpush3.bf16.msra.mxu1 %v2758_v34 }
 0x686   :  { %2349 = vmatprep.subr.bf16.mxu0 %v2744_v16  ;;  %2378 = vmatprep.subr.bf16.mxu1 %v2637_v0  ;;  %v1142_v16 = vld [vmem:[#allocation3 + $0x98] sm:$0xff] }
 0x689   :  { %2351 = vmatpush1.bf16.msra.mxu0 %v2747_v21  ;;  %2380 = vmatpush3.bf16.msra.mxu1 %v2768_v43 }
 0x68a   :  { %2353 = vmatprep.subr.bf16.mxu0 %v2750_v23  ;;  %2381 = vmatprep.subr.bf16.mxu1 %v2637_v0 }
 0x68d   :  { %2355 = vmatpush1.bf16.msra.mxu0 %v2755_v32  ;;  %2383 = vmatpush3.bf16.msra.mxu1 %v2778_v52  ;;  %v1143_v52 = vld [vmem:[#allocation3 + $0xa0] sm:$0xff] }
 0x68e   :  { %2357 = vmatprep.subr.bf16.mxu0 %v2761_v35  ;;  %2384 = vmatprep.subr.bf16.mxu1 %v2637_v0 }
 0x691   :  { %2359 = vmatpush1.bf16.msra.mxu0 %v2765_v41  ;;  %2386 = vmatpush3.bf16.msra.mxu1 %v2788_v61 }
 0x692   :  { %2361 = vmatprep.subr.bf16.mxu0 %v2771_v44  ;;  %2387 = vmatprep.subr.bf16.mxu1 %v2637_v0 }
 0x695   :  { %2363 = vmatpush1.bf16.msra.mxu0 %v2775_v50  ;;  %2389 = vmatpush3.bf16.msra.mxu1 %v2798_v6 }
 0x696   :  { %2365 = vmatprep.subr.bf16.mxu0 %v2781_v53  ;;  %2390 = vmatprep.subr.bf16.mxu1 %v2637_v0 }
 0x699   :  { %2367 = vmatpush1.bf16.msra.mxu0 %v2785_v59  ;;  %2392 = vmatpush3.bf16.msra.mxu1 %v2806_v12 }
 0x69a   :  { %2369 = vmatprep.subr.bf16.mxu0 %v2791_v62  ;;  %2393 = vmatprep.subr.bf16.mxu1 %v2637_v0 }
 0x69d   :  { %2371 = vmatpush1.bf16.msra.mxu0 %v2795_v4  ;;  %2395 = vmatpush3.bf16.msra.mxu1 %v2812_v17 }
 0x753   :  { %v1210_v9 = vpop.f32.mrb[12].mxu0  ;;  %v1281_v10 = vpop.f32.mrb[12].mxu1 }
 0x754   :  { %v1285_v15 = vadd.f32 %v1210_v9, %v1141_v1  ;;  %v1212_v21 = vpop.f32.mrb[13].mxu0  ;;  %v1912_v23 = vpop.f32.mrb[13].mxu1  ;;  %v1299_v44 = vadd.f32 %v1281_v10, %v2853_v37 }
 0x755   :  { %v1292_v32 = vadd.f32 %v1212_v21, %v1142_v16 }
 0x756   :  { %v1528_v29 = vmul.f32 -1.442695, %v1285_v15 }
 0x757   :  { %v1529_v34 = vmul.f32 -1.442695, %v1292_v32 }
 0x758   :  { %2469 = vpow2.f32 %v1528_v29 }
 0x759   :  { %2471 = vpow2.f32 %v1529_v34 }
 0x762   :  { %v2470_v35 = vpop.eup %2469 }
 0x763   :  { %v1289_v41 = vadd.f32 1.0, %v2470_v35  ;;  %v2472_v0 = vpop.eup %2471 }
 0x764   :  { %v1296_v43 = vadd.f32 1.0, %v2472_v0 }
 0x765   :  { %2473 = vrcp.f32 %v1289_v41 }
 0x766   :  { %2475 = vrcp.f32 %v1296_v43 }
 0x76f   :  { %v2474_v50 = vpop.eup %2473 }
 0x770   :  { %v1300_v53 = vmul.f32 %v2474_v50, %v1299_v44  ;;  %v2476_v61 = vpop.eup %2475 }
 0x771   :  { %v1303_v62 = vsub.f32 1.0, %v2476_v61  ;;  %v1305_v12 = vmul.f32 %v2476_v61, %v3067_v18 }
 0x772   :  { %v1301_v59 = vadd.f32 %v1300_v53, %v1143_v52 }
 0x774   :  { %2477 = vtanh.f32 %v1301_v59 }
 0x77e   :  { %v2478_v4 = vpop.eup %2477 }
 0x77f   :  { %v1304_v6 = vmul.f32 %v2478_v4, %v1303_v62 }
 0x781   :  { %v1306_v17 = vadd.f32 %v1305_v12, %v1304_v6 }
 0x783   :  { %1308 = vst [vmem:[#allocation11 + $0x30] sm:$0xff] %v1306_v17  ;;  %1378 = vmatmul.mubr.f32.vlgmr.msra.gmra.mrb[14].mxu0 %v1306_v17  ;;  %1946 = vmatmul.mubr.f32.vlgmr.msra.gmra.mrb[14].mxu1 %v1306_v17 }
 0x856   :  { %v1379_v20 = vpop.f32.mrb[14].mxu0  ;;  %v1450_v22 = vpop.f32.mrb[14].mxu1 }
 0x857   :  { %v1454_v24 = vadd.f32 %v1379_v20, %v1310_v19  ;;  %v1381_v26 = vpop.f32.mrb[15].mxu0  ;;  %v1947_v27 = vpop.f32.mrb[15].mxu1  ;;  %v1468_v40 = vadd.f32 %v1450_v22, %v2853_v37 }
 0x858   :  { %v1461_v30 = vadd.f32 %v1381_v26, %v1311_v25 }
 0x859   :  { %v1530_v28 = vmul.f32 -1.442695, %v1454_v24 }
 0x85a   :  { %v1531_v31 = vmul.f32 -1.442695, %v1461_v30 }
 0x85b   :  { %2479 = vpow2.f32 %v1530_v28 }
 0x85c   :  { %2481 = vpow2.f32 %v1531_v31 }
 0x865   :  { %v2480_v33 = vpop.eup %2479 }
 0x866   :  { %v1458_v36 = vadd.f32 1.0, %v2480_v33  ;;  %v2482_v38 = vpop.eup %2481 }
 0x867   :  { %v1465_v39 = vadd.f32 1.0, %v2482_v38 }
 0x868   :  { %2483 = vrcp.f32 %v1458_v36 }
 0x869   :  { %2485 = vrcp.f32 %v1465_v39 }
 0x872   :  { %v2484_v42 = vpop.eup %2483 }
 0x873   :  { %v1469_v46 = vmul.f32 %v2484_v42, %v1468_v40  ;;  %v2486_v48 = vpop.eup %2485 }
 0x874   :  { %v1472_v49 = vsub.f32 1.0, %v2486_v48  ;;  %v1474_v55 = vmul.f32 %v2486_v48, %v1306_v17 }
 0x875   :  { %v1470_v47 = vadd.f32 %v1469_v46, %v1312_v45 }
 0x877   :  { %2487 = vtanh.f32 %v1470_v47 }
 0x881   :  { %v2488_v51 = vpop.eup %2487 }
 0x882   :  { %v1473_v54 = vmul.f32 %v2488_v51, %v1472_v49 }
 0x884   :  { %v1475_v56 = vadd.f32 %v1474_v55, %v1473_v54 }
 0x886   :  { %1477 = vst [vmem:[#allocation11 + $0x38] sm:$0xff] %v1475_v56  ;;  %1482 = vst [vmem:[#allocation12] sm:$0xff] %v1475_v56 }
 0x887   :  { %2588 = shalt.err (!%p2585_p8)
}
 0x888   :  { %s2589_s20 = scalar_lea.hbm %s3143_s4, 1024 }
 0x889   :  { %p2590_p9 = scmp.ne.s32.totalorder %s3143_s4, %s2589_s20  ;;  %p2593_p10 = scmp.lt.u32.totalorder %s2589_s20, %s3143_s4 }
 0x88b   :  { %p2595_p11 = pnand %p2593_p10, %p2590_p9 }
 0x88d   :  { %2598 = shalt.err (!%p2595_p11)
}
 0x88e   :  { %s2642_s26 = smov 128   ;;  %s2643_s27 = smov 8  }
 0x88f   :  { %1494 = dma.vmem_to_hbm [thread:$0]  %s1489_s15, 1024, %s3143_s4, [#allocation5], %s2642_s26, %s2642_s26, %s2643_s27  }
 0x890   :  { %s2599_s0 = scalar_lea.vmem %s3108_s1, 128  ;;  %p2604_p13 = scmp.lt.s32.totalorder %s3108_s1, %s3108_s1 }
 0x891   :  { %p2600_p12 = scmp.ne.s32.totalorder %s3108_s1, %s2599_s0  ;;  %p2605_p0 = scmp.lt.s32.totalorder %s2599_s0, %s2599_s0 }
 0x893   :  { %p2606_p1 = por %p2605_p0, %p2604_p13 }
 0x895   :  { %p2607_p2 = pnand %p2606_p1, %p2600_p12 }
 0x897   :  { %2610 = shalt.err (!%p2607_p2)
}
 0x898   :  { %s2611_s6 = scalar_lea.hbm %s3144_s5, 128 }
 0x899   :  { %p2612_p3 = scmp.ne.s32.totalorder %s3144_s5, %s2611_s6  ;;  %p2615_p4 = scmp.lt.u32.totalorder %s2611_s6, %s3144_s5 }
 0x89b   :  { %p2617_p5 = pnand %p2615_p4, %p2612_p3 }
 0x89d   :  { %2620 = shalt.err (!%p2617_p5)
}
 0x89e   :  { %1504 = dma.vmem_to_hbm [thread:$0]  %s3108_s1, 128, %s3144_s5, [#allocation13]  }
 0x89f   :  { %2627 = dma.done.wait [#allocation5], 1024  }
 0x8a0   :  { %2628 = vsyncadd [#allocation5], 4294966272 }
 0x8a1   :  { %2629 = dma.done.wait [#allocation13], 128  }
 0x8a2   :  { %2630 = vsyncadd [#allocation13], 4294967168 }
 0x8a3   :  { %1511 = vsyncpa [#allocation4], 1 }
 0x8a4   :  { %1512 = vsyncpa [#allocation7], 1 }
 0x8a5   :  { %1513 = vsyncpa [#allocation10], 1 }
 0x8a6   :  { %1514 = vsyncpa [#allocation5], 1 }
 0x8a7   :  { %1515 = vsyncpa [#allocation13], 1 }

// kernel: encoder_forward.5
= control target key start
LH: loop header
LB: loop body
LE: loop exit
PB: predicated region body
PF: predicated region fallthrough
CT: control target
= control target key end

     0   :  { %11 = vsyncpa [#allocation4], 0  ;;  %s3156_s0 = inlined_call_operand.hbm [shape: f32[8,8,384], index: 0, kind: input, shape index: {}]   ;;  %s3157_s1 = inlined_call_operand.hbm [shape: f32[128,384], index: 1, kind: input, shape index: {}]   ;;  %s3158_s2 = inlined_call_operand.hbm [shape: f32[8,128], index: 2, kind: input, shape index: {}]   ;;  %s3159_s3 = inlined_call_operand.hbm [shape: f32[8,128], index: 3, kind: input, shape index: {}]   ;;  %s3160_s4 = inlined_call_operand.hbm [shape: f32[8,8,128], index: 4, kind: output, shape index: {0}]   ;;  %s3161_s5 = inlined_call_operand.hbm [shape: f32[8,128], index: 5, kind: output, shape index: {1}]  }
   0x1   :  { %12 = vsyncpa [#allocation7], 0 }
   0x2   :  { %13 = vsyncpa [#allocation10], 0 }
   0x3   :  { %14 = vsyncpa [#allocation5], 0 }
   0x4   :  { %15 = vsyncpa [#allocation13], 0  ;;  %s2648_s18 = smov [#allocation6]   ;;  %s2649_s20 = smov [#allocation3]  }
   0x5   :  { %s38_s19 = sshll.u32 %s2648_s18, 4  ;;  %s26_s21 = sshll.u32 %s2649_s20, 4  ;;  %s39_s19 = int_to_ptr.vmem [resolvable:$true] %s38_s19  ;;  %s2691_s21 = int_to_ptr.vmem [resolvable:$true] %s26_s21 }
   0x6   :  { %s2506_s24 = scalar_lea.hbm %s3157_s1, 6144 }
   0x7   :  { %p2507_p0 = scmp.ne.s32.totalorder %s3157_s1, %s2506_s24  ;;  %p2510_p1 = scmp.lt.u32.totalorder %s2506_s24, %s3157_s1 }
   0x9   :  { %p2512_p2 = pnand %p2510_p1, %p2507_p0 }
   0xb   :  { %2515 = shalt.err (!%p2512_p2)
}
   0xc   :  { %s2516_s29 = scalar_lea.vmem %s39_s19, 6144  ;;  %p2521_p4 = scmp.lt.s32.totalorder %s39_s19, %s39_s19 }
   0xd   :  { %p2517_p3 = scmp.ne.s32.totalorder %s39_s19, %s2516_s29  ;;  %p2522_p5 = scmp.lt.s32.totalorder %s2516_s29, %s2516_s29 }
   0xf   :  { %p2523_p6 = por %p2522_p5, %p2521_p4 }
  0x11   :  { %p2524_p7 = pnand %p2523_p6, %p2517_p3 }
  0x13   :  { %2527 = shalt.err (!%p2524_p7)
}
  0x14   :  { %s2650_s30 = smov 384   ;;  %s2651_s6 = smov 24  }
  0x15   :  { %44 = dma.hbm_to_vmem [thread:$0]  %s3157_s1, 6144, %s39_s19, [#allocation7], %s2650_s30, %s2650_s30, %s2651_s6  }
  0x16   :  { %s2528_s11 = scalar_lea.hbm %s3156_s0, 3072 }
  0x17   :  { %p2529_p8 = scmp.ne.s32.totalorder %s3156_s0, %s2528_s11  ;;  %p2532_p9 = scmp.lt.u32.totalorder %s2528_s11, %s3156_s0 }
  0x19   :  { %p2534_p10 = pnand %p2532_p9, %p2529_p8 }
  0x1b   :  { %2537 = shalt.err (!%p2534_p10)
}
  0x1c   :  { %s2538_s16 = scalar_lea.vmem %s2691_s21, 3072  ;;  %p2543_p12 = scmp.lt.s32.totalorder %s2691_s21, %s2691_s21 }
  0x1d   :  { %p2539_p11 = scmp.ne.s32.totalorder %s2691_s21, %s2538_s16  ;;  %p2544_p13 = scmp.lt.s32.totalorder %s2538_s16, %s2538_s16 }
  0x1f   :  { %p2545_p0 = por %p2544_p13, %p2543_p12 }
  0x21   :  { %p2546_p1 = pnand %p2545_p0, %p2539_p11 }
  0x23   :  { %2549 = shalt.err (!%p2546_p1)
}
  0x24   :  { %32 = dma.hbm_to_vmem [thread:$0]  %s3156_s0, 3072, %s2691_s21, [#allocation4], %s2650_s30, %s2650_s30, %s2651_s6  }
  0x25   :  { %s2652_s18 = smov [#allocation8]   ;;  %s2653_s20 = smov [#allocation9]  }
  0x26   :  { %s51_s19 = sshll.u32 %s2652_s18, 4  ;;  %s61_s22 = sshll.u32 %s2653_s20, 4  ;;  %s52_s19 = int_to_ptr.vmem [resolvable:$true] %s51_s19  ;;  %s62_s22 = int_to_ptr.vmem [resolvable:$true] %s61_s22 }
  0x27   :  { %s2550_s25 = scalar_lea.hbm %s3158_s2, 128 }
  0x28   :  { %p2551_p2 = scmp.ne.s32.totalorder %s3158_s2, %s2550_s25  ;;  %p2554_p3 = scmp.lt.u32.totalorder %s2550_s25, %s3158_s2 }
  0x2a   :  { %p2556_p4 = pnand %p2554_p3, %p2551_p2 }
  0x2c   :  { %2559 = shalt.err (!%p2556_p4)
}
  0x2d   :  { %s2560_s0 = scalar_lea.vmem %s52_s19, 128  ;;  %p2565_p6 = scmp.lt.s32.totalorder %s52_s19, %s52_s19 }
  0x2e   :  { %p2561_p5 = scmp.ne.s32.totalorder %s52_s19, %s2560_s0  ;;  %p2566_p7 = scmp.lt.s32.totalorder %s2560_s0, %s2560_s0 }
  0x30   :  { %p2567_p8 = por %p2566_p7, %p2565_p6 }
  0x32   :  { %p2568_p9 = pnand %p2567_p8, %p2561_p5 }
  0x34   :  { %2571 = shalt.err (!%p2568_p9)
}
  0x35   :  { %54 = dma.hbm_to_vmem [thread:$0]  %s3158_s2, 128, %s52_s19, [#allocation7]  }
  0x36   :  { %s2572_s8 = scalar_lea.hbm %s3159_s3, 128 }
  0x37   :  { %p2573_p10 = scmp.ne.s32.totalorder %s3159_s3, %s2572_s8  ;;  %p2576_p11 = scmp.lt.u32.totalorder %s2572_s8, %s3159_s3 }
  0x39   :  { %p2578_p12 = pnand %p2576_p11, %p2573_p10 }
  0x3b   :  { %2581 = shalt.err (!%p2578_p12)
}
  0x3c   :  { %s2582_s13 = scalar_lea.vmem %s62_s22, 128  ;;  %p2587_p0 = scmp.lt.s32.totalorder %s62_s22, %s62_s22 }
  0x3d   :  { %p2583_p13 = scmp.ne.s32.totalorder %s62_s22, %s2582_s13  ;;  %p2588_p1 = scmp.lt.s32.totalorder %s2582_s13, %s2582_s13 }
  0x3f   :  { %p2589_p2 = por %p2588_p1, %p2587_p0 }
  0x41   :  { %p2590_p3 = pnand %p2589_p2, %p2583_p13 }
  0x43   :  { %2593 = shalt.err (!%p2590_p3)
}
  0x44   :  { %64 = dma.hbm_to_vmem [thread:$0]  %s3159_s3, 128, %s62_s22, [#allocation10]  }
  0x45   :  { %2638 = dma.done.wait [#allocation4], 3072  }
  0x46   :  { %2639 = vsyncadd [#allocation4], 4294964224 }
  0x47   :  { %2640 = dma.done.wait [#allocation7], 6272  }
  0x48   :  { %2641 = vsyncadd [#allocation7], 4294961024 }
  0x49   :  { %2642 = dma.done.wait [#allocation10], 128  }
  0x4a   :  { %2643 = vsyncadd [#allocation10], 4294967168  ;;  %v2654_v0 = vmov 0.0|0.0   ;;  %v2655_v1 = vmov 0.0   ;;  %vm2656_vm0 = vmmov 0   ;;  %v88_v2 = vld [vmem:[#allocation6 + $0x8] sm:$0xff] }
  0x4b   :  { %1997 = vmatprep.subr.bf16.mxu1 %v2654_v0  ;;  %205 = vmatprep.mubr.f32.mxu0 %v2655_v1  ;;  %v91_v3 = vld [vmem:[#allocation6 + $0x20] sm:$0xff]  ;;  %v90_v6 = vld [vmem:[#allocation6 + $0x18] sm:$0xff]  ;;  %v97_v8 = vld [vmem:[#allocation6 + $0x50] sm:$0xff]  ;;  %s2657_s3 = smov [#allocation11]   ;;  %s2658_s16 = smov [#allocation12]  }
  0x4c   :  { %1717 = vmatprep.mubr.msk.f32.mxu1 %vm2656_vm0, %v2655_v1  ;;  %v87_v4 = vld [vmem:[#allocation6] sm:$0xff]  ;;  %v2750_v5 = vpack.c.bf16 %v91_v3, %v88_v2  ;;  %v94_v7 = vld [vmem:[#allocation6 + $0x38] sm:$0xff]  ;;  %v93_v11 = vld [vmem:[#allocation6 + $0x30] sm:$0xff]  ;;  %s1501_s15 = sshll.u32 %s2657_s3, 4  ;;  %s1514_s1 = sshll.u32 %s2658_s16, 4  ;;  %s1502_s15 = int_to_ptr.vmem [resolvable:$true] %s1501_s15  ;;  %s3125_s1 = int_to_ptr.vmem [resolvable:$true] %s1514_s1 }
  0x4d   :  { %v2752_v9 = vpack.c.bf16 %v90_v6, %v87_v4  ;;  %v2754_v10 = vpack.c.bf16 %v97_v8, %v94_v7  ;;  %v96_v12 = vld [vmem:[#allocation6 + $0x48] sm:$0xff]  ;;  %v103_v14 = vld [vmem:[#allocation6 + $0x80] sm:$0xff]  ;;  %v102_v18 = vld [vmem:[#allocation6 + $0x78] sm:$0xff]  ;;  %s2594_s17 = scalar_lea.vmem %s1502_s15, 1024  ;;  %p2599_p5 = scmp.lt.s32.totalorder %s1502_s15, %s1502_s15 }
  0x4e   :  { %v100_v13 = vld [vmem:[#allocation6 + $0x68] sm:$0xff]  ;;  %1966 = vmatprep.subr.bf16.mxu0 %v2750_v5  ;;  %v2758_v15 = vpack.c.bf16 %v96_v12, %v93_v11  ;;  %v99_v17 = vld [vmem:[#allocation6 + $0x60] sm:$0xff]  ;;  %v106_v19 = vld [vmem:[#allocation6 + $0x98] sm:$0xff]  ;;  %p2595_p4 = scmp.ne.s32.totalorder %s1502_s15, %s2594_s17  ;;  %p2600_p6 = scmp.lt.s32.totalorder %s2594_s17, %s2594_s17 }
  0x4f   :  { %1968 = vmatpush1.bf16.msra.mxu0 %v2752_v9  ;;  %v2761_v16 = vpack.c.bf16 %v103_v14, %v100_v13  ;;  %v109_v20 = vld [vmem:[#allocation6 + $0xb0] sm:$0xff]  ;;  %v2764_v21 = vpack.c.bf16 %v102_v18, %v99_v17  ;;  %v108_v24 = vld [vmem:[#allocation6 + $0xa8] sm:$0xff]  ;;  %v115_v28 = vld [vmem:[#allocation6 + $0xe0] sm:$0xff] }
  0x50   :  { %1970 = vmatprep.subr.bf16.mxu0 %v2754_v10  ;;  %v105_v22 = vld [vmem:[#allocation6 + $0x90] sm:$0xff]  ;;  %v2767_v23 = vpack.c.bf16 %v109_v20, %v106_v19  ;;  %v92_v26 = vld [vmem:[#allocation6 + $0x28] sm:$0xff]  ;;  %v95_v30 = vld [vmem:[#allocation6 + $0x40] sm:$0xff]  ;;  %p2601_p7 = por %p2600_p6, %p2599_p5 }
  0x51   :  { %v89_v25 = vld [vmem:[#allocation6 + $0x10] sm:$0xff]  ;;  %v112_v27 = vld [vmem:[#allocation6 + $0xc8] sm:$0xff]  ;;  %v98_v31 = vld [vmem:[#allocation6 + $0x58] sm:$0xff]  ;;  %v2772_v32 = vpack.c.bf16 %v108_v24, %v105_v22 }
  0x52   :  { %v2769_v29 = vpack.c.bf16 %v92_v26, %v89_v25  ;;  %v111_v33 = vld [vmem:[#allocation6 + $0xc0] sm:$0xff]  ;;  %v2775_v34 = vpack.c.bf16 %v98_v31, %v95_v30  ;;  %v2778_v35 = vpack.c.bf16 %v115_v28, %v112_v27  ;;  %v114_v36 = vld [vmem:[#allocation6 + $0xd8] sm:$0xff]  ;;  %v101_v37 = vld [vmem:[#allocation6 + $0x70] sm:$0xff]  ;;  %p2602_p8 = pnand %p2601_p7, %p2595_p4 }
  0x53   :  { %1972 = vmatpush1.bf16.msra.mxu0 %v2758_v15  ;;  %v104_v38 = vld [vmem:[#allocation6 + $0x88] sm:$0xff]  ;;  %v118_v39 = vld [vmem:[#allocation6 + $0xf8] sm:$0xff]  ;;  %v121_v40 = vld [vmem:[#allocation6 + $0x110] sm:$0xff]  ;;  %v2782_v41 = vpack.c.bf16 %v114_v36, %v111_v33 }
  0x54   :  { %1974 = vmatprep.subr.bf16.mxu0 %v2761_v16  ;;  %1999 = vmatpush3.bf16.msra.mxu1 %v2769_v29  ;;  %v117_v42 = vld [vmem:[#allocation6 + $0xf0] sm:$0xff]  ;;  %v2785_v43 = vpack.c.bf16 %v104_v38, %v101_v37  ;;  %v2788_v44 = vpack.c.bf16 %v121_v40, %v118_v39  ;;  %v120_v45 = vld [vmem:[#allocation6 + $0x108] sm:$0xff]  ;;  %v107_v46 = vld [vmem:[#allocation6 + $0xa0] sm:$0xff] }
  0x55   :  { %2000 = vmatprep.subr.bf16.mxu1 %v2654_v0  ;;  %v110_v47 = vld [vmem:[#allocation6 + $0xb8] sm:$0xff]  ;;  %v124_v48 = vld [vmem:[#allocation6 + $0x128] sm:$0xff]  ;;  %v127_v49 = vld [vmem:[#allocation6 + $0x140] sm:$0xff]  ;;  %v2792_v50 = vpack.c.bf16 %v120_v45, %v117_v42 }
  0x56   :  { %v123_v51 = vld [vmem:[#allocation6 + $0x120] sm:$0xff]  ;;  %v2795_v52 = vpack.c.bf16 %v110_v47, %v107_v46  ;;  %v2798_v53 = vpack.c.bf16 %v127_v49, %v124_v48  ;;  %v126_v54 = vld [vmem:[#allocation6 + $0x138] sm:$0xff]  ;;  %v113_v55 = vld [vmem:[#allocation6 + $0xd0] sm:$0xff] }
  0x57   :  { %1976 = vmatpush1.bf16.msra.mxu0 %v2764_v21  ;;  %v116_v56 = vld [vmem:[#allocation6 + $0xe8] sm:$0xff]  ;;  %v130_v57 = vld [vmem:[#allocation6 + $0x158] sm:$0xff]  ;;  %v133_v58 = vld [vmem:[#allocation6 + $0x170] sm:$0xff]  ;;  %v2802_v59 = vpack.c.bf16 %v126_v54, %v123_v51 }
  0x58   :  { %1978 = vmatprep.subr.bf16.mxu0 %v2767_v23  ;;  %2002 = vmatpush3.bf16.msra.mxu1 %v2775_v34  ;;  %v129_v60 = vld [vmem:[#allocation6 + $0x150] sm:$0xff]  ;;  %v2805_v61 = vpack.c.bf16 %v116_v56, %v113_v55  ;;  %v2808_v62 = vpack.c.bf16 %v133_v58, %v130_v57  ;;  %v132_v63 = vld [vmem:[#allocation6 + $0x168] sm:$0xff]  ;;  %v119_v2 = vld [vmem:[#allocation6 + $0x100] sm:$0xff] }
  0x59   :  { %2003 = vmatprep.subr.bf16.mxu1 %v2654_v0  ;;  %v122_v3 = vld [vmem:[#allocation6 + $0x118] sm:$0xff]  ;;  %v2812_v4 = vpack.c.bf16 %v132_v63, %v129_v60  ;;  %v125_v7 = vld [vmem:[#allocation6 + $0x130] sm:$0xff]  ;;  %v128_v8 = vld [vmem:[#allocation6 + $0x148] sm:$0xff] }
  0x5a   :  { %v2815_v6 = vpack.c.bf16 %v122_v3, %v119_v2  ;;  %v2820_v11 = vld [vmem:[#allocation9] sm:$0xff]  ;;  %v2823_v12 = vpack.c.bf16 %v128_v8, %v125_v7  ;;  %v131_v13 = vld [vmem:[#allocation6 + $0x160] sm:$0xff]  ;;  %v134_v14 = vld [vmem:[#allocation6 + $0x178] sm:$0xff] }
  0x5b   :  { %1980 = vmatpush1.bf16.msra.mxu0 %v2772_v32  ;;  %v2829_v17 = vpack.c.bf16 %v134_v14, %v131_v13  ;;  %v138_v18 = vld [vmem:[#allocation3 + $0xa8] sm:$0xff]  ;;  %v139_v22 = vld [vmem:[#allocation3 + $0xb0] sm:$0xff]  ;;  %v2870_v37 = vld [vmem:[#allocation8] sm:$0xff] }
  0x5c   :  { %1982 = vmatprep.subr.bf16.mxu0 %v2778_v35  ;;  %2005 = vmatpush3.bf16.msra.mxu1 %v2785_v43  ;;  %v140_v42 = vld [vmem:[#allocation3 + $0xb8] sm:$0xff]  ;;  %v307_v56 = vld [vmem:[#allocation3 + $0x90] sm:$0xff] }
  0x5d   :  { %2006 = vmatprep.subr.bf16.mxu1 %v2654_v0  ;;  %v308_v63 = vld [vmem:[#allocation3 + $0x98] sm:$0xff] }
  0x5f   :  { %1984 = vmatpush1.bf16.msra.mxu0 %v2782_v41 }
  0x60   :  { %1986 = vmatprep.subr.bf16.mxu0 %v2788_v44  ;;  %2008 = vmatpush3.bf16.msra.mxu1 %v2795_v52 }
  0x61   :  { %2009 = vmatprep.subr.bf16.mxu1 %v2654_v0 }
  0x63   :  { %1988 = vmatpush1.bf16.msra.mxu0 %v2792_v50 }
  0x64   :  { %1990 = vmatprep.subr.bf16.mxu0 %v2798_v53  ;;  %2011 = vmatpush3.bf16.msra.mxu1 %v2805_v61 }
  0x65   :  { %2012 = vmatprep.subr.bf16.mxu1 %v2654_v0 }
  0x67   :  { %1992 = vmatpush1.bf16.msra.mxu0 %v2802_v59 }
  0x68   :  { %1994 = vmatprep.subr.bf16.mxu0 %v2808_v62  ;;  %2014 = vmatpush3.bf16.msra.mxu1 %v2815_v6 }
  0x69   :  { %2015 = vmatprep.subr.bf16.mxu1 %v2654_v0 }
  0x6b   :  { %1996 = vmatpush1.bf16.msra.mxu0 %v2812_v4 }
  0x6c   :  { %2022 = vmatprep.subr.bf16.mxu0 %v2750_v5  ;;  %2017 = vmatpush3.bf16.msra.mxu1 %v2823_v12 }
  0x6d   :  { %2018 = vmatprep.subr.bf16.mxu1 %v2654_v0 }
  0x6e   :  { %206 = vmatmul.mubr.f32.vlgmr.msra.gmra.mrb[0].mxu0 %v2820_v11 }
  0x6f   :  { %2024 = vmatpush1.bf16.msra.mxu0 %v2752_v9  ;;  %374 = vmatprep.mubr.f32.mxu0 %v2655_v1 }
  0x70   :  { %2026 = vmatprep.subr.bf16.mxu0 %v2754_v10  ;;  %2020 = vmatpush3.bf16.msra.mxu1 %v2829_v17 }
  0x71   :  { %2053 = vmatprep.subr.bf16.mxu1 %v2654_v0 }
  0x73   :  { %2028 = vmatpush1.bf16.msra.mxu0 %v2758_v15  ;;  %1718 = vmatmul.mubr.f32.vlgmr.msra.gmra.mrb[0].mxu1 %v2820_v11 }
  0x74   :  { %2030 = vmatprep.subr.bf16.mxu0 %v2761_v16  ;;  %2055 = vmatpush3.bf16.msra.mxu1 %v2769_v29 }
  0x75   :  { %2056 = vmatprep.subr.bf16.mxu1 %v2654_v0  ;;  %1752 = vmatprep.mubr.msk.f32.mxu1 %vm2656_vm0, %v2655_v1 }
  0x77   :  { %2032 = vmatpush1.bf16.msra.mxu0 %v2764_v21 }
  0x78   :  { %2034 = vmatprep.subr.bf16.mxu0 %v2767_v23  ;;  %2058 = vmatpush3.bf16.msra.mxu1 %v2775_v34 }
  0x79   :  { %2059 = vmatprep.subr.bf16.mxu1 %v2654_v0 }
  0x7b   :  { %2036 = vmatpush1.bf16.msra.mxu0 %v2772_v32 }
  0x7c   :  { %2038 = vmatprep.subr.bf16.mxu0 %v2778_v35  ;;  %2061 = vmatpush3.bf16.msra.mxu1 %v2785_v43 }
  0x7d   :  { %2062 = vmatprep.subr.bf16.mxu1 %v2654_v0 }
  0x7f   :  { %2040 = vmatpush1.bf16.msra.mxu0 %v2782_v41 }
  0x80   :  { %2042 = vmatprep.subr.bf16.mxu0 %v2788_v44  ;;  %2064 = vmatpush3.bf16.msra.mxu1 %v2795_v52 }
  0x81   :  { %2065 = vmatprep.subr.bf16.mxu1 %v2654_v0 }
  0x83   :  { %2044 = vmatpush1.bf16.msra.mxu0 %v2792_v50 }
  0x84   :  { %2046 = vmatprep.subr.bf16.mxu0 %v2798_v53  ;;  %2067 = vmatpush3.bf16.msra.mxu1 %v2805_v61 }
  0x85   :  { %2068 = vmatprep.subr.bf16.mxu1 %v2654_v0 }
  0x87   :  { %2048 = vmatpush1.bf16.msra.mxu0 %v2802_v59 }
  0x88   :  { %2050 = vmatprep.subr.bf16.mxu0 %v2808_v62  ;;  %2070 = vmatpush3.bf16.msra.mxu1 %v2815_v6 }
  0x89   :  { %2071 = vmatprep.subr.bf16.mxu1 %v2654_v0 }
  0x8b   :  { %2052 = vmatpush1.bf16.msra.mxu0 %v2812_v4 }
  0x8c   :  { %2078 = vmatprep.subr.bf16.mxu0 %v2750_v5  ;;  %2073 = vmatpush3.bf16.msra.mxu1 %v2823_v12 }
  0x8d   :  { %2074 = vmatprep.subr.bf16.mxu1 %v2654_v0 }
  0x90   :  { %2076 = vmatpush3.bf16.msra.mxu1 %v2829_v17 }
  0x91   :  { %2109 = vmatprep.subr.bf16.mxu1 %v2654_v0 }
 0x141   :  { %v207_v19 = vpop.f32.mrb[0].mxu0 }
 0x142   :  { %v282_v20 = vadd.f32 %v207_v19, %v138_v18  ;;  %v209_v24 = vpop.f32.mrb[1].mxu0 }
 0x143   :  { %v289_v26 = vadd.f32 %v209_v24, %v139_v22  ;;  %v309_v24 = vld [vmem:[#allocation3 + $0xa0] sm:$0xff] }
 0x144   :  { %v1533_v25 = vmul.f32 -1.442695, %v282_v20 }
 0x145   :  { %v1534_v27 = vmul.f32 -1.442695, %v289_v26 }
 0x146   :  { %2426 = vpow2.f32 %v1533_v25  ;;  %v278_v28 = vpop.f32.mrb[0].mxu1 }
 0x147   :  { %v1719_v30 = vpop.f32.mrb[1].mxu1  ;;  %2428 = vpow2.f32 %v1534_v27  ;;  %v296_v39 = vadd.f32 %v278_v28, %v2870_v37 }
 0x150   :  { %v2427_v31 = vpop.eup %2426 }
 0x151   :  { %v286_v33 = vadd.f32 1.0, %v2427_v31  ;;  %v2429_v36 = vpop.eup %2428 }
 0x152   :  { %v293_v38 = vadd.f32 1.0, %v2429_v36 }
 0x153   :  { %2430 = vrcp.f32 %v286_v33 }
 0x154   :  { %2432 = vrcp.f32 %v293_v38  ;;  %v476_v38 = vld [vmem:[#allocation3 + $0x78] sm:$0xff] }
 0x15d   :  { %v2431_v40 = vpop.eup %2430 }
 0x15e   :  { %v297_v45 = vmul.f32 %v2431_v40, %v296_v39  ;;  %v2433_v47 = vpop.eup %2432 }
 0x15f   :  { %v300_v48 = vsub.f32 1.0, %v2433_v47  ;;  %v302_v54 = vmul.f32 %v2433_v47, %v2820_v11 }
 0x160   :  { %v298_v46 = vadd.f32 %v297_v45, %v140_v42  ;;  %v477_v45 = vld [vmem:[#allocation3 + $0x80] sm:$0xff] }
 0x162   :  { %2434 = vtanh.f32 %v298_v46 }
 0x16c   :  { %v2435_v49 = vpop.eup %2434 }
 0x16d   :  { %v301_v51 = vmul.f32 %v2435_v49, %v300_v48 }
 0x16f   :  { %v2874_v55 = vadd.f32 %v302_v54, %v301_v51 }
 0x171   :  { %305 = vst [vmem:[#allocation11 + $0x38] sm:$0xff] %v2874_v55  ;;  %375 = vmatmul.mubr.f32.vlgmr.msra.gmra.mrb[2].mxu0 %v2874_v55  ;;  %1753 = vmatmul.mubr.f32.vlgmr.msra.gmra.mrb[2].mxu1 %v2874_v55 }
 0x172   :  { %2080 = vmatpush1.bf16.msra.mxu0 %v2752_v9  ;;  %2111 = vmatpush3.bf16.msra.mxu1 %v2769_v29 }
 0x173   :  { %2082 = vmatprep.subr.bf16.mxu0 %v2754_v10  ;;  %2112 = vmatprep.subr.bf16.mxu1 %v2654_v0 }
 0x174   :  { %543 = vmatprep.mubr.f32.mxu0 %v2655_v1  ;;  %1787 = vmatprep.mubr.msk.f32.mxu1 %vm2656_vm0, %v2655_v1 }
 0x176   :  { %2084 = vmatpush1.bf16.msra.mxu0 %v2758_v15  ;;  %2114 = vmatpush3.bf16.msra.mxu1 %v2775_v34 }
 0x177   :  { %2086 = vmatprep.subr.bf16.mxu0 %v2761_v16  ;;  %2115 = vmatprep.subr.bf16.mxu1 %v2654_v0 }
 0x17a   :  { %2088 = vmatpush1.bf16.msra.mxu0 %v2764_v21  ;;  %2117 = vmatpush3.bf16.msra.mxu1 %v2785_v43 }
 0x17b   :  { %2090 = vmatprep.subr.bf16.mxu0 %v2767_v23  ;;  %2118 = vmatprep.subr.bf16.mxu1 %v2654_v0 }
 0x17e   :  { %2092 = vmatpush1.bf16.msra.mxu0 %v2772_v32  ;;  %2120 = vmatpush3.bf16.msra.mxu1 %v2795_v52 }
 0x17f   :  { %2094 = vmatprep.subr.bf16.mxu0 %v2778_v35  ;;  %2121 = vmatprep.subr.bf16.mxu1 %v2654_v0 }
 0x182   :  { %2096 = vmatpush1.bf16.msra.mxu0 %v2782_v41  ;;  %2123 = vmatpush3.bf16.msra.mxu1 %v2805_v61 }
 0x183   :  { %2098 = vmatprep.subr.bf16.mxu0 %v2788_v44  ;;  %2124 = vmatprep.subr.bf16.mxu1 %v2654_v0 }
 0x186   :  { %2100 = vmatpush1.bf16.msra.mxu0 %v2792_v50  ;;  %2126 = vmatpush3.bf16.msra.mxu1 %v2815_v6 }
 0x187   :  { %2102 = vmatprep.subr.bf16.mxu0 %v2798_v53  ;;  %2127 = vmatprep.subr.bf16.mxu1 %v2654_v0 }
 0x18a   :  { %2104 = vmatpush1.bf16.msra.mxu0 %v2802_v59  ;;  %2129 = vmatpush3.bf16.msra.mxu1 %v2823_v12 }
 0x18b   :  { %2106 = vmatprep.subr.bf16.mxu0 %v2808_v62  ;;  %2130 = vmatprep.subr.bf16.mxu1 %v2654_v0 }
 0x18e   :  { %2108 = vmatpush1.bf16.msra.mxu0 %v2812_v4  ;;  %2132 = vmatpush3.bf16.msra.mxu1 %v2829_v17 }
 0x18f   :  { %2134 = vmatprep.subr.bf16.mxu0 %v2750_v5  ;;  %2165 = vmatprep.subr.bf16.mxu1 %v2654_v0 }
 0x244   :  { %v376_v57 = vpop.f32.mrb[2].mxu0  ;;  %v447_v58 = vpop.f32.mrb[2].mxu1 }
 0x245   :  { %v451_v60 = vadd.f32 %v376_v57, %v307_v56  ;;  %v378_v2 = vpop.f32.mrb[3].mxu0  ;;  %v1754_v3 = vpop.f32.mrb[3].mxu1  ;;  %v465_v20 = vadd.f32 %v447_v58, %v2870_v37 }
 0x246   :  { %v458_v8 = vadd.f32 %v378_v2, %v308_v63  ;;  %v478_v63 = vld [vmem:[#allocation3 + $0x88] sm:$0xff] }
 0x247   :  { %v1535_v7 = vmul.f32 -1.442695, %v451_v60 }
 0x248   :  { %v1536_v11 = vmul.f32 -1.442695, %v458_v8 }
 0x249   :  { %2436 = vpow2.f32 %v1535_v7 }
 0x24a   :  { %2438 = vpow2.f32 %v1536_v11 }
 0x253   :  { %v2437_v13 = vpop.eup %2436 }
 0x254   :  { %v455_v14 = vadd.f32 1.0, %v2437_v13  ;;  %v2439_v18 = vpop.eup %2438 }
 0x255   :  { %v462_v19 = vadd.f32 1.0, %v2439_v18 }
 0x256   :  { %2440 = vrcp.f32 %v455_v14 }
 0x257   :  { %2442 = vrcp.f32 %v462_v19  ;;  %v645_v19 = vld [vmem:[#allocation3 + $0x60] sm:$0xff] }
 0x260   :  { %v2441_v22 = vpop.eup %2440 }
 0x261   :  { %v466_v25 = vmul.f32 %v2441_v22, %v465_v20  ;;  %v2443_v27 = vpop.eup %2442 }
 0x262   :  { %v469_v28 = vsub.f32 1.0, %v2443_v27  ;;  %v471_v33 = vmul.f32 %v2443_v27, %v2874_v55 }
 0x263   :  { %v467_v26 = vadd.f32 %v466_v25, %v309_v24  ;;  %v646_v25 = vld [vmem:[#allocation3 + $0x68] sm:$0xff] }
 0x265   :  { %2444 = vtanh.f32 %v467_v26 }
 0x26f   :  { %v2445_v30 = vpop.eup %2444 }
 0x270   :  { %v470_v31 = vmul.f32 %v2445_v30, %v469_v28 }
 0x272   :  { %v2916_v36 = vadd.f32 %v471_v33, %v470_v31 }
 0x274   :  { %474 = vst [vmem:[#allocation11 + $0x30] sm:$0xff] %v2916_v36  ;;  %544 = vmatmul.mubr.f32.vlgmr.msra.gmra.mrb[4].mxu0 %v2916_v36  ;;  %1788 = vmatmul.mubr.f32.vlgmr.msra.gmra.mrb[4].mxu1 %v2916_v36 }
 0x275   :  { %2136 = vmatpush1.bf16.msra.mxu0 %v2752_v9  ;;  %2167 = vmatpush3.bf16.msra.mxu1 %v2769_v29 }
 0x276   :  { %2138 = vmatprep.subr.bf16.mxu0 %v2754_v10  ;;  %2168 = vmatprep.subr.bf16.mxu1 %v2654_v0 }
 0x277   :  { %712 = vmatprep.mubr.f32.mxu0 %v2655_v1  ;;  %1822 = vmatprep.mubr.msk.f32.mxu1 %vm2656_vm0, %v2655_v1 }
 0x279   :  { %2140 = vmatpush1.bf16.msra.mxu0 %v2758_v15  ;;  %2170 = vmatpush3.bf16.msra.mxu1 %v2775_v34 }
 0x27a   :  { %2142 = vmatprep.subr.bf16.mxu0 %v2761_v16  ;;  %2171 = vmatprep.subr.bf16.mxu1 %v2654_v0 }
 0x27d   :  { %2144 = vmatpush1.bf16.msra.mxu0 %v2764_v21  ;;  %2173 = vmatpush3.bf16.msra.mxu1 %v2785_v43 }
 0x27e   :  { %2146 = vmatprep.subr.bf16.mxu0 %v2767_v23  ;;  %2174 = vmatprep.subr.bf16.mxu1 %v2654_v0 }
 0x281   :  { %2148 = vmatpush1.bf16.msra.mxu0 %v2772_v32  ;;  %2176 = vmatpush3.bf16.msra.mxu1 %v2795_v52 }
 0x282   :  { %2150 = vmatprep.subr.bf16.mxu0 %v2778_v35  ;;  %2177 = vmatprep.subr.bf16.mxu1 %v2654_v0 }
 0x285   :  { %2152 = vmatpush1.bf16.msra.mxu0 %v2782_v41  ;;  %2179 = vmatpush3.bf16.msra.mxu1 %v2805_v61 }
 0x286   :  { %2154 = vmatprep.subr.bf16.mxu0 %v2788_v44  ;;  %2180 = vmatprep.subr.bf16.mxu1 %v2654_v0 }
 0x289   :  { %2156 = vmatpush1.bf16.msra.mxu0 %v2792_v50  ;;  %2182 = vmatpush3.bf16.msra.mxu1 %v2815_v6 }
 0x28a   :  { %2158 = vmatprep.subr.bf16.mxu0 %v2798_v53  ;;  %2183 = vmatprep.subr.bf16.mxu1 %v2654_v0 }
 0x28d   :  { %2160 = vmatpush1.bf16.msra.mxu0 %v2802_v59  ;;  %2185 = vmatpush3.bf16.msra.mxu1 %v2823_v12 }
 0x28e   :  { %2162 = vmatprep.subr.bf16.mxu0 %v2808_v62  ;;  %2186 = vmatprep.subr.bf16.mxu1 %v2654_v0 }
 0x291   :  { %2164 = vmatpush1.bf16.msra.mxu0 %v2812_v4  ;;  %2188 = vmatpush3.bf16.msra.mxu1 %v2829_v17 }
 0x292   :  { %2190 = vmatprep.subr.bf16.mxu0 %v2750_v5  ;;  %2221 = vmatprep.subr.bf16.mxu1 %v2654_v0 }
 0x347   :  { %v545_v39 = vpop.f32.mrb[4].mxu0  ;;  %v616_v40 = vpop.f32.mrb[4].mxu1 }
 0x348   :  { %v620_v42 = vadd.f32 %v545_v39, %v476_v38  ;;  %v547_v46 = vpop.f32.mrb[5].mxu0  ;;  %v1789_v47 = vpop.f32.mrb[5].mxu1  ;;  %v634_v58 = vadd.f32 %v616_v40, %v2870_v37 }
 0x349   :  { %v627_v49 = vadd.f32 %v547_v46, %v477_v45  ;;  %v647_v45 = vld [vmem:[#allocation3 + $0x70] sm:$0xff] }
 0x34a   :  { %v1537_v48 = vmul.f32 -1.442695, %v620_v42 }
 0x34b   :  { %v1538_v51 = vmul.f32 -1.442695, %v627_v49 }
 0x34c   :  { %2446 = vpow2.f32 %v1537_v48 }
 0x34d   :  { %2448 = vpow2.f32 %v1538_v51 }
 0x356   :  { %v2447_v54 = vpop.eup %2446 }
 0x357   :  { %v624_v55 = vadd.f32 1.0, %v2447_v54  ;;  %v2449_v56 = vpop.eup %2448 }
 0x358   :  { %v631_v57 = vadd.f32 1.0, %v2449_v56 }
 0x359   :  { %2450 = vrcp.f32 %v624_v55 }
 0x35a   :  { %2452 = vrcp.f32 %v631_v57  ;;  %v814_v57 = vld [vmem:[#allocation3 + $0x48] sm:$0xff] }
 0x363   :  { %v2451_v60 = vpop.eup %2450 }
 0x364   :  { %v635_v2 = vmul.f32 %v2451_v60, %v634_v58  ;;  %v2453_v7 = vpop.eup %2452 }
 0x365   :  { %v638_v8 = vsub.f32 1.0, %v2453_v7  ;;  %v640_v14 = vmul.f32 %v2453_v7, %v2916_v36 }
 0x366   :  { %v636_v3 = vadd.f32 %v635_v2, %v478_v63  ;;  %v815_v2 = vld [vmem:[#allocation3 + $0x50] sm:$0xff] }
 0x368   :  { %2454 = vtanh.f32 %v636_v3 }
 0x372   :  { %v2455_v11 = vpop.eup %2454 }
 0x373   :  { %v639_v13 = vmul.f32 %v2455_v11, %v638_v8 }
 0x375   :  { %v2958_v18 = vadd.f32 %v640_v14, %v639_v13 }
 0x377   :  { %643 = vst [vmem:[#allocation11 + $0x28] sm:$0xff] %v2958_v18  ;;  %713 = vmatmul.mubr.f32.vlgmr.msra.gmra.mrb[6].mxu0 %v2958_v18  ;;  %1823 = vmatmul.mubr.f32.vlgmr.msra.gmra.mrb[6].mxu1 %v2958_v18 }
 0x378   :  { %2192 = vmatpush1.bf16.msra.mxu0 %v2752_v9  ;;  %2223 = vmatpush3.bf16.msra.mxu1 %v2769_v29 }
 0x379   :  { %2194 = vmatprep.subr.bf16.mxu0 %v2754_v10  ;;  %2224 = vmatprep.subr.bf16.mxu1 %v2654_v0 }
 0x37a   :  { %881 = vmatprep.mubr.f32.mxu0 %v2655_v1  ;;  %1857 = vmatprep.mubr.msk.f32.mxu1 %vm2656_vm0, %v2655_v1 }
 0x37c   :  { %2196 = vmatpush1.bf16.msra.mxu0 %v2758_v15  ;;  %2226 = vmatpush3.bf16.msra.mxu1 %v2775_v34 }
 0x37d   :  { %2198 = vmatprep.subr.bf16.mxu0 %v2761_v16  ;;  %2227 = vmatprep.subr.bf16.mxu1 %v2654_v0 }
 0x380   :  { %2200 = vmatpush1.bf16.msra.mxu0 %v2764_v21  ;;  %2229 = vmatpush3.bf16.msra.mxu1 %v2785_v43 }
 0x381   :  { %2202 = vmatprep.subr.bf16.mxu0 %v2767_v23  ;;  %2230 = vmatprep.subr.bf16.mxu1 %v2654_v0 }
 0x384   :  { %2204 = vmatpush1.bf16.msra.mxu0 %v2772_v32  ;;  %2232 = vmatpush3.bf16.msra.mxu1 %v2795_v52 }
 0x385   :  { %2206 = vmatprep.subr.bf16.mxu0 %v2778_v35  ;;  %2233 = vmatprep.subr.bf16.mxu1 %v2654_v0 }
 0x388   :  { %2208 = vmatpush1.bf16.msra.mxu0 %v2782_v41  ;;  %2235 = vmatpush3.bf16.msra.mxu1 %v2805_v61 }
 0x389   :  { %2210 = vmatprep.subr.bf16.mxu0 %v2788_v44  ;;  %2236 = vmatprep.subr.bf16.mxu1 %v2654_v0 }
 0x38c   :  { %2212 = vmatpush1.bf16.msra.mxu0 %v2792_v50  ;;  %2238 = vmatpush3.bf16.msra.mxu1 %v2815_v6 }
 0x38d   :  { %2214 = vmatprep.subr.bf16.mxu0 %v2798_v53  ;;  %2239 = vmatprep.subr.bf16.mxu1 %v2654_v0 }
 0x390   :  { %2216 = vmatpush1.bf16.msra.mxu0 %v2802_v59  ;;  %2241 = vmatpush3.bf16.msra.mxu1 %v2823_v12 }
 0x391   :  { %2218 = vmatprep.subr.bf16.mxu0 %v2808_v62  ;;  %2242 = vmatprep.subr.bf16.mxu1 %v2654_v0 }
 0x394   :  { %2220 = vmatpush1.bf16.msra.mxu0 %v2812_v4  ;;  %2244 = vmatpush3.bf16.msra.mxu1 %v2829_v17 }
 0x395   :  { %2246 = vmatprep.subr.bf16.mxu0 %v2750_v5  ;;  %2277 = vmatprep.subr.bf16.mxu1 %v2654_v0 }
 0x44a   :  { %v714_v20 = vpop.f32.mrb[6].mxu0  ;;  %v785_v22 = vpop.f32.mrb[6].mxu1 }
 0x44b   :  { %v789_v24 = vadd.f32 %v714_v20, %v645_v19  ;;  %v716_v26 = vpop.f32.mrb[7].mxu0  ;;  %v1824_v27 = vpop.f32.mrb[7].mxu1  ;;  %v803_v40 = vadd.f32 %v785_v22, %v2870_v37 }
 0x44c   :  { %v796_v30 = vadd.f32 %v716_v26, %v646_v25  ;;  %v816_v25 = vld [vmem:[#allocation3 + $0x58] sm:$0xff] }
 0x44d   :  { %v1539_v28 = vmul.f32 -1.442695, %v789_v24 }
 0x44e   :  { %v1540_v31 = vmul.f32 -1.442695, %v796_v30 }
 0x44f   :  { %2456 = vpow2.f32 %v1539_v28 }
 0x450   :  { %2458 = vpow2.f32 %v1540_v31 }
 0x459   :  { %v2457_v33 = vpop.eup %2456 }
 0x45a   :  { %v793_v36 = vadd.f32 1.0, %v2457_v33  ;;  %v2459_v38 = vpop.eup %2458 }
 0x45b   :  { %v800_v39 = vadd.f32 1.0, %v2459_v38 }
 0x45c   :  { %2460 = vrcp.f32 %v793_v36 }
 0x45d   :  { %2462 = vrcp.f32 %v800_v39  ;;  %v983_v39 = vld [vmem:[#allocation3 + $0x30] sm:$0xff] }
 0x466   :  { %v2461_v42 = vpop.eup %2460 }
 0x467   :  { %v804_v46 = vmul.f32 %v2461_v42, %v803_v40  ;;  %v2463_v48 = vpop.eup %2462 }
 0x468   :  { %v807_v49 = vsub.f32 1.0, %v2463_v48  ;;  %v809_v55 = vmul.f32 %v2463_v48, %v2958_v18 }
 0x469   :  { %v805_v47 = vadd.f32 %v804_v46, %v647_v45  ;;  %v984_v46 = vld [vmem:[#allocation3 + $0x38] sm:$0xff] }
 0x46b   :  { %2464 = vtanh.f32 %v805_v47 }
 0x475   :  { %v2465_v51 = vpop.eup %2464 }
 0x476   :  { %v808_v54 = vmul.f32 %v2465_v51, %v807_v49 }
 0x478   :  { %v3000_v56 = vadd.f32 %v809_v55, %v808_v54 }
 0x47a   :  { %812 = vst [vmem:[#allocation11 + $0x20] sm:$0xff] %v3000_v56  ;;  %882 = vmatmul.mubr.f32.vlgmr.msra.gmra.mrb[8].mxu0 %v3000_v56  ;;  %1858 = vmatmul.mubr.f32.vlgmr.msra.gmra.mrb[8].mxu1 %v3000_v56 }
 0x47b   :  { %2248 = vmatpush1.bf16.msra.mxu0 %v2752_v9  ;;  %2279 = vmatpush3.bf16.msra.mxu1 %v2769_v29 }
 0x47c   :  { %2250 = vmatprep.subr.bf16.mxu0 %v2754_v10  ;;  %2280 = vmatprep.subr.bf16.mxu1 %v2654_v0 }
 0x47d   :  { %1050 = vmatprep.mubr.f32.mxu0 %v2655_v1  ;;  %1892 = vmatprep.mubr.msk.f32.mxu1 %vm2656_vm0, %v2655_v1 }
 0x47f   :  { %2252 = vmatpush1.bf16.msra.mxu0 %v2758_v15  ;;  %2282 = vmatpush3.bf16.msra.mxu1 %v2775_v34 }
 0x480   :  { %2254 = vmatprep.subr.bf16.mxu0 %v2761_v16  ;;  %2283 = vmatprep.subr.bf16.mxu1 %v2654_v0 }
 0x483   :  { %2256 = vmatpush1.bf16.msra.mxu0 %v2764_v21  ;;  %2285 = vmatpush3.bf16.msra.mxu1 %v2785_v43 }
 0x484   :  { %2258 = vmatprep.subr.bf16.mxu0 %v2767_v23  ;;  %2286 = vmatprep.subr.bf16.mxu1 %v2654_v0 }
 0x487   :  { %2260 = vmatpush1.bf16.msra.mxu0 %v2772_v32  ;;  %2288 = vmatpush3.bf16.msra.mxu1 %v2795_v52 }
 0x488   :  { %2262 = vmatprep.subr.bf16.mxu0 %v2778_v35  ;;  %2289 = vmatprep.subr.bf16.mxu1 %v2654_v0 }
 0x48b   :  { %2264 = vmatpush1.bf16.msra.mxu0 %v2782_v41  ;;  %2291 = vmatpush3.bf16.msra.mxu1 %v2805_v61 }
 0x48c   :  { %2266 = vmatprep.subr.bf16.mxu0 %v2788_v44  ;;  %2292 = vmatprep.subr.bf16.mxu1 %v2654_v0 }
 0x48f   :  { %2268 = vmatpush1.bf16.msra.mxu0 %v2792_v50  ;;  %2294 = vmatpush3.bf16.msra.mxu1 %v2815_v6 }
 0x490   :  { %2270 = vmatprep.subr.bf16.mxu0 %v2798_v53  ;;  %2295 = vmatprep.subr.bf16.mxu1 %v2654_v0 }
 0x493   :  { %2272 = vmatpush1.bf16.msra.mxu0 %v2802_v59  ;;  %2297 = vmatpush3.bf16.msra.mxu1 %v2823_v12 }
 0x494   :  { %2274 = vmatprep.subr.bf16.mxu0 %v2808_v62  ;;  %2298 = vmatprep.subr.bf16.mxu1 %v2654_v0 }
 0x497   :  { %2276 = vmatpush1.bf16.msra.mxu0 %v2812_v4  ;;  %2300 = vmatpush3.bf16.msra.mxu1 %v2829_v17 }
 0x498   :  { %2302 = vmatprep.subr.bf16.mxu0 %v2750_v5  ;;  %2333 = vmatprep.subr.bf16.mxu1 %v2654_v0 }
 0x54d   :  { %v883_v58 = vpop.f32.mrb[8].mxu0  ;;  %v954_v60 = vpop.f32.mrb[8].mxu1 }
 0x54e   :  { %v958_v63 = vadd.f32 %v883_v58, %v814_v57  ;;  %v885_v3 = vpop.f32.mrb[9].mxu0  ;;  %v1859_v7 = vpop.f32.mrb[9].mxu1  ;;  %v972_v22 = vadd.f32 %v954_v60, %v2870_v37 }
 0x54f   :  { %v965_v11 = vadd.f32 %v885_v3, %v815_v2 }
 0x550   :  { %v1541_v8 = vmul.f32 -1.442695, %v958_v63  ;;  %v985_v63 = vld [vmem:[#allocation3 + $0x40] sm:$0xff] }
 0x551   :  { %v1542_v13 = vmul.f32 -1.442695, %v965_v11 }
 0x552   :  { %2466 = vpow2.f32 %v1541_v8 }
 0x553   :  { %2468 = vpow2.f32 %v1542_v13 }
 0x55c   :  { %v2467_v14 = vpop.eup %2466 }
 0x55d   :  { %v962_v18 = vadd.f32 1.0, %v2467_v14  ;;  %v2469_v19 = vpop.eup %2468 }
 0x55e   :  { %v969_v20 = vadd.f32 1.0, %v2469_v19  ;;  %v1320_v19 = vld [vmem:[#allocation3] sm:$0xff] }
 0x55f   :  { %2470 = vrcp.f32 %v962_v18 }
 0x560   :  { %2472 = vrcp.f32 %v969_v20 }
 0x569   :  { %v2471_v24 = vpop.eup %2470 }
 0x56a   :  { %v973_v26 = vmul.f32 %v2471_v24, %v972_v22  ;;  %v2473_v28 = vpop.eup %2472 }
 0x56b   :  { %v976_v30 = vsub.f32 1.0, %v2473_v28  ;;  %v978_v36 = vmul.f32 %v2473_v28, %v3000_v56 }
 0x56c   :  { %v974_v27 = vadd.f32 %v973_v26, %v816_v25  ;;  %v1321_v25 = vld [vmem:[#allocation3 + $0x8] sm:$0xff] }
 0x56e   :  { %2474 = vtanh.f32 %v974_v27 }
 0x578   :  { %v2475_v31 = vpop.eup %2474 }
 0x579   :  { %v977_v33 = vmul.f32 %v2475_v31, %v976_v30 }
 0x57b   :  { %v3042_v38 = vadd.f32 %v978_v36, %v977_v33 }
 0x57d   :  { %981 = vst [vmem:[#allocation11 + $0x18] sm:$0xff] %v3042_v38  ;;  %1051 = vmatmul.mubr.f32.vlgmr.msra.gmra.mrb[10].mxu0 %v3042_v38  ;;  %1893 = vmatmul.mubr.f32.vlgmr.msra.gmra.mrb[10].mxu1 %v3042_v38 }
 0x57e   :  { %2304 = vmatpush1.bf16.msra.mxu0 %v2752_v9  ;;  %2335 = vmatpush3.bf16.msra.mxu1 %v2769_v29 }
 0x57f   :  { %2306 = vmatprep.subr.bf16.mxu0 %v2754_v10  ;;  %2336 = vmatprep.subr.bf16.mxu1 %v2654_v0 }
 0x580   :  { %1219 = vmatprep.mubr.f32.mxu0 %v2655_v1  ;;  %1927 = vmatprep.mubr.msk.f32.mxu1 %vm2656_vm0, %v2655_v1 }
 0x582   :  { %2308 = vmatpush1.bf16.msra.mxu0 %v2758_v15  ;;  %2338 = vmatpush3.bf16.msra.mxu1 %v2775_v34 }
 0x583   :  { %2310 = vmatprep.subr.bf16.mxu0 %v2761_v16  ;;  %2339 = vmatprep.subr.bf16.mxu1 %v2654_v0 }
 0x586   :  { %2312 = vmatpush1.bf16.msra.mxu0 %v2764_v21  ;;  %2341 = vmatpush3.bf16.msra.mxu1 %v2785_v43 }
 0x587   :  { %2314 = vmatprep.subr.bf16.mxu0 %v2767_v23  ;;  %2342 = vmatprep.subr.bf16.mxu1 %v2654_v0 }
 0x58a   :  { %2316 = vmatpush1.bf16.msra.mxu0 %v2772_v32  ;;  %2344 = vmatpush3.bf16.msra.mxu1 %v2795_v52 }
 0x58b   :  { %2318 = vmatprep.subr.bf16.mxu0 %v2778_v35  ;;  %2345 = vmatprep.subr.bf16.mxu1 %v2654_v0 }
 0x58e   :  { %2320 = vmatpush1.bf16.msra.mxu0 %v2782_v41  ;;  %2347 = vmatpush3.bf16.msra.mxu1 %v2805_v61 }
 0x58f   :  { %2322 = vmatprep.subr.bf16.mxu0 %v2788_v44  ;;  %2348 = vmatprep.subr.bf16.mxu1 %v2654_v0 }
 0x592   :  { %2324 = vmatpush1.bf16.msra.mxu0 %v2792_v50  ;;  %2350 = vmatpush3.bf16.msra.mxu1 %v2815_v6 }
 0x593   :  { %2326 = vmatprep.subr.bf16.mxu0 %v2798_v53  ;;  %2351 = vmatprep.subr.bf16.mxu1 %v2654_v0 }
 0x596   :  { %2328 = vmatpush1.bf16.msra.mxu0 %v2802_v59  ;;  %2353 = vmatpush3.bf16.msra.mxu1 %v2823_v12 }
 0x597   :  { %2330 = vmatprep.subr.bf16.mxu0 %v2808_v62  ;;  %2354 = vmatprep.subr.bf16.mxu1 %v2654_v0 }
 0x59a   :  { %2332 = vmatpush1.bf16.msra.mxu0 %v2812_v4  ;;  %2356 = vmatpush3.bf16.msra.mxu1 %v2829_v17 }
 0x59b   :  { %2358 = vmatprep.subr.bf16.mxu0 %v2750_v5  ;;  %2389 = vmatprep.subr.bf16.mxu1 %v2654_v0 }
 0x650   :  { %v1052_v40 = vpop.f32.mrb[10].mxu0  ;;  %v1123_v42 = vpop.f32.mrb[10].mxu1 }
 0x651   :  { %v1127_v45 = vadd.f32 %v1052_v40, %v983_v39  ;;  %v1054_v47 = vpop.f32.mrb[11].mxu0  ;;  %v1894_v48 = vpop.f32.mrb[11].mxu1  ;;  %v1141_v5 = vadd.f32 %v1123_v42, %v2870_v37 }
 0x652   :  { %v1134_v51 = vadd.f32 %v1054_v47, %v984_v46 }
 0x653   :  { %v1543_v49 = vmul.f32 -1.442695, %v1127_v45  ;;  %v1322_v45 = vld [vmem:[#allocation3 + $0x10] sm:$0xff] }
 0x654   :  { %v1544_v54 = vmul.f32 -1.442695, %v1134_v51 }
 0x655   :  { %2476 = vpow2.f32 %v1543_v49 }
 0x656   :  { %2478 = vpow2.f32 %v1544_v54 }
 0x65f   :  { %v2477_v55 = vpop.eup %2476 }
 0x660   :  { %v1131_v56 = vadd.f32 1.0, %v2477_v55  ;;  %v2479_v57 = vpop.eup %2478 }
 0x661   :  { %v1138_v58 = vadd.f32 1.0, %v2479_v57 }
 0x662   :  { %2480 = vrcp.f32 %v1131_v56 }
 0x663   :  { %2482 = vrcp.f32 %v1138_v58 }
 0x66c   :  { %v2481_v60 = vpop.eup %2480 }
 0x66d   :  { %v1142_v2 = vmul.f32 %v2481_v60, %v1141_v5  ;;  %v2483_v7 = vpop.eup %2482 }
 0x66e   :  { %v1145_v8 = vsub.f32 1.0, %v2483_v7  ;;  %v1147_v14 = vmul.f32 %v2483_v7, %v3042_v38 }
 0x66f   :  { %v1143_v3 = vadd.f32 %v1142_v2, %v985_v63 }
 0x671   :  { %2484 = vtanh.f32 %v1143_v3 }
 0x67b   :  { %v2485_v11 = vpop.eup %2484 }
 0x67c   :  { %v1146_v13 = vmul.f32 %v2485_v11, %v1145_v8 }
 0x67e   :  { %v3084_v18 = vadd.f32 %v1147_v14, %v1146_v13 }
 0x680   :  { %1150 = vst [vmem:[#allocation11 + $0x10] sm:$0xff] %v3084_v18  ;;  %1220 = vmatmul.mubr.f32.vlgmr.msra.gmra.mrb[12].mxu0 %v3084_v18  ;;  %1928 = vmatmul.mubr.f32.vlgmr.msra.gmra.mrb[12].mxu1 %v3084_v18 }
 0x681   :  { %2360 = vmatpush1.bf16.msra.mxu0 %v2752_v9  ;;  %2391 = vmatpush3.bf16.msra.mxu1 %v2769_v29 }
 0x682   :  { %2362 = vmatprep.subr.bf16.mxu0 %v2754_v10  ;;  %2392 = vmatprep.subr.bf16.mxu1 %v2654_v0 }
 0x683   :  { %1387 = vmatprep.mubr.f32.mxu0 %v2655_v1  ;;  %1962 = vmatprep.mubr.msk.f32.mxu1 %vm2656_vm0, %v2655_v1  ;;  %v1152_v1 = vld [vmem:[#allocation3 + $0x18] sm:$0xff] }
 0x685   :  { %2364 = vmatpush1.bf16.msra.mxu0 %v2758_v15  ;;  %2394 = vmatpush3.bf16.msra.mxu1 %v2775_v34 }
 0x686   :  { %2366 = vmatprep.subr.bf16.mxu0 %v2761_v16  ;;  %2395 = vmatprep.subr.bf16.mxu1 %v2654_v0  ;;  %v1153_v16 = vld [vmem:[#allocation3 + $0x20] sm:$0xff] }
 0x689   :  { %2368 = vmatpush1.bf16.msra.mxu0 %v2764_v21  ;;  %2397 = vmatpush3.bf16.msra.mxu1 %v2785_v43 }
 0x68a   :  { %2370 = vmatprep.subr.bf16.mxu0 %v2767_v23  ;;  %2398 = vmatprep.subr.bf16.mxu1 %v2654_v0 }
 0x68d   :  { %2372 = vmatpush1.bf16.msra.mxu0 %v2772_v32  ;;  %2400 = vmatpush3.bf16.msra.mxu1 %v2795_v52  ;;  %v1154_v52 = vld [vmem:[#allocation3 + $0x28] sm:$0xff] }
 0x68e   :  { %2374 = vmatprep.subr.bf16.mxu0 %v2778_v35  ;;  %2401 = vmatprep.subr.bf16.mxu1 %v2654_v0 }
 0x691   :  { %2376 = vmatpush1.bf16.msra.mxu0 %v2782_v41  ;;  %2403 = vmatpush3.bf16.msra.mxu1 %v2805_v61 }
 0x692   :  { %2378 = vmatprep.subr.bf16.mxu0 %v2788_v44  ;;  %2404 = vmatprep.subr.bf16.mxu1 %v2654_v0 }
 0x695   :  { %2380 = vmatpush1.bf16.msra.mxu0 %v2792_v50  ;;  %2406 = vmatpush3.bf16.msra.mxu1 %v2815_v6 }
 0x696   :  { %2382 = vmatprep.subr.bf16.mxu0 %v2798_v53  ;;  %2407 = vmatprep.subr.bf16.mxu1 %v2654_v0 }
 0x699   :  { %2384 = vmatpush1.bf16.msra.mxu0 %v2802_v59  ;;  %2409 = vmatpush3.bf16.msra.mxu1 %v2823_v12 }
 0x69a   :  { %2386 = vmatprep.subr.bf16.mxu0 %v2808_v62  ;;  %2410 = vmatprep.subr.bf16.mxu1 %v2654_v0 }
 0x69d   :  { %2388 = vmatpush1.bf16.msra.mxu0 %v2812_v4  ;;  %2412 = vmatpush3.bf16.msra.mxu1 %v2829_v17 }
 0x753   :  { %v1221_v9 = vpop.f32.mrb[12].mxu0  ;;  %v1292_v10 = vpop.f32.mrb[12].mxu1 }
 0x754   :  { %v1296_v15 = vadd.f32 %v1221_v9, %v1152_v1  ;;  %v1223_v21 = vpop.f32.mrb[13].mxu0  ;;  %v1929_v23 = vpop.f32.mrb[13].mxu1  ;;  %v1310_v44 = vadd.f32 %v1292_v10, %v2870_v37 }
 0x755   :  { %v1303_v32 = vadd.f32 %v1223_v21, %v1153_v16 }
 0x756   :  { %v1545_v29 = vmul.f32 -1.442695, %v1296_v15 }
 0x757   :  { %v1546_v34 = vmul.f32 -1.442695, %v1303_v32 }
 0x758   :  { %2486 = vpow2.f32 %v1545_v29 }
 0x759   :  { %2488 = vpow2.f32 %v1546_v34 }
 0x762   :  { %v2487_v35 = vpop.eup %2486 }
 0x763   :  { %v1300_v41 = vadd.f32 1.0, %v2487_v35  ;;  %v2489_v0 = vpop.eup %2488 }
 0x764   :  { %v1307_v43 = vadd.f32 1.0, %v2489_v0 }
 0x765   :  { %2490 = vrcp.f32 %v1300_v41 }
 0x766   :  { %2492 = vrcp.f32 %v1307_v43 }
 0x76f   :  { %v2491_v50 = vpop.eup %2490 }
 0x770   :  { %v1311_v53 = vmul.f32 %v2491_v50, %v1310_v44  ;;  %v2493_v61 = vpop.eup %2492 }
 0x771   :  { %v1314_v62 = vsub.f32 1.0, %v2493_v61  ;;  %v1316_v12 = vmul.f32 %v2493_v61, %v3084_v18 }
 0x772   :  { %v1312_v59 = vadd.f32 %v1311_v53, %v1154_v52 }
 0x774   :  { %2494 = vtanh.f32 %v1312_v59 }
 0x77e   :  { %v2495_v4 = vpop.eup %2494 }
 0x77f   :  { %v1315_v6 = vmul.f32 %v2495_v4, %v1314_v62 }
 0x781   :  { %v1317_v17 = vadd.f32 %v1316_v12, %v1315_v6 }
 0x783   :  { %1319 = vst [vmem:[#allocation11 + $0x8] sm:$0xff] %v1317_v17  ;;  %1388 = vmatmul.mubr.f32.vlgmr.msra.gmra.mrb[14].mxu0 %v1317_v17  ;;  %1963 = vmatmul.mubr.f32.vlgmr.msra.gmra.mrb[14].mxu1 %v1317_v17 }
 0x856   :  { %v1389_v20 = vpop.f32.mrb[14].mxu0  ;;  %v1460_v22 = vpop.f32.mrb[14].mxu1 }
 0x857   :  { %v1464_v24 = vadd.f32 %v1389_v20, %v1320_v19  ;;  %v1391_v26 = vpop.f32.mrb[15].mxu0  ;;  %v1964_v27 = vpop.f32.mrb[15].mxu1  ;;  %v1478_v40 = vadd.f32 %v1460_v22, %v2870_v37 }
 0x858   :  { %v1471_v30 = vadd.f32 %v1391_v26, %v1321_v25 }
 0x859   :  { %v1547_v28 = vmul.f32 -1.442695, %v1464_v24 }
 0x85a   :  { %v1548_v31 = vmul.f32 -1.442695, %v1471_v30 }
 0x85b   :  { %2496 = vpow2.f32 %v1547_v28 }
 0x85c   :  { %2498 = vpow2.f32 %v1548_v31 }
 0x865   :  { %v2497_v33 = vpop.eup %2496 }
 0x866   :  { %v1468_v36 = vadd.f32 1.0, %v2497_v33  ;;  %v2499_v38 = vpop.eup %2498 }
 0x867   :  { %v1475_v39 = vadd.f32 1.0, %v2499_v38 }
 0x868   :  { %2500 = vrcp.f32 %v1468_v36 }
 0x869   :  { %2502 = vrcp.f32 %v1475_v39 }
 0x872   :  { %v2501_v42 = vpop.eup %2500 }
 0x873   :  { %v1479_v46 = vmul.f32 %v2501_v42, %v1478_v40  ;;  %v2503_v48 = vpop.eup %2502 }
 0x874   :  { %v1482_v49 = vsub.f32 1.0, %v2503_v48  ;;  %v1484_v55 = vmul.f32 %v2503_v48, %v1317_v17 }
 0x875   :  { %v1480_v47 = vadd.f32 %v1479_v46, %v1322_v45 }
 0x877   :  { %2504 = vtanh.f32 %v1480_v47 }
 0x881   :  { %v2505_v51 = vpop.eup %2504 }
 0x882   :  { %v1483_v54 = vmul.f32 %v2505_v51, %v1482_v49 }
 0x884   :  { %v1485_v56 = vadd.f32 %v1484_v55, %v1483_v54 }
 0x886   :  { %1486 = vst [vmem:[#allocation11] sm:$0xff] %v1485_v56  ;;  %1491 = vst [vmem:[#allocation12] sm:$0xff] %v1485_v56 }
 0x887   :  { %2605 = shalt.err (!%p2602_p8)
}
 0x888   :  { %s2606_s20 = scalar_lea.hbm %s3160_s4, 1024 }
 0x889   :  { %p2607_p9 = scmp.ne.s32.totalorder %s3160_s4, %s2606_s20  ;;  %p2610_p10 = scmp.lt.u32.totalorder %s2606_s20, %s3160_s4 }
 0x88b   :  { %p2612_p11 = pnand %p2610_p10, %p2607_p9 }
 0x88d   :  { %2615 = shalt.err (!%p2612_p11)
}
 0x88e   :  { %s2659_s26 = smov 128   ;;  %s2660_s27 = smov 8  }
 0x88f   :  { %1507 = dma.vmem_to_hbm [thread:$0]  %s1502_s15, 1024, %s3160_s4, [#allocation5], %s2659_s26, %s2659_s26, %s2660_s27  }
 0x890   :  { %s2616_s0 = scalar_lea.vmem %s3125_s1, 128  ;;  %p2621_p13 = scmp.lt.s32.totalorder %s3125_s1, %s3125_s1 }
 0x891   :  { %p2617_p12 = scmp.ne.s32.totalorder %s3125_s1, %s2616_s0  ;;  %p2622_p0 = scmp.lt.s32.totalorder %s2616_s0, %s2616_s0 }
 0x893   :  { %p2623_p1 = por %p2622_p0, %p2621_p13 }
 0x895   :  { %p2624_p2 = pnand %p2623_p1, %p2617_p12 }
 0x897   :  { %2627 = shalt.err (!%p2624_p2)
}
 0x898   :  { %s2628_s6 = scalar_lea.hbm %s3161_s5, 128 }
 0x899   :  { %p2629_p3 = scmp.ne.s32.totalorder %s3161_s5, %s2628_s6  ;;  %p2632_p4 = scmp.lt.u32.totalorder %s2628_s6, %s3161_s5 }
 0x89b   :  { %p2634_p5 = pnand %p2632_p4, %p2629_p3 }
 0x89d   :  { %2637 = shalt.err (!%p2634_p5)
}
 0x89e   :  { %1517 = dma.vmem_to_hbm [thread:$0]  %s3125_s1, 128, %s3161_s5, [#allocation13]  }
 0x89f   :  { %2644 = dma.done.wait [#allocation5], 1024  }
 0x8a0   :  { %2645 = vsyncadd [#allocation5], 4294966272 }
 0x8a1   :  { %2646 = dma.done.wait [#allocation13], 128  }
 0x8a2   :  { %2647 = vsyncadd [#allocation13], 4294967168 }
 0x8a3   :  { %1524 = vsyncpa [#allocation4], 1 }
 0x8a4   :  { %1525 = vsyncpa [#allocation7], 1 }
 0x8a5   :  { %1526 = vsyncpa [#allocation10], 1 }
 0x8a6   :  { %1527 = vsyncpa [#allocation5], 1 }
 0x8a7   :  { %1528 = vsyncpa [#allocation13], 1 }

// kernel: encoder_forward.7
= control target key start
LH: loop header
LB: loop body
LE: loop exit
PB: predicated region body
PF: predicated region fallthrough
CT: control target
= control target key end

     0   :  { %9 = vsyncpa [#allocation4], 0  ;;  %s3054_s0 = inlined_call_operand.hbm [shape: f32[8,8,384], index: 0, kind: input, shape index: {}]   ;;  %s3055_s1 = inlined_call_operand.hbm [shape: f32[128,384], index: 1, kind: input, shape index: {}]   ;;  %s3056_s2 = inlined_call_operand.hbm [shape: f32[8,128], index: 2, kind: input, shape index: {}]   ;;  %s3057_s3 = inlined_call_operand.hbm [shape: f32[8,128], index: 3, kind: input, shape index: {}]   ;;  %s3058_s4 = inlined_call_operand.hbm [shape: f32[8,128], index: 4, kind: output, shape index: {}]  }
   0x1   :  { %10 = vsyncpa [#allocation7], 0 }
   0x2   :  { %11 = vsyncpa [#allocation10], 0 }
   0x3   :  { %12 = vsyncpa [#allocation5], 0  ;;  %s2579_s15 = smov [#allocation6]   ;;  %s2580_s17 = smov [#allocation3]  }
   0x4   :  { %s35_s16 = sshll.u32 %s2579_s15, 4  ;;  %s23_s18 = sshll.u32 %s2580_s17, 4  ;;  %s36_s16 = int_to_ptr.vmem [resolvable:$true] %s35_s16  ;;  %s2614_s18 = int_to_ptr.vmem [resolvable:$true] %s23_s18 }
   0x5   :  { %s2461_s21 = scalar_lea.hbm %s3055_s1, 6144 }
   0x6   :  { %p2462_p0 = scmp.ne.s32.totalorder %s3055_s1, %s2461_s21  ;;  %p2465_p1 = scmp.lt.u32.totalorder %s2461_s21, %s3055_s1 }
   0x8   :  { %p2467_p2 = pnand %p2465_p1, %p2462_p0 }
   0xa   :  { %2470 = shalt.err (!%p2467_p2)
}
   0xb   :  { %s2471_s26 = scalar_lea.vmem %s36_s16, 6144  ;;  %p2476_p4 = scmp.lt.s32.totalorder %s36_s16, %s36_s16 }
   0xc   :  { %p2472_p3 = scmp.ne.s32.totalorder %s36_s16, %s2471_s26  ;;  %p2477_p5 = scmp.lt.s32.totalorder %s2471_s26, %s2471_s26 }
   0xe   :  { %p2478_p6 = por %p2477_p5, %p2476_p4 }
  0x10   :  { %p2479_p7 = pnand %p2478_p6, %p2472_p3 }
  0x12   :  { %2482 = shalt.err (!%p2479_p7)
}
  0x13   :  { %s2581_s27 = smov 384   ;;  %s2582_s28 = smov 24  }
  0x14   :  { %41 = dma.hbm_to_vmem [thread:$0]  %s3055_s1, 6144, %s36_s16, [#allocation7], %s2581_s27, %s2581_s27, %s2582_s28  }
  0x15   :  { %s2483_s7 = scalar_lea.hbm %s3054_s0, 3072 }
  0x16   :  { %p2484_p8 = scmp.ne.s32.totalorder %s3054_s0, %s2483_s7  ;;  %p2487_p9 = scmp.lt.u32.totalorder %s2483_s7, %s3054_s0 }
  0x18   :  { %p2489_p10 = pnand %p2487_p9, %p2484_p8 }
  0x1a   :  { %2492 = shalt.err (!%p2489_p10)
}
  0x1b   :  { %s2493_s12 = scalar_lea.vmem %s2614_s18, 3072  ;;  %p2498_p12 = scmp.lt.s32.totalorder %s2614_s18, %s2614_s18 }
  0x1c   :  { %p2494_p11 = scmp.ne.s32.totalorder %s2614_s18, %s2493_s12  ;;  %p2499_p13 = scmp.lt.s32.totalorder %s2493_s12, %s2493_s12 }
  0x1e   :  { %p2500_p0 = por %p2499_p13, %p2498_p12 }
  0x20   :  { %p2501_p1 = pnand %p2500_p0, %p2494_p11 }
  0x22   :  { %2504 = shalt.err (!%p2501_p1)
}
  0x23   :  { %29 = dma.hbm_to_vmem [thread:$0]  %s3054_s0, 3072, %s2614_s18, [#allocation4], %s2581_s27, %s2581_s27, %s2582_s28  }
  0x24   :  { %s2583_s14 = smov [#allocation8]   ;;  %s2584_s16 = smov [#allocation9]  }
  0x25   :  { %s48_s15 = sshll.u32 %s2583_s14, 4  ;;  %s58_s17 = sshll.u32 %s2584_s16, 4  ;;  %s49_s15 = int_to_ptr.vmem [resolvable:$true] %s48_s15  ;;  %s59_s17 = int_to_ptr.vmem [resolvable:$true] %s58_s17 }
  0x26   :  { %s2505_s21 = scalar_lea.hbm %s3056_s2, 128 }
  0x27   :  { %p2506_p2 = scmp.ne.s32.totalorder %s3056_s2, %s2505_s21  ;;  %p2509_p3 = scmp.lt.u32.totalorder %s2505_s21, %s3056_s2 }
  0x29   :  { %p2511_p4 = pnand %p2509_p3, %p2506_p2 }
  0x2b   :  { %2514 = shalt.err (!%p2511_p4)
}
  0x2c   :  { %s2515_s0 = scalar_lea.vmem %s49_s15, 128  ;;  %p2520_p6 = scmp.lt.s32.totalorder %s49_s15, %s49_s15 }
  0x2d   :  { %p2516_p5 = scmp.ne.s32.totalorder %s49_s15, %s2515_s0  ;;  %p2521_p7 = scmp.lt.s32.totalorder %s2515_s0, %s2515_s0 }
  0x2f   :  { %p2522_p8 = por %p2521_p7, %p2520_p6 }
  0x31   :  { %p2523_p9 = pnand %p2522_p8, %p2516_p5 }
  0x33   :  { %2526 = shalt.err (!%p2523_p9)
}
  0x34   :  { %51 = dma.hbm_to_vmem [thread:$0]  %s3056_s2, 128, %s49_s15, [#allocation7]  }
  0x35   :  { %s2527_s29 = scalar_lea.hbm %s3057_s3, 128 }
  0x36   :  { %p2528_p10 = scmp.ne.s32.totalorder %s3057_s3, %s2527_s29  ;;  %p2531_p11 = scmp.lt.u32.totalorder %s2527_s29, %s3057_s3 }
  0x38   :  { %p2533_p12 = pnand %p2531_p11, %p2528_p10 }
  0x3a   :  { %2536 = shalt.err (!%p2533_p12)
}
  0x3b   :  { %s2537_s8 = scalar_lea.vmem %s59_s17, 128  ;;  %p2542_p0 = scmp.lt.s32.totalorder %s59_s17, %s59_s17 }
  0x3c   :  { %p2538_p13 = scmp.ne.s32.totalorder %s59_s17, %s2537_s8  ;;  %p2543_p1 = scmp.lt.s32.totalorder %s2537_s8, %s2537_s8 }
  0x3e   :  { %p2544_p2 = por %p2543_p1, %p2542_p0 }
  0x40   :  { %p2545_p3 = pnand %p2544_p2, %p2538_p13 }
  0x42   :  { %2548 = shalt.err (!%p2545_p3)
}
  0x43   :  { %61 = dma.hbm_to_vmem [thread:$0]  %s3057_s3, 128, %s59_s17, [#allocation10]  }
  0x44   :  { %2571 = dma.done.wait [#allocation4], 3072  }
  0x45   :  { %2572 = vsyncadd [#allocation4], 4294964224 }
  0x46   :  { %2573 = dma.done.wait [#allocation7], 6272  }
  0x47   :  { %2574 = vsyncadd [#allocation7], 4294961024 }
  0x48   :  { %2575 = dma.done.wait [#allocation10], 128  }
  0x49   :  { %2576 = vsyncadd [#allocation10], 4294967168  ;;  %v2585_v0 = vmov 0.0|0.0   ;;  %v2586_v1 = vmov 0.0   ;;  %vm2587_vm0 = vmmov 0   ;;  %v83_v2 = vld [vmem:[#allocation6 + $0x8] sm:$0xff] }
  0x4a   :  { %1955 = vmatprep.subr.bf16.mxu1 %v2585_v0  ;;  %200 = vmatprep.mubr.f32.mxu0 %v2586_v1  ;;  %v86_v3 = vld [vmem:[#allocation6 + $0x20] sm:$0xff]  ;;  %v85_v6 = vld [vmem:[#allocation6 + $0x18] sm:$0xff]  ;;  %v92_v8 = vld [vmem:[#allocation6 + $0x50] sm:$0xff]  ;;  %s2588_s3 = smov [#allocation11]  }
  0x4b   :  { %1675 = vmatprep.mubr.msk.f32.mxu1 %vm2587_vm0, %v2586_v1  ;;  %v82_v4 = vld [vmem:[#allocation6] sm:$0xff]  ;;  %v2673_v5 = vpack.c.bf16 %v86_v3, %v83_v2  ;;  %v89_v7 = vld [vmem:[#allocation6 + $0x38] sm:$0xff]  ;;  %v88_v11 = vld [vmem:[#allocation6 + $0x30] sm:$0xff]  ;;  %s1478_s10 = sshll.u32 %s2588_s3, 4  ;;  %s1479_s10 = int_to_ptr.vmem [resolvable:$true] %s1478_s10 }
  0x4c   :  { %v2675_v9 = vpack.c.bf16 %v85_v6, %v82_v4  ;;  %v2677_v10 = vpack.c.bf16 %v92_v8, %v89_v7  ;;  %v91_v12 = vld [vmem:[#allocation6 + $0x48] sm:$0xff]  ;;  %v98_v14 = vld [vmem:[#allocation6 + $0x80] sm:$0xff]  ;;  %v97_v18 = vld [vmem:[#allocation6 + $0x78] sm:$0xff]  ;;  %s2549_s11 = scalar_lea.vmem %s1479_s10, 128  ;;  %p2554_p5 = scmp.lt.s32.totalorder %s1479_s10, %s1479_s10 }
  0x4d   :  { %v95_v13 = vld [vmem:[#allocation6 + $0x68] sm:$0xff]  ;;  %1924 = vmatprep.subr.bf16.mxu0 %v2673_v5  ;;  %v2681_v15 = vpack.c.bf16 %v91_v12, %v88_v11  ;;  %v94_v17 = vld [vmem:[#allocation6 + $0x60] sm:$0xff]  ;;  %v101_v19 = vld [vmem:[#allocation6 + $0x98] sm:$0xff]  ;;  %p2550_p4 = scmp.ne.s32.totalorder %s1479_s10, %s2549_s11  ;;  %p2555_p6 = scmp.lt.s32.totalorder %s2549_s11, %s2549_s11 }
  0x4e   :  { %1926 = vmatpush1.bf16.msra.mxu0 %v2675_v9  ;;  %v2684_v16 = vpack.c.bf16 %v98_v14, %v95_v13  ;;  %v104_v20 = vld [vmem:[#allocation6 + $0xb0] sm:$0xff]  ;;  %v2687_v21 = vpack.c.bf16 %v97_v18, %v94_v17  ;;  %v103_v24 = vld [vmem:[#allocation6 + $0xa8] sm:$0xff]  ;;  %v110_v28 = vld [vmem:[#allocation6 + $0xe0] sm:$0xff] }
  0x4f   :  { %1928 = vmatprep.subr.bf16.mxu0 %v2677_v10  ;;  %v100_v22 = vld [vmem:[#allocation6 + $0x90] sm:$0xff]  ;;  %v2690_v23 = vpack.c.bf16 %v104_v20, %v101_v19  ;;  %v87_v26 = vld [vmem:[#allocation6 + $0x28] sm:$0xff]  ;;  %v90_v30 = vld [vmem:[#allocation6 + $0x40] sm:$0xff]  ;;  %p2556_p7 = por %p2555_p6, %p2554_p5 }
  0x50   :  { %v84_v25 = vld [vmem:[#allocation6 + $0x10] sm:$0xff]  ;;  %v107_v27 = vld [vmem:[#allocation6 + $0xc8] sm:$0xff]  ;;  %v93_v31 = vld [vmem:[#allocation6 + $0x58] sm:$0xff]  ;;  %v2695_v32 = vpack.c.bf16 %v103_v24, %v100_v22 }
  0x51   :  { %v2692_v29 = vpack.c.bf16 %v87_v26, %v84_v25  ;;  %v106_v33 = vld [vmem:[#allocation6 + $0xc0] sm:$0xff]  ;;  %v2698_v34 = vpack.c.bf16 %v93_v31, %v90_v30  ;;  %v2701_v35 = vpack.c.bf16 %v110_v28, %v107_v27  ;;  %v109_v36 = vld [vmem:[#allocation6 + $0xd8] sm:$0xff]  ;;  %v96_v37 = vld [vmem:[#allocation6 + $0x70] sm:$0xff]  ;;  %p2557_p8 = pnand %p2556_p7, %p2550_p4 }
  0x52   :  { %1930 = vmatpush1.bf16.msra.mxu0 %v2681_v15  ;;  %v99_v38 = vld [vmem:[#allocation6 + $0x88] sm:$0xff]  ;;  %v113_v39 = vld [vmem:[#allocation6 + $0xf8] sm:$0xff]  ;;  %v116_v40 = vld [vmem:[#allocation6 + $0x110] sm:$0xff]  ;;  %v2705_v41 = vpack.c.bf16 %v109_v36, %v106_v33 }
  0x53   :  { %1932 = vmatprep.subr.bf16.mxu0 %v2684_v16  ;;  %1957 = vmatpush3.bf16.msra.mxu1 %v2692_v29  ;;  %v112_v42 = vld [vmem:[#allocation6 + $0xf0] sm:$0xff]  ;;  %v2708_v43 = vpack.c.bf16 %v99_v38, %v96_v37  ;;  %v2711_v44 = vpack.c.bf16 %v116_v40, %v113_v39  ;;  %v115_v45 = vld [vmem:[#allocation6 + $0x108] sm:$0xff]  ;;  %v102_v46 = vld [vmem:[#allocation6 + $0xa0] sm:$0xff] }
  0x54   :  { %1958 = vmatprep.subr.bf16.mxu1 %v2585_v0  ;;  %v105_v47 = vld [vmem:[#allocation6 + $0xb8] sm:$0xff]  ;;  %v119_v48 = vld [vmem:[#allocation6 + $0x128] sm:$0xff]  ;;  %v122_v49 = vld [vmem:[#allocation6 + $0x140] sm:$0xff]  ;;  %v2715_v50 = vpack.c.bf16 %v115_v45, %v112_v42 }
  0x55   :  { %v118_v51 = vld [vmem:[#allocation6 + $0x120] sm:$0xff]  ;;  %v2718_v52 = vpack.c.bf16 %v105_v47, %v102_v46  ;;  %v2721_v53 = vpack.c.bf16 %v122_v49, %v119_v48  ;;  %v121_v54 = vld [vmem:[#allocation6 + $0x138] sm:$0xff]  ;;  %v108_v55 = vld [vmem:[#allocation6 + $0xd0] sm:$0xff] }
  0x56   :  { %1934 = vmatpush1.bf16.msra.mxu0 %v2687_v21  ;;  %v111_v56 = vld [vmem:[#allocation6 + $0xe8] sm:$0xff]  ;;  %v125_v57 = vld [vmem:[#allocation6 + $0x158] sm:$0xff]  ;;  %v128_v58 = vld [vmem:[#allocation6 + $0x170] sm:$0xff]  ;;  %v2725_v59 = vpack.c.bf16 %v121_v54, %v118_v51 }
  0x57   :  { %1936 = vmatprep.subr.bf16.mxu0 %v2690_v23  ;;  %1960 = vmatpush3.bf16.msra.mxu1 %v2698_v34  ;;  %v124_v60 = vld [vmem:[#allocation6 + $0x150] sm:$0xff]  ;;  %v2728_v61 = vpack.c.bf16 %v111_v56, %v108_v55  ;;  %v2731_v62 = vpack.c.bf16 %v128_v58, %v125_v57  ;;  %v127_v63 = vld [vmem:[#allocation6 + $0x168] sm:$0xff]  ;;  %v114_v2 = vld [vmem:[#allocation6 + $0x100] sm:$0xff] }
  0x58   :  { %1961 = vmatprep.subr.bf16.mxu1 %v2585_v0  ;;  %v117_v3 = vld [vmem:[#allocation6 + $0x118] sm:$0xff]  ;;  %v2735_v4 = vpack.c.bf16 %v127_v63, %v124_v60  ;;  %v120_v7 = vld [vmem:[#allocation6 + $0x130] sm:$0xff]  ;;  %v123_v8 = vld [vmem:[#allocation6 + $0x148] sm:$0xff] }
  0x59   :  { %v2738_v6 = vpack.c.bf16 %v117_v3, %v114_v2  ;;  %v2743_v11 = vld [vmem:[#allocation9] sm:$0xff]  ;;  %v2746_v12 = vpack.c.bf16 %v123_v8, %v120_v7  ;;  %v126_v13 = vld [vmem:[#allocation6 + $0x160] sm:$0xff]  ;;  %v129_v14 = vld [vmem:[#allocation6 + $0x178] sm:$0xff] }
  0x5a   :  { %1938 = vmatpush1.bf16.msra.mxu0 %v2695_v32  ;;  %v2752_v17 = vpack.c.bf16 %v129_v14, %v126_v13  ;;  %v133_v18 = vld [vmem:[#allocation3 + $0xa8] sm:$0xff]  ;;  %v134_v22 = vld [vmem:[#allocation3 + $0xb0] sm:$0xff]  ;;  %v2793_v37 = vld [vmem:[#allocation8] sm:$0xff] }
  0x5b   :  { %1940 = vmatprep.subr.bf16.mxu0 %v2701_v35  ;;  %1963 = vmatpush3.bf16.msra.mxu1 %v2708_v43  ;;  %v135_v42 = vld [vmem:[#allocation3 + $0xb8] sm:$0xff]  ;;  %v300_v56 = vld [vmem:[#allocation3 + $0x90] sm:$0xff] }
  0x5c   :  { %1964 = vmatprep.subr.bf16.mxu1 %v2585_v0  ;;  %v301_v63 = vld [vmem:[#allocation3 + $0x98] sm:$0xff] }
  0x5e   :  { %1942 = vmatpush1.bf16.msra.mxu0 %v2705_v41 }
  0x5f   :  { %1944 = vmatprep.subr.bf16.mxu0 %v2711_v44  ;;  %1966 = vmatpush3.bf16.msra.mxu1 %v2718_v52 }
  0x60   :  { %1967 = vmatprep.subr.bf16.mxu1 %v2585_v0 }
  0x62   :  { %1946 = vmatpush1.bf16.msra.mxu0 %v2715_v50 }
  0x63   :  { %1948 = vmatprep.subr.bf16.mxu0 %v2721_v53  ;;  %1969 = vmatpush3.bf16.msra.mxu1 %v2728_v61 }
  0x64   :  { %1970 = vmatprep.subr.bf16.mxu1 %v2585_v0 }
  0x66   :  { %1950 = vmatpush1.bf16.msra.mxu0 %v2725_v59 }
  0x67   :  { %1952 = vmatprep.subr.bf16.mxu0 %v2731_v62  ;;  %1972 = vmatpush3.bf16.msra.mxu1 %v2738_v6 }
  0x68   :  { %1973 = vmatprep.subr.bf16.mxu1 %v2585_v0 }
  0x6a   :  { %1954 = vmatpush1.bf16.msra.mxu0 %v2735_v4 }
  0x6b   :  { %1980 = vmatprep.subr.bf16.mxu0 %v2673_v5  ;;  %1975 = vmatpush3.bf16.msra.mxu1 %v2746_v12 }
  0x6c   :  { %1976 = vmatprep.subr.bf16.mxu1 %v2585_v0 }
  0x6d   :  { %201 = vmatmul.mubr.f32.vlgmr.msra.gmra.mrb[0].mxu0 %v2743_v11 }
  0x6e   :  { %1982 = vmatpush1.bf16.msra.mxu0 %v2675_v9  ;;  %367 = vmatprep.mubr.f32.mxu0 %v2586_v1 }
  0x6f   :  { %1984 = vmatprep.subr.bf16.mxu0 %v2677_v10  ;;  %1978 = vmatpush3.bf16.msra.mxu1 %v2752_v17 }
  0x70   :  { %2011 = vmatprep.subr.bf16.mxu1 %v2585_v0 }
  0x72   :  { %1986 = vmatpush1.bf16.msra.mxu0 %v2681_v15  ;;  %1676 = vmatmul.mubr.f32.vlgmr.msra.gmra.mrb[0].mxu1 %v2743_v11 }
  0x73   :  { %1988 = vmatprep.subr.bf16.mxu0 %v2684_v16  ;;  %2013 = vmatpush3.bf16.msra.mxu1 %v2692_v29 }
  0x74   :  { %2014 = vmatprep.subr.bf16.mxu1 %v2585_v0  ;;  %1710 = vmatprep.mubr.msk.f32.mxu1 %vm2587_vm0, %v2586_v1 }
  0x76   :  { %1990 = vmatpush1.bf16.msra.mxu0 %v2687_v21 }
  0x77   :  { %1992 = vmatprep.subr.bf16.mxu0 %v2690_v23  ;;  %2016 = vmatpush3.bf16.msra.mxu1 %v2698_v34 }
  0x78   :  { %2017 = vmatprep.subr.bf16.mxu1 %v2585_v0 }
  0x7a   :  { %1994 = vmatpush1.bf16.msra.mxu0 %v2695_v32 }
  0x7b   :  { %1996 = vmatprep.subr.bf16.mxu0 %v2701_v35  ;;  %2019 = vmatpush3.bf16.msra.mxu1 %v2708_v43 }
  0x7c   :  { %2020 = vmatprep.subr.bf16.mxu1 %v2585_v0 }
  0x7e   :  { %1998 = vmatpush1.bf16.msra.mxu0 %v2705_v41 }
  0x7f   :  { %2000 = vmatprep.subr.bf16.mxu0 %v2711_v44  ;;  %2022 = vmatpush3.bf16.msra.mxu1 %v2718_v52 }
  0x80   :  { %2023 = vmatprep.subr.bf16.mxu1 %v2585_v0 }
  0x82   :  { %2002 = vmatpush1.bf16.msra.mxu0 %v2715_v50 }
  0x83   :  { %2004 = vmatprep.subr.bf16.mxu0 %v2721_v53  ;;  %2025 = vmatpush3.bf16.msra.mxu1 %v2728_v61 }
  0x84   :  { %2026 = vmatprep.subr.bf16.mxu1 %v2585_v0 }
  0x86   :  { %2006 = vmatpush1.bf16.msra.mxu0 %v2725_v59 }
  0x87   :  { %2008 = vmatprep.subr.bf16.mxu0 %v2731_v62  ;;  %2028 = vmatpush3.bf16.msra.mxu1 %v2738_v6 }
  0x88   :  { %2029 = vmatprep.subr.bf16.mxu1 %v2585_v0 }
  0x8a   :  { %2010 = vmatpush1.bf16.msra.mxu0 %v2735_v4 }
  0x8b   :  { %2036 = vmatprep.subr.bf16.mxu0 %v2673_v5  ;;  %2031 = vmatpush3.bf16.msra.mxu1 %v2746_v12 }
  0x8c   :  { %2032 = vmatprep.subr.bf16.mxu1 %v2585_v0 }
  0x8f   :  { %2034 = vmatpush3.bf16.msra.mxu1 %v2752_v17 }
  0x90   :  { %2067 = vmatprep.subr.bf16.mxu1 %v2585_v0 }
 0x140   :  { %v202_v19 = vpop.f32.mrb[0].mxu0 }
 0x141   :  { %v277_v20 = vadd.f32 %v202_v19, %v133_v18  ;;  %v204_v24 = vpop.f32.mrb[1].mxu0 }
 0x142   :  { %v284_v26 = vadd.f32 %v204_v24, %v134_v22  ;;  %v302_v24 = vld [vmem:[#allocation3 + $0xa0] sm:$0xff] }
 0x143   :  { %v1491_v25 = vmul.f32 -1.442695, %v277_v20 }
 0x144   :  { %v1492_v27 = vmul.f32 -1.442695, %v284_v26 }
 0x145   :  { %2381 = vpow2.f32 %v1491_v25  ;;  %v273_v28 = vpop.f32.mrb[0].mxu1 }
 0x146   :  { %v1677_v30 = vpop.f32.mrb[1].mxu1  ;;  %2383 = vpow2.f32 %v1492_v27  ;;  %v291_v39 = vadd.f32 %v273_v28, %v2793_v37 }
 0x14f   :  { %v2382_v31 = vpop.eup %2381 }
 0x150   :  { %v281_v33 = vadd.f32 1.0, %v2382_v31  ;;  %v2384_v36 = vpop.eup %2383 }
 0x151   :  { %v288_v38 = vadd.f32 1.0, %v2384_v36 }
 0x152   :  { %2385 = vrcp.f32 %v281_v33 }
 0x153   :  { %2387 = vrcp.f32 %v288_v38  ;;  %v467_v38 = vld [vmem:[#allocation3 + $0x78] sm:$0xff] }
 0x15c   :  { %v2386_v40 = vpop.eup %2385 }
 0x15d   :  { %v292_v45 = vmul.f32 %v2386_v40, %v291_v39  ;;  %v2388_v47 = vpop.eup %2387 }
 0x15e   :  { %v295_v48 = vsub.f32 1.0, %v2388_v47  ;;  %v297_v54 = vmul.f32 %v2388_v47, %v2743_v11 }
 0x15f   :  { %v293_v46 = vadd.f32 %v292_v45, %v135_v42  ;;  %v468_v45 = vld [vmem:[#allocation3 + $0x80] sm:$0xff] }
 0x161   :  { %2389 = vtanh.f32 %v293_v46 }
 0x16b   :  { %v2390_v49 = vpop.eup %2389 }
 0x16c   :  { %v296_v51 = vmul.f32 %v2390_v49, %v295_v48 }
 0x16e   :  { %v2797_v55 = vadd.f32 %v297_v54, %v296_v51 }
 0x170   :  { %368 = vmatmul.mubr.f32.vlgmr.msra.gmra.mrb[2].mxu0 %v2797_v55  ;;  %1711 = vmatmul.mubr.f32.vlgmr.msra.gmra.mrb[2].mxu1 %v2797_v55 }
 0x171   :  { %2038 = vmatpush1.bf16.msra.mxu0 %v2675_v9  ;;  %2069 = vmatpush3.bf16.msra.mxu1 %v2692_v29 }
 0x172   :  { %2040 = vmatprep.subr.bf16.mxu0 %v2677_v10  ;;  %2070 = vmatprep.subr.bf16.mxu1 %v2585_v0 }
 0x173   :  { %534 = vmatprep.mubr.f32.mxu0 %v2586_v1  ;;  %1745 = vmatprep.mubr.msk.f32.mxu1 %vm2587_vm0, %v2586_v1 }
 0x175   :  { %2042 = vmatpush1.bf16.msra.mxu0 %v2681_v15  ;;  %2072 = vmatpush3.bf16.msra.mxu1 %v2698_v34 }
 0x176   :  { %2044 = vmatprep.subr.bf16.mxu0 %v2684_v16  ;;  %2073 = vmatprep.subr.bf16.mxu1 %v2585_v0 }
 0x179   :  { %2046 = vmatpush1.bf16.msra.mxu0 %v2687_v21  ;;  %2075 = vmatpush3.bf16.msra.mxu1 %v2708_v43 }
 0x17a   :  { %2048 = vmatprep.subr.bf16.mxu0 %v2690_v23  ;;  %2076 = vmatprep.subr.bf16.mxu1 %v2585_v0 }
 0x17d   :  { %2050 = vmatpush1.bf16.msra.mxu0 %v2695_v32  ;;  %2078 = vmatpush3.bf16.msra.mxu1 %v2718_v52 }
 0x17e   :  { %2052 = vmatprep.subr.bf16.mxu0 %v2701_v35  ;;  %2079 = vmatprep.subr.bf16.mxu1 %v2585_v0 }
 0x181   :  { %2054 = vmatpush1.bf16.msra.mxu0 %v2705_v41  ;;  %2081 = vmatpush3.bf16.msra.mxu1 %v2728_v61 }
 0x182   :  { %2056 = vmatprep.subr.bf16.mxu0 %v2711_v44  ;;  %2082 = vmatprep.subr.bf16.mxu1 %v2585_v0 }
 0x185   :  { %2058 = vmatpush1.bf16.msra.mxu0 %v2715_v50  ;;  %2084 = vmatpush3.bf16.msra.mxu1 %v2738_v6 }
 0x186   :  { %2060 = vmatprep.subr.bf16.mxu0 %v2721_v53  ;;  %2085 = vmatprep.subr.bf16.mxu1 %v2585_v0 }
 0x189   :  { %2062 = vmatpush1.bf16.msra.mxu0 %v2725_v59  ;;  %2087 = vmatpush3.bf16.msra.mxu1 %v2746_v12 }
 0x18a   :  { %2064 = vmatprep.subr.bf16.mxu0 %v2731_v62  ;;  %2088 = vmatprep.subr.bf16.mxu1 %v2585_v0 }
 0x18d   :  { %2066 = vmatpush1.bf16.msra.mxu0 %v2735_v4  ;;  %2090 = vmatpush3.bf16.msra.mxu1 %v2752_v17 }
 0x18e   :  { %2092 = vmatprep.subr.bf16.mxu0 %v2673_v5  ;;  %2123 = vmatprep.subr.bf16.mxu1 %v2585_v0 }
 0x243   :  { %v369_v57 = vpop.f32.mrb[2].mxu0  ;;  %v440_v58 = vpop.f32.mrb[2].mxu1 }
 0x244   :  { %v444_v60 = vadd.f32 %v369_v57, %v300_v56  ;;  %v371_v2 = vpop.f32.mrb[3].mxu0  ;;  %v1712_v3 = vpop.f32.mrb[3].mxu1  ;;  %v458_v20 = vadd.f32 %v440_v58, %v2793_v37 }
 0x245   :  { %v451_v8 = vadd.f32 %v371_v2, %v301_v63  ;;  %v469_v63 = vld [vmem:[#allocation3 + $0x88] sm:$0xff] }
 0x246   :  { %v1493_v7 = vmul.f32 -1.442695, %v444_v60 }
 0x247   :  { %v1494_v11 = vmul.f32 -1.442695, %v451_v8 }
 0x248   :  { %2391 = vpow2.f32 %v1493_v7 }
 0x249   :  { %2393 = vpow2.f32 %v1494_v11 }
 0x252   :  { %v2392_v13 = vpop.eup %2391 }
 0x253   :  { %v448_v14 = vadd.f32 1.0, %v2392_v13  ;;  %v2394_v18 = vpop.eup %2393 }
 0x254   :  { %v455_v19 = vadd.f32 1.0, %v2394_v18 }
 0x255   :  { %2395 = vrcp.f32 %v448_v14 }
 0x256   :  { %2397 = vrcp.f32 %v455_v19  ;;  %v634_v19 = vld [vmem:[#allocation3 + $0x60] sm:$0xff] }
 0x25f   :  { %v2396_v22 = vpop.eup %2395 }
 0x260   :  { %v459_v25 = vmul.f32 %v2396_v22, %v458_v20  ;;  %v2398_v27 = vpop.eup %2397 }
 0x261   :  { %v462_v28 = vsub.f32 1.0, %v2398_v27  ;;  %v464_v33 = vmul.f32 %v2398_v27, %v2797_v55 }
 0x262   :  { %v460_v26 = vadd.f32 %v459_v25, %v302_v24  ;;  %v635_v25 = vld [vmem:[#allocation3 + $0x68] sm:$0xff] }
 0x264   :  { %2399 = vtanh.f32 %v460_v26 }
 0x26e   :  { %v2400_v30 = vpop.eup %2399 }
 0x26f   :  { %v463_v31 = vmul.f32 %v2400_v30, %v462_v28 }
 0x271   :  { %v2838_v36 = vadd.f32 %v464_v33, %v463_v31 }
 0x273   :  { %535 = vmatmul.mubr.f32.vlgmr.msra.gmra.mrb[4].mxu0 %v2838_v36  ;;  %1746 = vmatmul.mubr.f32.vlgmr.msra.gmra.mrb[4].mxu1 %v2838_v36 }
 0x274   :  { %2094 = vmatpush1.bf16.msra.mxu0 %v2675_v9  ;;  %2125 = vmatpush3.bf16.msra.mxu1 %v2692_v29 }
 0x275   :  { %2096 = vmatprep.subr.bf16.mxu0 %v2677_v10  ;;  %2126 = vmatprep.subr.bf16.mxu1 %v2585_v0 }
 0x276   :  { %701 = vmatprep.mubr.f32.mxu0 %v2586_v1  ;;  %1780 = vmatprep.mubr.msk.f32.mxu1 %vm2587_vm0, %v2586_v1 }
 0x278   :  { %2098 = vmatpush1.bf16.msra.mxu0 %v2681_v15  ;;  %2128 = vmatpush3.bf16.msra.mxu1 %v2698_v34 }
 0x279   :  { %2100 = vmatprep.subr.bf16.mxu0 %v2684_v16  ;;  %2129 = vmatprep.subr.bf16.mxu1 %v2585_v0 }
 0x27c   :  { %2102 = vmatpush1.bf16.msra.mxu0 %v2687_v21  ;;  %2131 = vmatpush3.bf16.msra.mxu1 %v2708_v43 }
 0x27d   :  { %2104 = vmatprep.subr.bf16.mxu0 %v2690_v23  ;;  %2132 = vmatprep.subr.bf16.mxu1 %v2585_v0 }
 0x280   :  { %2106 = vmatpush1.bf16.msra.mxu0 %v2695_v32  ;;  %2134 = vmatpush3.bf16.msra.mxu1 %v2718_v52 }
 0x281   :  { %2108 = vmatprep.subr.bf16.mxu0 %v2701_v35  ;;  %2135 = vmatprep.subr.bf16.mxu1 %v2585_v0 }
 0x284   :  { %2110 = vmatpush1.bf16.msra.mxu0 %v2705_v41  ;;  %2137 = vmatpush3.bf16.msra.mxu1 %v2728_v61 }
 0x285   :  { %2112 = vmatprep.subr.bf16.mxu0 %v2711_v44  ;;  %2138 = vmatprep.subr.bf16.mxu1 %v2585_v0 }
 0x288   :  { %2114 = vmatpush1.bf16.msra.mxu0 %v2715_v50  ;;  %2140 = vmatpush3.bf16.msra.mxu1 %v2738_v6 }
 0x289   :  { %2116 = vmatprep.subr.bf16.mxu0 %v2721_v53  ;;  %2141 = vmatprep.subr.bf16.mxu1 %v2585_v0 }
 0x28c   :  { %2118 = vmatpush1.bf16.msra.mxu0 %v2725_v59  ;;  %2143 = vmatpush3.bf16.msra.mxu1 %v2746_v12 }
 0x28d   :  { %2120 = vmatprep.subr.bf16.mxu0 %v2731_v62  ;;  %2144 = vmatprep.subr.bf16.mxu1 %v2585_v0 }
 0x290   :  { %2122 = vmatpush1.bf16.msra.mxu0 %v2735_v4  ;;  %2146 = vmatpush3.bf16.msra.mxu1 %v2752_v17 }
 0x291   :  { %2148 = vmatprep.subr.bf16.mxu0 %v2673_v5  ;;  %2179 = vmatprep.subr.bf16.mxu1 %v2585_v0 }
 0x346   :  { %v536_v39 = vpop.f32.mrb[4].mxu0  ;;  %v607_v40 = vpop.f32.mrb[4].mxu1 }
 0x347   :  { %v611_v42 = vadd.f32 %v536_v39, %v467_v38  ;;  %v538_v46 = vpop.f32.mrb[5].mxu0  ;;  %v1747_v47 = vpop.f32.mrb[5].mxu1  ;;  %v625_v58 = vadd.f32 %v607_v40, %v2793_v37 }
 0x348   :  { %v618_v49 = vadd.f32 %v538_v46, %v468_v45  ;;  %v636_v45 = vld [vmem:[#allocation3 + $0x70] sm:$0xff] }
 0x349   :  { %v1495_v48 = vmul.f32 -1.442695, %v611_v42 }
 0x34a   :  { %v1496_v51 = vmul.f32 -1.442695, %v618_v49 }
 0x34b   :  { %2401 = vpow2.f32 %v1495_v48 }
 0x34c   :  { %2403 = vpow2.f32 %v1496_v51 }
 0x355   :  { %v2402_v54 = vpop.eup %2401 }
 0x356   :  { %v615_v55 = vadd.f32 1.0, %v2402_v54  ;;  %v2404_v56 = vpop.eup %2403 }
 0x357   :  { %v622_v57 = vadd.f32 1.0, %v2404_v56 }
 0x358   :  { %2405 = vrcp.f32 %v615_v55 }
 0x359   :  { %2407 = vrcp.f32 %v622_v57  ;;  %v801_v57 = vld [vmem:[#allocation3 + $0x48] sm:$0xff] }
 0x362   :  { %v2406_v60 = vpop.eup %2405 }
 0x363   :  { %v626_v2 = vmul.f32 %v2406_v60, %v625_v58  ;;  %v2408_v7 = vpop.eup %2407 }
 0x364   :  { %v629_v8 = vsub.f32 1.0, %v2408_v7  ;;  %v631_v14 = vmul.f32 %v2408_v7, %v2838_v36 }
 0x365   :  { %v627_v3 = vadd.f32 %v626_v2, %v469_v63  ;;  %v802_v2 = vld [vmem:[#allocation3 + $0x50] sm:$0xff] }
 0x367   :  { %2409 = vtanh.f32 %v627_v3 }
 0x371   :  { %v2410_v11 = vpop.eup %2409 }
 0x372   :  { %v630_v13 = vmul.f32 %v2410_v11, %v629_v8 }
 0x374   :  { %v2879_v18 = vadd.f32 %v631_v14, %v630_v13 }
 0x376   :  { %702 = vmatmul.mubr.f32.vlgmr.msra.gmra.mrb[6].mxu0 %v2879_v18  ;;  %1781 = vmatmul.mubr.f32.vlgmr.msra.gmra.mrb[6].mxu1 %v2879_v18 }
 0x377   :  { %2150 = vmatpush1.bf16.msra.mxu0 %v2675_v9  ;;  %2181 = vmatpush3.bf16.msra.mxu1 %v2692_v29 }
 0x378   :  { %2152 = vmatprep.subr.bf16.mxu0 %v2677_v10  ;;  %2182 = vmatprep.subr.bf16.mxu1 %v2585_v0 }
 0x379   :  { %868 = vmatprep.mubr.f32.mxu0 %v2586_v1  ;;  %1815 = vmatprep.mubr.msk.f32.mxu1 %vm2587_vm0, %v2586_v1 }
 0x37b   :  { %2154 = vmatpush1.bf16.msra.mxu0 %v2681_v15  ;;  %2184 = vmatpush3.bf16.msra.mxu1 %v2698_v34 }
 0x37c   :  { %2156 = vmatprep.subr.bf16.mxu0 %v2684_v16  ;;  %2185 = vmatprep.subr.bf16.mxu1 %v2585_v0 }
 0x37f   :  { %2158 = vmatpush1.bf16.msra.mxu0 %v2687_v21  ;;  %2187 = vmatpush3.bf16.msra.mxu1 %v2708_v43 }
 0x380   :  { %2160 = vmatprep.subr.bf16.mxu0 %v2690_v23  ;;  %2188 = vmatprep.subr.bf16.mxu1 %v2585_v0 }
 0x383   :  { %2162 = vmatpush1.bf16.msra.mxu0 %v2695_v32  ;;  %2190 = vmatpush3.bf16.msra.mxu1 %v2718_v52 }
 0x384   :  { %2164 = vmatprep.subr.bf16.mxu0 %v2701_v35  ;;  %2191 = vmatprep.subr.bf16.mxu1 %v2585_v0 }
 0x387   :  { %2166 = vmatpush1.bf16.msra.mxu0 %v2705_v41  ;;  %2193 = vmatpush3.bf16.msra.mxu1 %v2728_v61 }
 0x388   :  { %2168 = vmatprep.subr.bf16.mxu0 %v2711_v44  ;;  %2194 = vmatprep.subr.bf16.mxu1 %v2585_v0 }
 0x38b   :  { %2170 = vmatpush1.bf16.msra.mxu0 %v2715_v50  ;;  %2196 = vmatpush3.bf16.msra.mxu1 %v2738_v6 }
 0x38c   :  { %2172 = vmatprep.subr.bf16.mxu0 %v2721_v53  ;;  %2197 = vmatprep.subr.bf16.mxu1 %v2585_v0 }
 0x38f   :  { %2174 = vmatpush1.bf16.msra.mxu0 %v2725_v59  ;;  %2199 = vmatpush3.bf16.msra.mxu1 %v2746_v12 }
 0x390   :  { %2176 = vmatprep.subr.bf16.mxu0 %v2731_v62  ;;  %2200 = vmatprep.subr.bf16.mxu1 %v2585_v0 }
 0x393   :  { %2178 = vmatpush1.bf16.msra.mxu0 %v2735_v4  ;;  %2202 = vmatpush3.bf16.msra.mxu1 %v2752_v17 }
 0x394   :  { %2204 = vmatprep.subr.bf16.mxu0 %v2673_v5  ;;  %2235 = vmatprep.subr.bf16.mxu1 %v2585_v0 }
 0x449   :  { %v703_v20 = vpop.f32.mrb[6].mxu0  ;;  %v774_v22 = vpop.f32.mrb[6].mxu1 }
 0x44a   :  { %v778_v24 = vadd.f32 %v703_v20, %v634_v19  ;;  %v705_v26 = vpop.f32.mrb[7].mxu0  ;;  %v1782_v27 = vpop.f32.mrb[7].mxu1  ;;  %v792_v40 = vadd.f32 %v774_v22, %v2793_v37 }
 0x44b   :  { %v785_v30 = vadd.f32 %v705_v26, %v635_v25  ;;  %v803_v25 = vld [vmem:[#allocation3 + $0x58] sm:$0xff] }
 0x44c   :  { %v1497_v28 = vmul.f32 -1.442695, %v778_v24 }
 0x44d   :  { %v1498_v31 = vmul.f32 -1.442695, %v785_v30 }
 0x44e   :  { %2411 = vpow2.f32 %v1497_v28 }
 0x44f   :  { %2413 = vpow2.f32 %v1498_v31 }
 0x458   :  { %v2412_v33 = vpop.eup %2411 }
 0x459   :  { %v782_v36 = vadd.f32 1.0, %v2412_v33  ;;  %v2414_v38 = vpop.eup %2413 }
 0x45a   :  { %v789_v39 = vadd.f32 1.0, %v2414_v38 }
 0x45b   :  { %2415 = vrcp.f32 %v782_v36 }
 0x45c   :  { %2417 = vrcp.f32 %v789_v39  ;;  %v968_v39 = vld [vmem:[#allocation3 + $0x30] sm:$0xff] }
 0x465   :  { %v2416_v42 = vpop.eup %2415 }
 0x466   :  { %v793_v46 = vmul.f32 %v2416_v42, %v792_v40  ;;  %v2418_v48 = vpop.eup %2417 }
 0x467   :  { %v796_v49 = vsub.f32 1.0, %v2418_v48  ;;  %v798_v55 = vmul.f32 %v2418_v48, %v2879_v18 }
 0x468   :  { %v794_v47 = vadd.f32 %v793_v46, %v636_v45  ;;  %v969_v46 = vld [vmem:[#allocation3 + $0x38] sm:$0xff] }
 0x46a   :  { %2419 = vtanh.f32 %v794_v47 }
 0x474   :  { %v2420_v51 = vpop.eup %2419 }
 0x475   :  { %v797_v54 = vmul.f32 %v2420_v51, %v796_v49 }
 0x477   :  { %v2920_v56 = vadd.f32 %v798_v55, %v797_v54 }
 0x479   :  { %869 = vmatmul.mubr.f32.vlgmr.msra.gmra.mrb[8].mxu0 %v2920_v56  ;;  %1816 = vmatmul.mubr.f32.vlgmr.msra.gmra.mrb[8].mxu1 %v2920_v56 }
 0x47a   :  { %2206 = vmatpush1.bf16.msra.mxu0 %v2675_v9  ;;  %2237 = vmatpush3.bf16.msra.mxu1 %v2692_v29 }
 0x47b   :  { %2208 = vmatprep.subr.bf16.mxu0 %v2677_v10  ;;  %2238 = vmatprep.subr.bf16.mxu1 %v2585_v0 }
 0x47c   :  { %1035 = vmatprep.mubr.f32.mxu0 %v2586_v1  ;;  %1850 = vmatprep.mubr.msk.f32.mxu1 %vm2587_vm0, %v2586_v1 }
 0x47e   :  { %2210 = vmatpush1.bf16.msra.mxu0 %v2681_v15  ;;  %2240 = vmatpush3.bf16.msra.mxu1 %v2698_v34 }
 0x47f   :  { %2212 = vmatprep.subr.bf16.mxu0 %v2684_v16  ;;  %2241 = vmatprep.subr.bf16.mxu1 %v2585_v0 }
 0x482   :  { %2214 = vmatpush1.bf16.msra.mxu0 %v2687_v21  ;;  %2243 = vmatpush3.bf16.msra.mxu1 %v2708_v43 }
 0x483   :  { %2216 = vmatprep.subr.bf16.mxu0 %v2690_v23  ;;  %2244 = vmatprep.subr.bf16.mxu1 %v2585_v0 }
 0x486   :  { %2218 = vmatpush1.bf16.msra.mxu0 %v2695_v32  ;;  %2246 = vmatpush3.bf16.msra.mxu1 %v2718_v52 }
 0x487   :  { %2220 = vmatprep.subr.bf16.mxu0 %v2701_v35  ;;  %2247 = vmatprep.subr.bf16.mxu1 %v2585_v0 }
 0x48a   :  { %2222 = vmatpush1.bf16.msra.mxu0 %v2705_v41  ;;  %2249 = vmatpush3.bf16.msra.mxu1 %v2728_v61 }
 0x48b   :  { %2224 = vmatprep.subr.bf16.mxu0 %v2711_v44  ;;  %2250 = vmatprep.subr.bf16.mxu1 %v2585_v0 }
 0x48e   :  { %2226 = vmatpush1.bf16.msra.mxu0 %v2715_v50  ;;  %2252 = vmatpush3.bf16.msra.mxu1 %v2738_v6 }
 0x48f   :  { %2228 = vmatprep.subr.bf16.mxu0 %v2721_v53  ;;  %2253 = vmatprep.subr.bf16.mxu1 %v2585_v0 }
 0x492   :  { %2230 = vmatpush1.bf16.msra.mxu0 %v2725_v59  ;;  %2255 = vmatpush3.bf16.msra.mxu1 %v2746_v12 }
 0x493   :  { %2232 = vmatprep.subr.bf16.mxu0 %v2731_v62  ;;  %2256 = vmatprep.subr.bf16.mxu1 %v2585_v0 }
 0x496   :  { %2234 = vmatpush1.bf16.msra.mxu0 %v2735_v4  ;;  %2258 = vmatpush3.bf16.msra.mxu1 %v2752_v17 }
 0x497   :  { %2260 = vmatprep.subr.bf16.mxu0 %v2673_v5  ;;  %2291 = vmatprep.subr.bf16.mxu1 %v2585_v0 }
 0x54c   :  { %v870_v58 = vpop.f32.mrb[8].mxu0  ;;  %v941_v60 = vpop.f32.mrb[8].mxu1 }
 0x54d   :  { %v945_v63 = vadd.f32 %v870_v58, %v801_v57  ;;  %v872_v3 = vpop.f32.mrb[9].mxu0  ;;  %v1817_v7 = vpop.f32.mrb[9].mxu1  ;;  %v959_v22 = vadd.f32 %v941_v60, %v2793_v37 }
 0x54e   :  { %v952_v11 = vadd.f32 %v872_v3, %v802_v2 }
 0x54f   :  { %v1499_v8 = vmul.f32 -1.442695, %v945_v63  ;;  %v970_v63 = vld [vmem:[#allocation3 + $0x40] sm:$0xff] }
 0x550   :  { %v1500_v13 = vmul.f32 -1.442695, %v952_v11 }
 0x551   :  { %2421 = vpow2.f32 %v1499_v8 }
 0x552   :  { %2423 = vpow2.f32 %v1500_v13 }
 0x55b   :  { %v2422_v14 = vpop.eup %2421 }
 0x55c   :  { %v949_v18 = vadd.f32 1.0, %v2422_v14  ;;  %v2424_v19 = vpop.eup %2423 }
 0x55d   :  { %v956_v20 = vadd.f32 1.0, %v2424_v19  ;;  %v1301_v19 = vld [vmem:[#allocation3] sm:$0xff] }
 0x55e   :  { %2425 = vrcp.f32 %v949_v18 }
 0x55f   :  { %2427 = vrcp.f32 %v956_v20 }
 0x568   :  { %v2426_v24 = vpop.eup %2425 }
 0x569   :  { %v960_v26 = vmul.f32 %v2426_v24, %v959_v22  ;;  %v2428_v28 = vpop.eup %2427 }
 0x56a   :  { %v963_v30 = vsub.f32 1.0, %v2428_v28  ;;  %v965_v36 = vmul.f32 %v2428_v28, %v2920_v56 }
 0x56b   :  { %v961_v27 = vadd.f32 %v960_v26, %v803_v25  ;;  %v1302_v25 = vld [vmem:[#allocation3 + $0x8] sm:$0xff] }
 0x56d   :  { %2429 = vtanh.f32 %v961_v27 }
 0x577   :  { %v2430_v31 = vpop.eup %2429 }
 0x578   :  { %v964_v33 = vmul.f32 %v2430_v31, %v963_v30 }
 0x57a   :  { %v2961_v38 = vadd.f32 %v965_v36, %v964_v33 }
 0x57c   :  { %1036 = vmatmul.mubr.f32.vlgmr.msra.gmra.mrb[10].mxu0 %v2961_v38  ;;  %1851 = vmatmul.mubr.f32.vlgmr.msra.gmra.mrb[10].mxu1 %v2961_v38 }
 0x57d   :  { %2262 = vmatpush1.bf16.msra.mxu0 %v2675_v9  ;;  %2293 = vmatpush3.bf16.msra.mxu1 %v2692_v29 }
 0x57e   :  { %2264 = vmatprep.subr.bf16.mxu0 %v2677_v10  ;;  %2294 = vmatprep.subr.bf16.mxu1 %v2585_v0 }
 0x57f   :  { %1202 = vmatprep.mubr.f32.mxu0 %v2586_v1  ;;  %1885 = vmatprep.mubr.msk.f32.mxu1 %vm2587_vm0, %v2586_v1 }
 0x581   :  { %2266 = vmatpush1.bf16.msra.mxu0 %v2681_v15  ;;  %2296 = vmatpush3.bf16.msra.mxu1 %v2698_v34 }
 0x582   :  { %2268 = vmatprep.subr.bf16.mxu0 %v2684_v16  ;;  %2297 = vmatprep.subr.bf16.mxu1 %v2585_v0 }
 0x585   :  { %2270 = vmatpush1.bf16.msra.mxu0 %v2687_v21  ;;  %2299 = vmatpush3.bf16.msra.mxu1 %v2708_v43 }
 0x586   :  { %2272 = vmatprep.subr.bf16.mxu0 %v2690_v23  ;;  %2300 = vmatprep.subr.bf16.mxu1 %v2585_v0 }
 0x589   :  { %2274 = vmatpush1.bf16.msra.mxu0 %v2695_v32  ;;  %2302 = vmatpush3.bf16.msra.mxu1 %v2718_v52 }
 0x58a   :  { %2276 = vmatprep.subr.bf16.mxu0 %v2701_v35  ;;  %2303 = vmatprep.subr.bf16.mxu1 %v2585_v0 }
 0x58d   :  { %2278 = vmatpush1.bf16.msra.mxu0 %v2705_v41  ;;  %2305 = vmatpush3.bf16.msra.mxu1 %v2728_v61 }
 0x58e   :  { %2280 = vmatprep.subr.bf16.mxu0 %v2711_v44  ;;  %2306 = vmatprep.subr.bf16.mxu1 %v2585_v0 }
 0x591   :  { %2282 = vmatpush1.bf16.msra.mxu0 %v2715_v50  ;;  %2308 = vmatpush3.bf16.msra.mxu1 %v2738_v6 }
 0x592   :  { %2284 = vmatprep.subr.bf16.mxu0 %v2721_v53  ;;  %2309 = vmatprep.subr.bf16.mxu1 %v2585_v0 }
 0x595   :  { %2286 = vmatpush1.bf16.msra.mxu0 %v2725_v59  ;;  %2311 = vmatpush3.bf16.msra.mxu1 %v2746_v12 }
 0x596   :  { %2288 = vmatprep.subr.bf16.mxu0 %v2731_v62  ;;  %2312 = vmatprep.subr.bf16.mxu1 %v2585_v0 }
 0x599   :  { %2290 = vmatpush1.bf16.msra.mxu0 %v2735_v4  ;;  %2314 = vmatpush3.bf16.msra.mxu1 %v2752_v17 }
 0x59a   :  { %2316 = vmatprep.subr.bf16.mxu0 %v2673_v5  ;;  %2347 = vmatprep.subr.bf16.mxu1 %v2585_v0 }
 0x64f   :  { %v1037_v40 = vpop.f32.mrb[10].mxu0  ;;  %v1108_v42 = vpop.f32.mrb[10].mxu1 }
 0x650   :  { %v1112_v45 = vadd.f32 %v1037_v40, %v968_v39  ;;  %v1039_v47 = vpop.f32.mrb[11].mxu0  ;;  %v1852_v48 = vpop.f32.mrb[11].mxu1  ;;  %v1126_v5 = vadd.f32 %v1108_v42, %v2793_v37 }
 0x651   :  { %v1119_v51 = vadd.f32 %v1039_v47, %v969_v46 }
 0x652   :  { %v1501_v49 = vmul.f32 -1.442695, %v1112_v45  ;;  %v1303_v45 = vld [vmem:[#allocation3 + $0x10] sm:$0xff] }
 0x653   :  { %v1502_v54 = vmul.f32 -1.442695, %v1119_v51 }
 0x654   :  { %2431 = vpow2.f32 %v1501_v49 }
 0x655   :  { %2433 = vpow2.f32 %v1502_v54 }
 0x65e   :  { %v2432_v55 = vpop.eup %2431 }
 0x65f   :  { %v1116_v56 = vadd.f32 1.0, %v2432_v55  ;;  %v2434_v57 = vpop.eup %2433 }
 0x660   :  { %v1123_v58 = vadd.f32 1.0, %v2434_v57 }
 0x661   :  { %2435 = vrcp.f32 %v1116_v56 }
 0x662   :  { %2437 = vrcp.f32 %v1123_v58 }
 0x66b   :  { %v2436_v60 = vpop.eup %2435 }
 0x66c   :  { %v1127_v2 = vmul.f32 %v2436_v60, %v1126_v5  ;;  %v2438_v7 = vpop.eup %2437 }
 0x66d   :  { %v1130_v8 = vsub.f32 1.0, %v2438_v7  ;;  %v1132_v14 = vmul.f32 %v2438_v7, %v2961_v38 }
 0x66e   :  { %v1128_v3 = vadd.f32 %v1127_v2, %v970_v63 }
 0x670   :  { %2439 = vtanh.f32 %v1128_v3 }
 0x67a   :  { %v2440_v11 = vpop.eup %2439 }
 0x67b   :  { %v1131_v13 = vmul.f32 %v2440_v11, %v1130_v8 }
 0x67d   :  { %v3002_v18 = vadd.f32 %v1132_v14, %v1131_v13 }
 0x67f   :  { %1203 = vmatmul.mubr.f32.vlgmr.msra.gmra.mrb[12].mxu0 %v3002_v18  ;;  %1886 = vmatmul.mubr.f32.vlgmr.msra.gmra.mrb[12].mxu1 %v3002_v18 }
 0x680   :  { %2318 = vmatpush1.bf16.msra.mxu0 %v2675_v9  ;;  %2349 = vmatpush3.bf16.msra.mxu1 %v2692_v29 }
 0x681   :  { %2320 = vmatprep.subr.bf16.mxu0 %v2677_v10  ;;  %2350 = vmatprep.subr.bf16.mxu1 %v2585_v0 }
 0x682   :  { %1368 = vmatprep.mubr.f32.mxu0 %v2586_v1  ;;  %1920 = vmatprep.mubr.msk.f32.mxu1 %vm2587_vm0, %v2586_v1  ;;  %v1135_v1 = vld [vmem:[#allocation3 + $0x18] sm:$0xff] }
 0x684   :  { %2322 = vmatpush1.bf16.msra.mxu0 %v2681_v15  ;;  %2352 = vmatpush3.bf16.msra.mxu1 %v2698_v34 }
 0x685   :  { %2324 = vmatprep.subr.bf16.mxu0 %v2684_v16  ;;  %2353 = vmatprep.subr.bf16.mxu1 %v2585_v0  ;;  %v1136_v16 = vld [vmem:[#allocation3 + $0x20] sm:$0xff] }
 0x688   :  { %2326 = vmatpush1.bf16.msra.mxu0 %v2687_v21  ;;  %2355 = vmatpush3.bf16.msra.mxu1 %v2708_v43 }
 0x689   :  { %2328 = vmatprep.subr.bf16.mxu0 %v2690_v23  ;;  %2356 = vmatprep.subr.bf16.mxu1 %v2585_v0 }
 0x68c   :  { %2330 = vmatpush1.bf16.msra.mxu0 %v2695_v32  ;;  %2358 = vmatpush3.bf16.msra.mxu1 %v2718_v52  ;;  %v1137_v52 = vld [vmem:[#allocation3 + $0x28] sm:$0xff] }
 0x68d   :  { %2332 = vmatprep.subr.bf16.mxu0 %v2701_v35  ;;  %2359 = vmatprep.subr.bf16.mxu1 %v2585_v0 }
 0x690   :  { %2334 = vmatpush1.bf16.msra.mxu0 %v2705_v41  ;;  %2361 = vmatpush3.bf16.msra.mxu1 %v2728_v61 }
 0x691   :  { %2336 = vmatprep.subr.bf16.mxu0 %v2711_v44  ;;  %2362 = vmatprep.subr.bf16.mxu1 %v2585_v0 }
 0x694   :  { %2338 = vmatpush1.bf16.msra.mxu0 %v2715_v50  ;;  %2364 = vmatpush3.bf16.msra.mxu1 %v2738_v6 }
 0x695   :  { %2340 = vmatprep.subr.bf16.mxu0 %v2721_v53  ;;  %2365 = vmatprep.subr.bf16.mxu1 %v2585_v0 }
 0x698   :  { %2342 = vmatpush1.bf16.msra.mxu0 %v2725_v59  ;;  %2367 = vmatpush3.bf16.msra.mxu1 %v2746_v12 }
 0x699   :  { %2344 = vmatprep.subr.bf16.mxu0 %v2731_v62  ;;  %2368 = vmatprep.subr.bf16.mxu1 %v2585_v0 }
 0x69c   :  { %2346 = vmatpush1.bf16.msra.mxu0 %v2735_v4  ;;  %2370 = vmatpush3.bf16.msra.mxu1 %v2752_v17 }
 0x752   :  { %v1204_v9 = vpop.f32.mrb[12].mxu0  ;;  %v1275_v10 = vpop.f32.mrb[12].mxu1 }
 0x753   :  { %v1279_v15 = vadd.f32 %v1204_v9, %v1135_v1  ;;  %v1206_v21 = vpop.f32.mrb[13].mxu0  ;;  %v1887_v23 = vpop.f32.mrb[13].mxu1  ;;  %v1293_v44 = vadd.f32 %v1275_v10, %v2793_v37 }
 0x754   :  { %v1286_v32 = vadd.f32 %v1206_v21, %v1136_v16 }
 0x755   :  { %v1503_v29 = vmul.f32 -1.442695, %v1279_v15 }
 0x756   :  { %v1504_v34 = vmul.f32 -1.442695, %v1286_v32 }
 0x757   :  { %2441 = vpow2.f32 %v1503_v29 }
 0x758   :  { %2443 = vpow2.f32 %v1504_v34 }
 0x761   :  { %v2442_v35 = vpop.eup %2441 }
 0x762   :  { %v1283_v41 = vadd.f32 1.0, %v2442_v35  ;;  %v2444_v0 = vpop.eup %2443 }
 0x763   :  { %v1290_v43 = vadd.f32 1.0, %v2444_v0 }
 0x764   :  { %2445 = vrcp.f32 %v1283_v41 }
 0x765   :  { %2447 = vrcp.f32 %v1290_v43 }
 0x76e   :  { %v2446_v50 = vpop.eup %2445 }
 0x76f   :  { %v1294_v53 = vmul.f32 %v2446_v50, %v1293_v44  ;;  %v2448_v61 = vpop.eup %2447 }
 0x770   :  { %v1297_v62 = vsub.f32 1.0, %v2448_v61  ;;  %v1299_v12 = vmul.f32 %v2448_v61, %v3002_v18 }
 0x771   :  { %v1295_v59 = vadd.f32 %v1294_v53, %v1137_v52 }
 0x773   :  { %2449 = vtanh.f32 %v1295_v59 }
 0x77d   :  { %v2450_v4 = vpop.eup %2449 }
 0x77e   :  { %v1298_v6 = vmul.f32 %v2450_v4, %v1297_v62 }
 0x780   :  { %v1300_v17 = vadd.f32 %v1299_v12, %v1298_v6 }
 0x782   :  { %1369 = vmatmul.mubr.f32.vlgmr.msra.gmra.mrb[14].mxu0 %v1300_v17  ;;  %1921 = vmatmul.mubr.f32.vlgmr.msra.gmra.mrb[14].mxu1 %v1300_v17 }
 0x855   :  { %v1370_v20 = vpop.f32.mrb[14].mxu0  ;;  %v1441_v22 = vpop.f32.mrb[14].mxu1 }
 0x856   :  { %v1445_v24 = vadd.f32 %v1370_v20, %v1301_v19  ;;  %v1372_v26 = vpop.f32.mrb[15].mxu0  ;;  %v1922_v27 = vpop.f32.mrb[15].mxu1  ;;  %v1459_v40 = vadd.f32 %v1441_v22, %v2793_v37 }
 0x857   :  { %v1452_v30 = vadd.f32 %v1372_v26, %v1302_v25 }
 0x858   :  { %v1505_v28 = vmul.f32 -1.442695, %v1445_v24 }
 0x859   :  { %v1506_v31 = vmul.f32 -1.442695, %v1452_v30 }
 0x85a   :  { %2451 = vpow2.f32 %v1505_v28 }
 0x85b   :  { %2453 = vpow2.f32 %v1506_v31 }
 0x864   :  { %v2452_v33 = vpop.eup %2451 }
 0x865   :  { %v1449_v36 = vadd.f32 1.0, %v2452_v33  ;;  %v2454_v38 = vpop.eup %2453 }
 0x866   :  { %v1456_v39 = vadd.f32 1.0, %v2454_v38 }
 0x867   :  { %2455 = vrcp.f32 %v1449_v36 }
 0x868   :  { %2457 = vrcp.f32 %v1456_v39 }
 0x871   :  { %v2456_v42 = vpop.eup %2455 }
 0x872   :  { %v1460_v46 = vmul.f32 %v2456_v42, %v1459_v40  ;;  %v2458_v48 = vpop.eup %2457 }
 0x873   :  { %v1463_v49 = vsub.f32 1.0, %v2458_v48  ;;  %v1465_v55 = vmul.f32 %v2458_v48, %v1300_v17 }
 0x874   :  { %v1461_v47 = vadd.f32 %v1460_v46, %v1303_v45 }
 0x876   :  { %2459 = vtanh.f32 %v1461_v47 }
 0x880   :  { %v2460_v51 = vpop.eup %2459 }
 0x881   :  { %v1464_v54 = vmul.f32 %v2460_v51, %v1463_v49 }
 0x883   :  { %v1466_v56 = vadd.f32 %v1465_v55, %v1464_v54 }
 0x885   :  { %1471 = vst [vmem:[#allocation11] sm:$0xff] %v1466_v56 }
 0x886   :  { %2560 = shalt.err (!%p2557_p8)
}
 0x887   :  { %s2561_s13 = scalar_lea.hbm %s3058_s4, 128 }
 0x888   :  { %p2562_p9 = scmp.ne.s32.totalorder %s3058_s4, %s2561_s13  ;;  %p2565_p10 = scmp.lt.u32.totalorder %s2561_s13, %s3058_s4 }
 0x88a   :  { %p2567_p11 = pnand %p2565_p10, %p2562_p9 }
 0x88c   :  { %2570 = shalt.err (!%p2567_p11)
}
 0x88d   :  { %1481 = dma.vmem_to_hbm [thread:$0]  %s1479_s10, 128, %s3058_s4, [#allocation5]  }
 0x88e   :  { %2577 = dma.done.wait [#allocation5], 128  }
 0x88f   :  { %2578 = vsyncadd [#allocation5], 4294967168 }
 0x890   :  { %1485 = vsyncpa [#allocation4], 1 }
 0x891   :  { %1486 = vsyncpa [#allocation7], 1 }
 0x892   :  { %1487 = vsyncpa [#allocation10], 1 }
 0x893   :  { %1488 = vsyncpa [#allocation5], 1 }

</bundles_post_ra>
